<compile_context>
chip_gen: v5e
topology: v5e:2x2
jax: 0.10.0
libtpu: 0.0.40
codegen_flags: <defaults>
</compile_context>

<pallas_src>
import functools

import jax
import jax.numpy as jnp
import numpy as np
from jax.experimental import pallas as pl
from jax.experimental.pallas import tpu as pltpu

EPS = 1e-5


def _bottleneck_kernel(stride, has_ds, H, W, Cin, P,
                       x_ref, w1_ref, b1_ref, w2_ref, b2_ref, w3_ref, b3_ref,
                       o_ref, pad_ref):
    """One grid step = one image of the batch, entirely in VMEM."""
    Cout = 4 * P
    Hp, Wp = H // stride, W // stride

    x = x_ref[0]                                           # (H, W, Cin) bf16

    # ---- conv1 (1x1, BN scale folded into weight) + bias + relu ----
    h = jnp.dot(x.reshape(H * W, Cin), w1_ref[...],
                preferred_element_type=jnp.float32)        # (H*W, P) f32
    h = jnp.maximum(h + b1_ref[...], 0.0)

    # ---- conv2 (3x3, padding=1) via halo scratch + channel-axis im2col ----
    # Zero the whole padded scratch each step (cheap, and safe regardless of
    # how the "parallel" batch axis is split across cores), then write the
    # interior; the border stays zero = the conv padding.
    pad_ref[...] = jnp.zeros((H + 2, W + 2, P), pad_ref.dtype)
    pad_ref[1:H + 1, 1:W + 1, :] = h.reshape(H, W, P).astype(pad_ref.dtype)

    acc = jnp.zeros((H * W, P), jnp.float32)
    for kh in range(3):
        # Concatenate the three kw-shifted slabs on the lane (channel) axis:
        # one matmul per kh with contraction dim 3*P.
        cols = jnp.concatenate(
            [pad_ref[kh:kh + H, 0:W, :],
             pad_ref[kh:kh + H, 1:W + 1, :],
             pad_ref[kh:kh + H, 2:W + 2, :]],
            axis=-1).reshape(H * W, 3 * P)                 # bf16
        acc = acc + jnp.dot(cols, w2_ref[kh],
                            preferred_element_type=jnp.float32)
    h = jnp.maximum(acc + b2_ref[...], 0.0).reshape(H, W, P)

    # ---- avgpool(stride) (identity if stride == 1) ----
    if stride > 1:
        h = h.reshape(Hp, stride, W, P).mean(axis=1)       # (Hp, W, P)
        h = h.reshape(Hp, Wp, stride, P).mean(axis=2)      # (Hp, Wp, P)

    # ---- conv3 + bn3 (+ fused downsample projection) + residual + relu ----
    if has_ds:
        xi = x.astype(jnp.float32)
        if stride > 1:
            xi = xi.reshape(Hp, stride, W, Cin).mean(axis=1)
            xi = xi.reshape(Hp, Wp, stride, Cin).mean(axis=2)
        # Single MXU pass: [pooled_h | pooled_x] @ [w3 ; wd], bias = b3 + bd.
        hz = jnp.concatenate([h, xi], axis=-1).reshape(Hp * Wp, P + Cin)
        out = jnp.dot(hz.astype(jnp.bfloat16), w3_ref[...],
                      preferred_element_type=jnp.float32) + b3_ref[...]
    else:
        out = jnp.dot(h.reshape(Hp * Wp, P).astype(jnp.bfloat16), w3_ref[...],
                      preferred_element_type=jnp.float32)
        out = out + b3_ref[...] + x.reshape(H * W, Cin).astype(jnp.float32)

    out = jnp.maximum(out, 0.0)
    o_ref[...] = out.reshape(1, Hp, Wp, Cout).astype(o_ref.dtype)


def _fold_bn(g, b, m, v):
    sc = g / jnp.sqrt(v + EPS)                 # (C,)
    return sc, (b - m * sc).reshape(1, -1)     # scale (C,), bias (1, C) f32


def bottleneck_pallas(x_nchw, params, stride):
    x = jnp.transpose(x_nchw, (0, 2, 3, 1)).astype(jnp.bfloat16)  # NCHW -> NHWC
    B, H, W, Cin = x.shape
    P = params['w1'].shape[1]
    Cout = 4 * P
    has_ds = (stride > 1) or (Cin != Cout)
    if not has_ds:
        assert Cin == Cout, "identity shortcut requires Cin == 4 * planes"
    Hp, Wp = H // stride, W // stride

    # Fold BN (eval mode) scales into the conv weights; keep only the biases.
    s1, b1 = _fold_bn(params['g1'], params['be1'], params['m1'], params['v1'])
    s2, b2 = _fold_bn(params['g2'], params['be2'], params['m2'], params['v2'])
    s3, b3 = _fold_bn(params['g3'], params['be3'], params['m3'], params['v3'])

    w1 = (params['w1'] * s1[None, :]).astype(jnp.bfloat16)              # (Cin, P)
    # HWIO (3,3,P,P) * out-channel scale, flattened to (kh, kw*P, P) so that the
    # K axis matches the kw-concatenated im2col columns in the kernel.
    w2 = (params['w2'] * s2[None, None, None, :]).reshape(3, 3 * P, P)
    w2 = w2.astype(jnp.bfloat16)
    w3 = params['w3'] * s3[None, :]                                     # (P, 4P)
    if has_ds:
        sd, bd = _fold_bn(params['gd'], params['bed'], params['md'], params['vd'])
        wd = params['wd'] * sd[None, :]                                 # (Cin, 4P)
        w3c = jnp.concatenate([w3, wd], axis=0).astype(jnp.bfloat16)    # (P+Cin, 4P)
        b3c = b3 + bd
    else:
        w3c = w3.astype(jnp.bfloat16)
        b3c = b3

    kernel = functools.partial(_bottleneck_kernel, stride, has_ds, H, W, Cin, P)

    # Weights / biases: whole-array VMEM residents (loaded once, single buffer).
    weight_spec = pl.BlockSpec(memory_space=pltpu.MemorySpace.VMEM)

    out = pl.pallas_call(
        kernel,
        out_shape=jax.ShapeDtypeStruct((B, Hp, Wp, Cout), jnp.float32),
        grid_spec=pltpu.PrefetchScalarGridSpec(
            num_scalar_prefetch=0,
            grid=(B,),
            in_specs=[
                pl.BlockSpec((1, H, W, Cin), lambda b: (b, 0, 0, 0)),
                weight_spec, weight_spec,   # w1, b1
                weight_spec, weight_spec,   # w2, b2
                weight_spec, weight_spec,   # w3 (+wd fused), b3 (+bd fused)
            ],
            out_specs=pl.BlockSpec((1, Hp, Wp, Cout), lambda b: (b, 0, 0, 0)),
            scratch_shapes=[pltpu.VMEM((H + 2, W + 2, P), jnp.bfloat16)],
        ),
        compiler_params=pltpu.CompilerParams(
            dimension_semantics=("parallel",),
            vmem_limit_bytes=64 * 1024 * 1024),   # safe on v5e/v6e/v7x; raise to ~100MiB on v6e
    )(x, w1, b1, w2, b2, w3c, b3c)

    return jnp.transpose(out, (0, 3, 1, 2))  # NHWC -> NCHW


# ------------------- pure-JAX f32 reference (for checking) -------------------
def bottleneck_ref(x_nchw, params, stride):
    x = jnp.transpose(x_nchw, (0, 2, 3, 1)).astype(jnp.float32)

    def bn(y, g, b, m, v):
        return (y - m) / jnp.sqrt(v + EPS) * g + b

    def pool(y, s):
        if s == 1:
            return y
        Bn, Hn, Wn, Cn = y.shape
        return y.reshape(Bn, Hn // s, s, Wn // s, s, Cn).mean(axis=(2, 4))

    h = jnp.einsum('bhwc,co->bhwo', x, params['w1'])
    h = jax.nn.relu(bn(h, params['g1'], params['be1'], params['m1'], params['v1']))
    h = jax.lax.conv_general_dilated(
        h, params['w2'], (1, 1), 'SAME',
        dimension_numbers=('NHWC', 'HWIO', 'NHWC'))
    h = jax.nn.relu(bn(h, params['g2'], params['be2'], params['m2'], params['v2']))
    h = pool(h, stride)
    h = jnp.einsum('bhwc,co->bhwo', h, params['w3'])
    h = bn(h, params['g3'], params['be3'], params['m3'], params['v3'])

    Cin = x.shape[-1]
    Cout = params['w3'].shape[1]
    if stride > 1 or Cin != Cout:
        idn = pool(x, stride)
        idn = jnp.einsum('bhwc,co->bhwo', idn, params['wd'])
        idn = bn(idn, params['gd'], params['bed'], params['md'], params['vd'])
    else:
        idn = x
    out = jax.nn.relu(h + idn)
    return jnp.transpose(out, (0, 3, 1, 2))


def init_params(key, inplanes, planes):
    cout = planes * 4
    keys = iter(jax.random.split(key, 32))

    def w(shape):
        return jax.random.normal(next(keys), shape, jnp.float32) * 0.1

    def bn(dim):
        g = jax.random.uniform(next(keys), (dim,), jnp.float32, 0.5, 1.5)
        b = jax.random.normal(next(keys), (dim,), jnp.float32) * 0.1
        m = jax.random.normal(next(keys), (dim,), jnp.float32) * 0.1
        v = jax.random.uniform(next(keys), (dim,), jnp.float32, 0.5, 1.5)
        return g, b, m, v

    p = {}
    p['w1'] = w((inplanes, planes))
    p['g1'], p['be1'], p['m1'], p['v1'] = bn(planes)
    p['w2'] = w((3, 3, planes, planes))                     # HWIO
    p['g2'], p['be2'], p['m2'], p['v2'] = bn(planes)
    p['w3'] = w((planes, cout))
    p['g3'], p['be3'], p['m3'], p['v3'] = bn(cout)
    p['wd'] = w((inplanes, cout))
    p['gd'], p['bed'], p['md'], p['vd'] = bn(cout)
    return p


if __name__ == "__main__":
    key = jax.random.PRNGKey(0)
    kx1, kx2, kp1, kp2 = jax.random.split(key, 4)
    B, H, W = 2, 16, 16

    # bf16 MXU operands vs. a pure-f32 reference -> percent-level tolerance.
    TOL = 6e-2

    # Case 1: stride-2 block with downsample (projection) shortcut.
    inplanes, planes, stride = 16, 8, 2
    x1 = jax.random.normal(kx1, (B, inplanes, H, W), jnp.float32)  # NCHW
    p1 = init_params(kp1, inplanes, planes)
    out1 = jax.block_until_ready(bottleneck_pallas(x1, p1, stride))
    assert out1.shape == (B, planes * 4, H // stride, W // stride), out1.shape
    np.testing.assert_allclose(np.asarray(out1), np.asarray(bottleneck_ref(x1, p1, stride)),
                               rtol=TOL, atol=TOL)

    # Case 2: stride-1 identity block (no downsample branch, no placeholder args).
    inplanes2, planes2, stride2 = 32, 8, 1
    x2 = jax.random.normal(kx2, (B, inplanes2, H, W), jnp.float32)
    p2 = init_params(kp2, inplanes2, planes2)
    out2 = jax.block_until_ready(bottleneck_pallas(x2, p2, stride2))
    assert out2.shape == (B, planes2 * 4, H, W), out2.shape
    np.testing.assert_allclose(np.asarray(out2), np.asarray(bottleneck_ref(x2, p2, stride2)),
                               rtol=TOL, atol=TOL)

    print("KERNEL_OK")
</pallas_src>

<mosaic_0001>
module attributes {stable_mosaic.version = 11 : i64} {
  func.func @_bottleneck_kernel(%arg0: i32, %arg1: memref<1x16x16x16xbf16, #tpu.memory_space<vmem>>, %arg2: memref<16x8xbf16, #tpu.memory_space<vmem>>, %arg3: memref<1x8xf32, #tpu.memory_space<vmem>>, %arg4: memref<3x24x8xbf16, #tpu.memory_space<vmem>>, %arg5: memref<1x8xf32, #tpu.memory_space<vmem>>, %arg6: memref<24x32xbf16, #tpu.memory_space<vmem>>, %arg7: memref<1x32xf32, #tpu.memory_space<vmem>>, %arg8: memref<1x8x8x32xf32, #tpu.memory_space<vmem>>, %arg9: memref<18x18x8xbf16, #tpu.memory_space<vmem>>) attributes {dimension_semantics = [#tpu.dimension_semantics<parallel>], iteration_bounds = array<i64: 2>, scalar_prefetch = 0 : i64, scratch_operands = 1 : i64, tpu.core_type = #tpu.core_type<tc>, window_params = [{transform_indices = @transform_0, window_bounds = array<i64: 1, 16, 16, 16>}, {pipeline_mode = #tpu.pipeline_mode<synchronous>, transform_indices = @transform_1, window_bounds = array<i64: 16, 8>}, {pipeline_mode = #tpu.pipeline_mode<synchronous>, transform_indices = @transform_2, window_bounds = array<i64: 1, 8>}, {pipeline_mode = #tpu.pipeline_mode<synchronous>, transform_indices = @transform_3, window_bounds = array<i64: 3, 24, 8>}, {pipeline_mode = #tpu.pipeline_mode<synchronous>, transform_indices = @transform_4, window_bounds = array<i64: 1, 8>}, {pipeline_mode = #tpu.pipeline_mode<synchronous>, transform_indices = @transform_5, window_bounds = array<i64: 24, 32>}, {pipeline_mode = #tpu.pipeline_mode<synchronous>, transform_indices = @transform_6, window_bounds = array<i64: 1, 32>}, {transform_indices = @transform_7, window_bounds = array<i64: 1, 8, 8, 32>}]} {
    %c0 = arith.constant 0 : index
    %c0_0 = arith.constant 0 : index
    %c0_1 = arith.constant 0 : index
    %c0_2 = arith.constant 0 : index
    %0 = vector.load %arg1[%c0, %c0_0, %c0_1, %c0_2] : memref<1x16x16x16xbf16, #tpu.memory_space<vmem>>, vector<1x16x16x16xbf16>
    %1 = vector.shape_cast %0 : vector<1x16x16x16xbf16> to vector<16x16x16xbf16>
    %2 = vector.shape_cast %1 : vector<16x16x16xbf16> to vector<256x16xbf16>
    %c0_3 = arith.constant 0 : index
    %c0_4 = arith.constant 0 : index
    %3 = vector.load %arg2[%c0_3, %c0_4] : memref<16x8xbf16, #tpu.memory_space<vmem>>, vector<16x8xbf16>
    %cst = arith.constant dense<0.000000e+00> : vector<256x8xf32>
    %4 = tpu.matmul %2, %3, %cst {dimension_numbers = #tpu.dot_dimension_numbers<[1], [0], [0], [1], [0, 0, 1, 1], [], []>} : vector<256x16xbf16>, vector<16x8xbf16>, vector<256x8xf32> -> vector<256x8xf32>
    %c0_5 = arith.constant 0 : index
    %c0_6 = arith.constant 0 : index
    %5 = vector.load %arg3[%c0_5, %c0_6] : memref<1x8xf32, #tpu.memory_space<vmem>>, vector<1x8xf32>
    %6 = vector.broadcast %5 : vector<1x8xf32> to vector<256x8xf32>
    %7 = arith.addf %4, %6 : vector<256x8xf32>
    %cst_7 = arith.constant 0.000000e+00 : f32
    %8 = vector.broadcast %cst_7 : f32 to vector<256x8xf32>
    %9 = arith.maximumf %7, %8 : vector<256x8xf32>
    %cst_8 = arith.constant 0.000000e+00 : bf16
    %10 = vector.broadcast %cst_8 : bf16 to vector<18x18x8xbf16>
    %c0_9 = arith.constant 0 : index
    %c0_10 = arith.constant 0 : index
    %c0_11 = arith.constant 0 : index
    %11 = vector.load %arg9[%c0_9, %c0_10, %c0_11] : memref<18x18x8xbf16, #tpu.memory_space<vmem>>, vector<18x18x8xbf16>
    tpu.vector_store %arg9[%c0_9, %c0_10, %c0_11], %10 {strides = array<i32>} : memref<18x18x8xbf16, #tpu.memory_space<vmem>>, vector<18x18x8xbf16>,
    %12 = vector.shape_cast %9 : vector<256x8xf32> to vector<16x16x8xf32>
    %13 = arith.truncf %12 : vector<16x16x8xf32> to vector<16x16x8xbf16>
    %c1 = arith.constant 1 : index
    %c1_12 = arith.constant 1 : index
    %c0_13 = arith.constant 0 : index
    %14 = vector.load %arg9[%c1, %c1_12, %c0_13] : memref<18x18x8xbf16, #tpu.memory_space<vmem>>, vector<16x16x8xbf16>
    tpu.vector_store %arg9[%c1, %c1_12, %c0_13], %13 {strides = array<i32>} : memref<18x18x8xbf16, #tpu.memory_space<vmem>>, vector<16x16x8xbf16>,
    %cst_14 = arith.constant 0.000000e+00 : f32
    %15 = vector.broadcast %cst_14 : f32 to vector<256x8xf32>
    %c0_15 = arith.constant 0 : index
    %c0_16 = arith.constant 0 : index
    %c0_17 = arith.constant 0 : index
    %16 = vector.load %arg9[%c0_15, %c0_16, %c0_17] : memref<18x18x8xbf16, #tpu.memory_space<vmem>>, vector<16x16x8xbf16>
    %c0_18 = arith.constant 0 : index
    %c1_19 = arith.constant 1 : index
    %c0_20 = arith.constant 0 : index
    %17 = vector.load %arg9[%c0_18, %c1_19, %c0_20] : memref<18x18x8xbf16, #tpu.memory_space<vmem>>, vector<16x16x8xbf16>
    %c0_21 = arith.constant 0 : index
    %c2 = arith.constant 2 : index
    %c0_22 = arith.constant 0 : index
    %18 = vector.load %arg9[%c0_21, %c2, %c0_22] : memref<18x18x8xbf16, #tpu.memory_space<vmem>>, vector<16x16x8xbf16>
    %19 = tpu.concatenate %16, %17, %18 in 2 : vector<16x16x8xbf16>, vector<16x16x8xbf16>, vector<16x16x8xbf16> -> vector<16x16x24xbf16>
    %20 = vector.shape_cast %19 : vector<16x16x24xbf16> to vector<256x24xbf16>
    %c0_23 = arith.constant 0 : index
    %c0_24 = arith.constant 0 : index
    %c0_25 = arith.constant 0 : index
    %21 = vector.load %arg4[%c0_23, %c0_24, %c0_25] : memref<3x24x8xbf16, #tpu.memory_space<vmem>>, vector<1x24x8xbf16>
    %22 = vector.shape_cast %21 : vector<1x24x8xbf16> to vector<24x8xbf16>
    %cst_26 = arith.constant dense<0.000000e+00> : vector<256x8xf32>
    %23 = tpu.matmul %20, %22, %cst_26 {dimension_numbers = #tpu.dot_dimension_numbers<[1], [0], [0], [1], [0, 0, 1, 1], [], []>} : vector<256x24xbf16>, vector<24x8xbf16>, vector<256x8xf32> -> vector<256x8xf32>
    %24 = arith.addf %15, %23 : vector<256x8xf32>
    %c1_27 = arith.constant 1 : index
    %c0_28 = arith.constant 0 : index
    %c0_29 = arith.constant 0 : index
    %25 = vector.load %arg9[%c1_27, %c0_28, %c0_29] : memref<18x18x8xbf16, #tpu.memory_space<vmem>>, vector<16x16x8xbf16>
    %c1_30 = arith.constant 1 : index
    %c1_31 = arith.constant 1 : index
    %c0_32 = arith.constant 0 : index
    %26 = vector.load %arg9[%c1_30, %c1_31, %c0_32] : memref<18x18x8xbf16, #tpu.memory_space<vmem>>, vector<16x16x8xbf16>
    %c1_33 = arith.constant 1 : index
    %c2_34 = arith.constant 2 : index
    %c0_35 = arith.constant 0 : index
    %27 = vector.load %arg9[%c1_33, %c2_34, %c0_35] : memref<18x18x8xbf16, #tpu.memory_space<vmem>>, vector<16x16x8xbf16>
    %28 = tpu.concatenate %25, %26, %27 in 2 : vector<16x16x8xbf16>, vector<16x16x8xbf16>, vector<16x16x8xbf16> -> vector<16x16x24xbf16>
    %29 = vector.shape_cast %28 : vector<16x16x24xbf16> to vector<256x24xbf16>
    %c1_36 = arith.constant 1 : index
    %c0_37 = arith.constant 0 : index
    %c0_38 = arith.constant 0 : index
    %30 = vector.load %arg4[%c1_36, %c0_37, %c0_38] : memref<3x24x8xbf16, #tpu.memory_space<vmem>>, vector<1x24x8xbf16>
    %31 = vector.shape_cast %30 : vector<1x24x8xbf16> to vector<24x8xbf16>
    %cst_39 = arith.constant dense<0.000000e+00> : vector<256x8xf32>
    %32 = tpu.matmul %29, %31, %cst_39 {dimension_numbers = #tpu.dot_dimension_numbers<[1], [0], [0], [1], [0, 0, 1, 1], [], []>} : vector<256x24xbf16>, vector<24x8xbf16>, vector<256x8xf32> -> vector<256x8xf32>
    %33 = arith.addf %24, %32 : vector<256x8xf32>
    %c2_40 = arith.constant 2 : index
    %c0_41 = arith.constant 0 : index
    %c0_42 = arith.constant 0 : index
    %34 = vector.load %arg9[%c2_40, %c0_41, %c0_42] : memref<18x18x8xbf16, #tpu.memory_space<vmem>>, vector<16x16x8xbf16>
    %c2_43 = arith.constant 2 : index
    %c1_44 = arith.constant 1 : index
    %c0_45 = arith.constant 0 : index
    %35 = vector.load %arg9[%c2_43, %c1_44, %c0_45] : memref<18x18x8xbf16, #tpu.memory_space<vmem>>, vector<16x16x8xbf16>
    %c2_46 = arith.constant 2 : index
    %c2_47 = arith.constant 2 : index
    %c0_48 = arith.constant 0 : index
    %36 = vector.load %arg9[%c2_46, %c2_47, %c0_48] : memref<18x18x8xbf16, #tpu.memory_space<vmem>>, vector<16x16x8xbf16>
    %37 = tpu.concatenate %34, %35, %36 in 2 : vector<16x16x8xbf16>, vector<16x16x8xbf16>, vector<16x16x8xbf16> -> vector<16x16x24xbf16>
    %38 = vector.shape_cast %37 : vector<16x16x24xbf16> to vector<256x24xbf16>
    %c2_49 = arith.constant 2 : index
    %c0_50 = arith.constant 0 : index
    %c0_51 = arith.constant 0 : index
    %39 = vector.load %arg4[%c2_49, %c0_50, %c0_51] : memref<3x24x8xbf16, #tpu.memory_space<vmem>>, vector<1x24x8xbf16>
    %40 = vector.shape_cast %39 : vector<1x24x8xbf16> to vector<24x8xbf16>
    %cst_52 = arith.constant dense<0.000000e+00> : vector<256x8xf32>
    %41 = tpu.matmul %38, %40, %cst_52 {dimension_numbers = #tpu.dot_dimension_numbers<[1], [0], [0], [1], [0, 0, 1, 1], [], []>} : vector<256x24xbf16>, vector<24x8xbf16>, vector<256x8xf32> -> vector<256x8xf32>
    %42 = arith.addf %33, %41 : vector<256x8xf32>
    %c0_53 = arith.constant 0 : index
    %c0_54 = arith.constant 0 : index
    %43 = vector.load %arg5[%c0_53, %c0_54] : memref<1x8xf32, #tpu.memory_space<vmem>>, vector<1x8xf32>
    %44 = vector.broadcast %43 : vector<1x8xf32> to vector<256x8xf32>
    %45 = arith.addf %42, %44 : vector<256x8xf32>
    %cst_55 = arith.constant 0.000000e+00 : f32
    %46 = vector.broadcast %cst_55 : f32 to vector<256x8xf32>
    %47 = arith.maximumf %45, %46 : vector<256x8xf32>
    %48 = vector.shape_cast %47 : vector<256x8xf32> to vector<16x16x8xf32>
    %49 = vector.shape_cast %48 : vector<16x16x8xf32> to vector<8x2x16x8xf32>
    %cst_56 = arith.constant dense<0.000000e+00> : vector<8x16x8xf32>
    %50 = vector.multi_reduction <add>, %49, %cst_56 [1] : vector<8x2x16x8xf32> to vector<8x16x8xf32>
    %cst_57 = arith.constant 2.000000e+00 : f32
    %51 = vector.broadcast %cst_57 : f32 to vector<8x16x8xf32>
    %52 = arith.divf %50, %51 : vector<8x16x8xf32>
    %53 = vector.shape_cast %52 : vector<8x16x8xf32> to vector<8x8x2x8xf32>
    %cst_58 = arith.constant dense<0.000000e+00> : vector<8x8x8xf32>
    %54 = vector.multi_reduction <add>, %53, %cst_58 [2] : vector<8x8x2x8xf32> to vector<8x8x8xf32>
    %cst_59 = arith.constant 2.000000e+00 : f32
    %55 = vector.broadcast %cst_59 : f32 to vector<8x8x8xf32>
    %56 = arith.divf %54, %55 : vector<8x8x8xf32>
    %57 = arith.extf %1 : vector<16x16x16xbf16> to vector<16x16x16xf32>
    %58 = vector.shape_cast %57 : vector<16x16x16xf32> to vector<8x2x16x16xf32>
    %cst_60 = arith.constant dense<0.000000e+00> : vector<8x16x16xf32>
    %59 = vector.multi_reduction <add>, %58, %cst_60 [1] : vector<8x2x16x16xf32> to vector<8x16x16xf32>
    %cst_61 = arith.constant 2.000000e+00 : f32
    %60 = vector.broadcast %cst_61 : f32 to vector<8x16x16xf32>
    %61 = arith.divf %59, %60 : vector<8x16x16xf32>
    %62 = vector.shape_cast %61 : vector<8x16x16xf32> to vector<8x8x2x16xf32>
    %cst_62 = arith.constant dense<0.000000e+00> : vector<8x8x16xf32>
    %63 = vector.multi_reduction <add>, %62, %cst_62 [2] : vector<8x8x2x16xf32> to vector<8x8x16xf32>
    %cst_63 = arith.constant 2.000000e+00 : f32
    %64 = vector.broadcast %cst_63 : f32 to vector<8x8x16xf32>
    %65 = arith.divf %63, %64 : vector<8x8x16xf32>
    %66 = tpu.concatenate %56, %65 in 2 : vector<8x8x8xf32>, vector<8x8x16xf32> -> vector<8x8x24xf32>
    %67 = vector.shape_cast %66 : vector<8x8x24xf32> to vector<64x24xf32>
    %68 = arith.truncf %67 : vector<64x24xf32> to vector<64x24xbf16>
    %c0_64 = arith.constant 0 : index
    %c0_65 = arith.constant 0 : index
    %69 = vector.load %arg6[%c0_64, %c0_65] : memref<24x32xbf16, #tpu.memory_space<vmem>>, vector<24x32xbf16>
    %cst_66 = arith.constant dense<0.000000e+00> : vector<64x32xf32>
    %70 = tpu.matmul %68, %69, %cst_66 {dimension_numbers = #tpu.dot_dimension_numbers<[1], [0], [0], [1], [0, 0, 1, 1], [], []>} : vector<64x24xbf16>, vector<24x32xbf16>, vector<64x32xf32> -> vector<64x32xf32>
    %c0_67 = arith.constant 0 : index
    %c0_68 = arith.constant 0 : index
    %71 = vector.load %arg7[%c0_67, %c0_68] : memref<1x32xf32, #tpu.memory_space<vmem>>, vector<1x32xf32>
    %72 = vector.broadcast %71 : vector<1x32xf32> to vector<64x32xf32>
    %73 = arith.addf %70, %72 : vector<64x32xf32>
    %cst_69 = arith.constant 0.000000e+00 : f32
    %74 = vector.broadcast %cst_69 : f32 to vector<64x32xf32>
    %75 = arith.maximumf %73, %74 : vector<64x32xf32>
    %76 = vector.shape_cast %75 : vector<64x32xf32> to vector<1x8x8x32xf32>
    %c0_70 = arith.constant 0 : index
    %c0_71 = arith.constant 0 : index
    %c0_72 = arith.constant 0 : index
    %c0_73 = arith.constant 0 : index
    %77 = vector.load %arg8[%c0_70, %c0_71, %c0_72, %c0_73] : memref<1x8x8x32xf32, #tpu.memory_space<vmem>>, vector<1x8x8x32xf32>
    tpu.vector_store %arg8[%c0_70, %c0_71, %c0_72, %c0_73], %76 {strides = array<i32>} : memref<1x8x8x32xf32, #tpu.memory_space<vmem>>, vector<1x8x8x32xf32>,
    return
  }
  func.func @transform_0(%arg0: i32) -> (i32, i32, i32, i32) {
    %c0_i32 = arith.constant 0 : i32
    %c0_i32_0 = arith.constant 0 : i32
    %c0_i32_1 = arith.constant 0 : i32
    %c0_i32_2 = arith.constant 0 : i32
    return %arg0, %c0_i32, %c0_i32_0, %c0_i32_1 : i32, i32, i32, i32
  }
  func.func @transform_1(%arg0: i32) -> (i32, i32) {
    %c0_i32 = arith.constant 0 : i32
    %c0_i32_0 = arith.constant 0 : i32
    %c0_i32_1 = arith.constant 0 : i32
    return %c0_i32, %c0_i32_0 : i32, i32
  }
  func.func @transform_2(%arg0: i32) -> (i32, i32) {
    %c0_i32 = arith.constant 0 : i32
    %c0_i32_0 = arith.constant 0 : i32
    %c0_i32_1 = arith.constant 0 : i32
    return %c0_i32, %c0_i32_0 : i32, i32
  }
  func.func @transform_3(%arg0: i32) -> (i32, i32, i32) {
    %c0_i32 = arith.constant 0 : i32
    %c0_i32_0 = arith.constant 0 : i32
    %c0_i32_1 = arith.constant 0 : i32
    %c0_i32_2 = arith.constant 0 : i32
    return %c0_i32, %c0_i32_0, %c0_i32_1 : i32, i32, i32
  }
  func.func @transform_4(%arg0: i32) -> (i32, i32) {
    %c0_i32 = arith.constant 0 : i32
    %c0_i32_0 = arith.constant 0 : i32
    %c0_i32_1 = arith.constant 0 : i32
    return %c0_i32, %c0_i32_0 : i32, i32
  }
  func.func @transform_5(%arg0: i32) -> (i32, i32) {
    %c0_i32 = arith.constant 0 : i32
    %c0_i32_0 = arith.constant 0 : i32
    %c0_i32_1 = arith.constant 0 : i32
    return %c0_i32, %c0_i32_0 : i32, i32
  }
  func.func @transform_6(%arg0: i32) -> (i32, i32) {
    %c0_i32 = arith.constant 0 : i32
    %c0_i32_0 = arith.constant 0 : i32
    %c0_i32_1 = arith.constant 0 : i32
    return %c0_i32, %c0_i32_0 : i32, i32
  }
  func.func @transform_7(%arg0: i32) -> (i32, i32, i32, i32) {
    %c0_i32 = arith.constant 0 : i32
    %c0_i32_0 = arith.constant 0 : i32
    %c0_i32_1 = arith.constant 0 : i32
    %c0_i32_2 = arith.constant 0 : i32
    return %arg0, %c0_i32, %c0_i32_0, %c0_i32_1 : i32, i32, i32, i32
  }
}

</mosaic_0001>

<bundles_post_ra>
// kernel: tpu_custom_call.1
= control target key start
LH: loop header
LB: loop body
LE: loop exit
PB: predicated region body
PF: predicated region fallthrough
CT: control target
= control target key end

     0   :  { %12 = vsyncpa [#allocation4], 0  ;;  %s8531_s0 = inlined_call_operand.hbm [shape: bf16[2,16,16,16], index: 0, kind: input, shape index: {}]   ;;  %s8532_s1 = inlined_call_operand.vmem [shape: bf16[16,8], index: 1, kind: input, shape index: {}]   ;;  %s8533_s2 = inlined_call_operand.vmem [shape: f32[1,8], index: 2, kind: input, shape index: {}]   ;;  %s8534_s3 = inlined_call_operand.vmem [shape: bf16[3,24,8], index: 3, kind: input, shape index: {}]   ;;  %s8535_s4 = inlined_call_operand.vmem [shape: f32[1,8], index: 4, kind: input, shape index: {}]   ;;  %s8536_s5 = inlined_call_operand.vmem [shape: bf16[24,32], index: 5, kind: input, shape index: {}]   ;;  %s8537_s6 = inlined_call_operand.vmem [shape: f32[1,32], index: 6, kind: input, shape index: {}]   ;;  %s8538_s7 = inlined_call_operand.hbm [shape: f32[2,8,8,32], index: 7, kind: output, shape index: {}]  }
   0x1   :  { %14 = vsyncpa [#allocation4 + $0x1], 0 }
   0x2   :  { %15 = vsyncpa [#allocation5], 0 }
   0x3   :  { %17 = vsyncpa [#allocation5 + $0x1], 0  ;;  %s6030_s24 = smov 0   ;;  %s6032_s25 = smov 0  }
   0x4   :  { %s6034_s26 = smov 0   ;;  %s6036_s27 = smov 0  }
   0x5 LB: > { %s6051_s28 = sadd.s32 4294967295, %s5981_s27   ;;  %s5337_s29 = sadd.s32 4294967294, %s5981_s27   ;;  %s5981_s27 = sphi %s6036_s27, %s8602_s27   ;;  %s5977_s26 = sphi %s6034_s26, %s8601_s26   ;;  %s5973_s25 = sphi %s6032_s25, %s8600_s25   ;;  %s5969_s24 = sphi %s6030_s24, %s8599_s24  }
   0x6   : > { %s6055_s30 = sadd.s32 1, %s5981_s27   ;;  %s30_s8 = sadd.s32 1, %s5977_s26 }
   0x7   : > { %s27_s9 = ssub.s32 %s5981_s27, %s6055_s30  ;;  %p37_p0 = scmp.ne.s32.totalorder %s5977_s26, %s5973_s25 }
   0x8   : > { %p28_p1 = scmp.eq.s32.totalorder %s27_s9, 0  ;;  %p38_p2 = scmp.eq.s32.totalorder %s5981_s27, 0 }
   0x9   : > { %p43_p3 = scmp.ne.s32.totalorder %s5973_s25, %s5969_s24  ;;  %p44_p4 = scmp.eq.s32.totalorder %s6051_s28, 0 }
   0xa   : > { %s6067_s10 = scalar_select %p28_p1, %s5977_s26, %s30_s8  }
   0xb   : > { %p6069_p5 = por %p38_p2, %p37_p0  ;;  %p6073_p6 = por %p44_p4, %p43_p3 }
   0xc   : > { %8548 = sst [smem:[#allocation9_spill]] %s6067_s10  ;;  %p193_p7 = scmp.eq.s32.totalorder %s6051_s28, 1 }
   0xd   : > { %p199_p8 = scmp.eq.s32.totalorder %s5337_s29, 1  ;;  %p5735_p10 = scmp.lt.s32.totalorder %s5981_s27, 2 }
   0xe   : > { %p6080_p11 = por %p193_p7, %p37_p0  ;;  %s237_s15 = sand.u32 1, %s5977_s26  }
   0xf   : > { %p6084_p12 = por %p199_p8, %p43_p3  ;;  %s5509_s16 = sshll.u32 %s5981_s27, 7 }
  0x10   : > { %s5340_s17 = sshll.u32 %s237_s15, 7  ;;  %s246_s20 = scalar_lea.hbm %s8531_s0, %s5509_s16 }
  0x11   : > { %s247_s21 = sshll.u32 %s246_s20, 4  ;;  %s241_s22 = scalar_lea.vmem [#allocation3], %s5340_s17  ;;  %s248_s21 = int_to_ptr.hbm [resolvable:$true] %s247_s21 }
  0x12   : > { %s249_s23 = sshll.u32 %s241_s22, 4  ;;  %p6095_p13 = pnand %p5735_p10, %p6069_p5  ;;  %s250_s23 = int_to_ptr.vmem [resolvable:$true] %s249_s23 }
  0x13   : > { %p5343_p0 = scmp.ge.s32.totalorder %s5981_s27, 1  ;;  %p257_p1 = scmp.lt.s32.totalorder %s5981_s27, 3 }
  0x14   : > { %s238_s8 = scalar_lea.sflag [#allocation4], %s237_s15  ;;  %s5882_s9 = sshra.s32 %s248_s21, 4  ;;  %s5883_s9 = int_to_ptr.hbm [resolvable:$true] %s5882_s9 }
  0x15   : > { %s5884_s10 = scalar_lea.hbm %s5883_s9, 128  ;;  %p5886_p3 = pneg %p6095_p13 }
  0x16   : > { %p5885_p2 = scmp.ne.s32.totalorder %s5883_s9, %s5884_s10  ;;  %s5889_s11 = scalar_lea.hbm %s8531_s0, 256 }
  0x17   : > { %p5890_p5 = scmp.lt.s32.totalorder %s5883_s9, %s8531_s0  ;;  %p5891_p8 = scmp.lt.s32.totalorder %s5889_s11, %s5884_s10 }
  0x18   : > { %p5887_p4 = pnand %p5886_p3, %p5885_p2 }
  0x19   : > { %p5892_p10 = por %p5891_p8, %p5890_p5 }
  0x1a   : > { %p5888_p7 = pneg %p5887_p4 }
  0x1c   : > { %p5893_p9 = pnand %p5892_p10, %p5888_p7 }
  0x1e   : > { %5896 = shalt.err (!%p5893_p9)
}
  0x1f   : > { %s5983_s15 = smov 64   ;;  %s5984_s20 = smov 4  }
  0x20   : > { %5730 = dma.hbm_to_vmem [thread:$0]  (!%p6095_p13), %s248_s21, 2048, %s250_s23, %s238_s8, %s5983_s15, %s5983_s15, %s5984_s20  }
  0x21   : > { %p258_p2 = pnand %p5343_p0, %p257_p1 }
  0x23   : > { %261 = sbr.rel (%p258_p2) target bundleno = 1018 (0x3fa), region = 48 }
  0x28   : > { %s6116_s22 = sand.u32 1, %s5973_s25  }
  0x29   : > { %s5344_s10 = sshll.u32 %s6116_s22, 7  ;;  %s264_s9 = scalar_lea.sflag [#allocation4], %s6116_s22 }
  0x2a   : > { %s6120_s16 = scalar_lea.vmem [#allocation3], %s5344_s10 }
  0x2b   : > { %5957 = dma.done.wait (%p6073_p6), %s264_s9, 2048  }
  0x2c   : > { %5959 = vsyncadd (%p6073_p6), %s264_s9, 4294965248  ;;  %v5526_v0 = vld [vmem:[%s8532_s1] sm:$0xff]  ;;  %v5510_v1 = vld [vmem:[%s6120_s16] sm:$0xff]  ;;  %vm424_vm0 = vcmask 130048   ;;  %vm597_vm1 = vcmask 57344   ;;  %v5985_v7 = vmov 0  }
  0x2d   : > { %480 = vmatpush.bf16.msra.mxu0 %v5526_v0  ;;  %5722 = vmatpush.bf16.msra.mxu1 %v5526_v0  ;;  %v5511_v2 = vld [vmem:[%s6120_s16 + $0x8] sm:$0xff]  ;;  %v5512_v3 = vld [vmem:[%s6120_s16 + $0x10] sm:$0xff]  ;;  %v5513_v4 = vld [vmem:[%s6120_s16 + $0x18] sm:$0xff]  ;;  %601 = vst.msk [vmem:[#allocation2 + $0x14] sm:$0x1] %vm597_vm1, %v5985_v7  ;;  %vm594_vm2 = vcmask 60416  }
  0x2e   : > { %v5514_v5 = vld [vmem:[%s6120_s16 + $0x20] sm:$0xff]  ;;  %v5515_v6 = vld [vmem:[%s6120_s16 + $0x28] sm:$0xff]  ;;  %598 = vst.msk [vmem:[#allocation2 + $0x8] sm:$0x1] %vm597_vm1, %v5985_v7  ;;  %v5516_v8 = vld [vmem:[%s6120_s16 + $0x30] sm:$0xff]  ;;  %s5986_s12 = smov 8  }
  0x2f   : > { %599 = vst.msk [vmem:[#allocation2 + $0xc] sm:$0xf] %vm594_vm2, %v5985_v7  ;;  %vm1315_vm3 = vsmask.f32 7424  ;;  %v5517_v20 = vld [vmem:[%s6120_s16 + $0x38] sm:$0xff]  ;;  %vm1588_vm4 = vcmask 1046528  }
  0x30   : > { %5414 = vmatmul.msk.bf16.vlgmr.msra.gmra.mxu0 %vm424_vm0, %v5510_v1  ;;  %595 = vst.msk [vmem:[#allocation2] sm:$0xf] %vm594_vm2, %v5985_v7  ;;  %s5987_s29 = smov 16   ;;  %v6226_v27 = vld [vmem:[%s8533_s2] ss:$0 sm:$0xff]  ;;  %v5518_v28 = vld [vmem:[%s6120_s16 + $0x40] sm:$0xff] }
  0x31   : > { %596 = vst.msk [vmem:[#allocation2 + $0x4] sm:$0xf] %vm594_vm2, %v5985_v7  ;;  %vm1007_vm5 = vsmask.f32 7938  ;;  %vm682_vm7 = vsmask.f32 256 }
  0x32   : > { %600 = vst.msk [vmem:[#allocation2 + $0x10] sm:$0xf] %vm594_vm2, %v5985_v7  ;;  %vm6259_vm6 = vmand %vm594_vm2, %vm1007_vm5  ;;  %vm683_vm8 = vsmask.f32 4368  ;;  %v5519_v45 = vld [vmem:[%s6120_s16 + $0x48] sm:$0xff]  ;;  %vm1669_vm11 = vcmask 64512  }
  0x33   : > { %602 = vst.msk [vmem:[#allocation2 + $0x18] sm:$0xf] %vm594_vm2, %v5985_v7  ;;  %vm6278_vm9 = vmor %vm682_vm7, %vm683_vm8  ;;  %vm2391_vm12 = vcmask 1043456   ;;  %vm2358_vm13 = vcmask 195584   ;;  %vm4367_vm15 = vcmask 123904   ;;  %vm4952_vm5 = vcmask 1045509  }
  0x34   : > { %603 = vst.msk [vmem:[#allocation2 + $0x1c] sm:$0xf] %vm594_vm2, %v5985_v7  ;;  %vm6284_vm10 = vmand %vm597_vm1, %vm682_vm7  ;;  %v1015_v52 = vld [vmem:[#allocation2 + $0x14] sm:$0x1]  ;;  %vm4956_vm7 = vcmask 1047559   ;;  %vm3646_vm8 = vcmask 58368  }
  0x35   : > { %605 = vst.msk [vmem:[#allocation2 + $0x24] sm:$0xf] %vm594_vm2, %v5985_v7  ;;  %v1155_v9 = vld [vmem:[#allocation2 + $0x8] sm:$0x1]  ;;  %s5345_s20 = sshll.u32 %s6116_s22, 6  ;;  %s5531_s10 = sshll.u32 %s6051_s28, 6 }
  0x36   : > { %606 = vst.msk [vmem:[#allocation2 + $0x28] sm:$0xf] %vm594_vm2, %v5985_v7  ;;  %v1283_v10 = vunpack.c.l.b16 %v1155_v9  ;;  %v1009_v39 = vld [vmem:[#allocation2 + $0xc] sm:$0xf]  ;;  %s5260_s23 = scalar_lea.hbm %s8538_s7, %s5531_s10  ;;  %s5249_s11 = scalar_lea.sflag [#allocation5], %s6116_s22 }
  0x37   : > { %608 = vst.msk [vmem:[#allocation2 + $0x30] sm:$0xf] %vm594_vm2, %v5985_v7  ;;  %v5636_v22 = vld [vmem:[#allocation2] sm:$0xe]  ;;  %s5263_s17 = sshll.u32 %s5260_s23, 4  ;;  %s5932_s15 = scalar_lea.hbm %s8538_s7, 128  ;;  %s5264_s17 = int_to_ptr.hbm [resolvable:$true] %s5263_s17 }
  0x38   : > { %609 = vst.msk [vmem:[#allocation2 + $0x34] sm:$0xf] %vm594_vm2, %v5985_v7  ;;  %v6167_v11 = vld [vmem:[#allocation2] sm:$0xff]   ;;  %v1299_v12 = vpack.c.b16 %v1283_v10, %v1283_v10  ;;  %s5926_s28 = sshra.s32 %s5264_s17, 4  ;;  %s5927_s28 = int_to_ptr.hbm [resolvable:$true] %s5926_s28 }
  0x39   : > { %611 = vst.msk [vmem:[#allocation2 + $0x3c] sm:$0xf] %vm594_vm2, %v5985_v7  ;;  %v1319_v13 = vshll.u32 %v6167_v11, 16  ;;  %v1317_v14 = vshrl.u32 %v6167_v11, 16  ;;  %v5635_v21 = vld [vmem:[#allocation2] sm:$0xf0]  ;;  %p5933_p0 = scmp.lt.s32.totalorder %s5927_s28, %s8538_s7 }
  0x3a   : > { %612 = vst.msk [vmem:[#allocation2 + $0x40] sm:$0xf] %vm594_vm2, %v5985_v7  ;;  %v1324_v15 = vshll.u32 %v1299_v12, 16  ;;  %v5637_v23 = vor.u32 %v5636_v22, %v5635_v21  ;;  %v1590_v24 = vrot.slane %v1299_v12, 1  ;;  %v1018_v1 = vld [vmem:[#allocation2 + $0x18] sm:$0xf] }
  0x3b   : > { %614 = vst.msk [vmem:[#allocation2 + $0x48] sm:$0xf] %vm594_vm2, %v5985_v7  ;;  %v1321_v16 = vrot.slane %v1319_v13, 1 }
  0x3c   : > { %615 = vst.msk [vmem:[#allocation2 + $0x4c] sm:$0xf] %vm594_vm2, %v5985_v7  ;;  %v1326_v17 = vrot.slane %v1324_v15, 1  ;;  %v1589_v25 = vrot.slane %v5637_v23, 1 }
  0x3d   : > { %617 = vst.msk [vmem:[#allocation2 + $0x54] sm:$0xf] %vm594_vm2, %v5985_v7  ;;  %v1322_v18 = vor.u32 %v1321_v16, %v1317_v14  ;;  %v5520_v14 = vld [vmem:[%s6120_s16 + $0x50] sm:$0xff] }
  0x3e   : > { %618 = vst.msk [vmem:[#allocation2 + $0x58] sm:$0xf] %vm594_vm2, %v5985_v7  ;;  %v1591_v26 = vsel %vm1588_vm4, %v1589_v25, %v1590_v24 }
  0x3f   : > { %620 = vst.msk [vmem:[#allocation2 + $0x60] sm:$0xf] %vm594_vm2, %v5985_v7  ;;  %v1327_v19 = vsel %vm1315_vm3, %v1322_v18, %v1326_v17 }
  0x40   : > { %5415 = vmatmul.msk.bf16.gmra.mxu0 %vm424_vm0, %v5511_v2  ;;  %621 = vst.msk [vmem:[#allocation2 + $0x64] sm:$0xf] %vm594_vm2, %v5985_v7  ;;  %1508 = vrot.lane.b32.xlu0 %v1327_v19, %s5986_s12 }
  0x41   : > { %623 = vst.msk [vmem:[#allocation2 + $0x6c] sm:$0xf] %vm594_vm2, %v5985_v7 }
  0x42   : > { %624 = vst.msk [vmem:[#allocation2 + $0x70] sm:$0xf] %vm594_vm2, %v5985_v7 }
  0x43   : > { %626 = vst.msk [vmem:[#allocation2 + $0x78] sm:$0xf] %vm594_vm2, %v5985_v7 }
  0x44   : > { %627 = vst.msk [vmem:[#allocation2 + $0x7c] sm:$0xf] %vm594_vm2, %v5985_v7 }
  0x45   : > { %629 = vst.msk [vmem:[#allocation2 + $0x84] sm:$0xf] %vm594_vm2, %v5985_v7 }
  0x46   : > { %630 = vst.msk [vmem:[#allocation2 + $0x88] sm:$0xf] %vm594_vm2, %v5985_v7 }
  0x47   : > { %632 = vst.msk [vmem:[#allocation2 + $0x90] sm:$0xf] %vm594_vm2, %v5985_v7 }
  0x48   : > { %633 = vst.msk [vmem:[#allocation2 + $0x94] sm:$0xf] %vm594_vm2, %v5985_v7  ;;  %1637 = vrot.lane.b32.xlu0 %v1591_v26, %s5987_s29 }
  0x49   : > { %635 = vst.msk [vmem:[#allocation2 + $0x9c] sm:$0xf] %vm594_vm2, %v5985_v7 }
  0x4a   : > { %636 = vst.msk [vmem:[#allocation2 + $0xa0] sm:$0xf] %vm594_vm2, %v5985_v7 }
  0x4b   : > { %638 = vst.msk [vmem:[#allocation2 + $0xa8] sm:$0xf] %vm594_vm2, %v5985_v7 }
  0x4c   : > { %639 = vst.msk [vmem:[#allocation2 + $0xac] sm:$0xf] %vm594_vm2, %v5985_v7 }
  0x4d   : > { %641 = vst.msk [vmem:[#allocation2 + $0xb4] sm:$0xf] %vm594_vm2, %v5985_v7 }
  0x4e   : > { %642 = vst.msk [vmem:[#allocation2 + $0xb8] sm:$0xf] %vm594_vm2, %v5985_v7 }
  0x4f   : > { %644 = vst.msk [vmem:[#allocation2 + $0xc0] sm:$0xf] %vm594_vm2, %v5985_v7 }
  0x50   : > { %5416 = vmatmul.msk.bf16.gmra.mxu0 %vm424_vm0, %v5512_v3  ;;  %645 = vst.msk [vmem:[#allocation2 + $0xc4] sm:$0xf] %vm594_vm2, %v5985_v7 }
  0x51   : > { %647 = vst.msk [vmem:[#allocation2 + $0xcc] sm:$0xf] %vm594_vm2, %v5985_v7 }
  0x52   : > { %648 = vst.msk [vmem:[#allocation2 + $0xd0] sm:$0xf] %vm594_vm2, %v5985_v7 }
  0x53   : > { %604 = vst.msk [vmem:[#allocation2 + $0x20] sm:$0x1] %vm597_vm1, %v5985_v7 }
  0x54   : > { %607 = vst.msk [vmem:[#allocation2 + $0x2c] sm:$0x1] %vm597_vm1, %v5985_v7 }
  0x55   : > { %610 = vst.msk [vmem:[#allocation2 + $0x38] sm:$0x1] %vm597_vm1, %v5985_v7 }
  0x56   : > { %613 = vst.msk [vmem:[#allocation2 + $0x44] sm:$0x1] %vm597_vm1, %v5985_v7 }
  0x57   : > { %616 = vst.msk [vmem:[#allocation2 + $0x50] sm:$0x1] %vm597_vm1, %v5985_v7 }
  0x58   : > { %619 = vst.msk [vmem:[#allocation2 + $0x5c] sm:$0x1] %vm597_vm1, %v5985_v7 }
  0x59   : > { %622 = vst.msk [vmem:[#allocation2 + $0x68] sm:$0x1] %vm597_vm1, %v5985_v7 }
  0x5a   : > { %625 = vst.msk [vmem:[#allocation2 + $0x74] sm:$0x1] %vm597_vm1, %v5985_v7 }
  0x5b   : > { %628 = vst.msk [vmem:[#allocation2 + $0x80] sm:$0x1] %vm597_vm1, %v5985_v7 }
  0x5c   : > { %631 = vst.msk [vmem:[#allocation2 + $0x8c] sm:$0x1] %vm597_vm1, %v5985_v7 }
  0x5d   : > { %634 = vst.msk [vmem:[#allocation2 + $0x98] sm:$0x1] %vm597_vm1, %v5985_v7 }
  0x5e   : > { %637 = vst.msk [vmem:[#allocation2 + $0xa4] sm:$0x1] %vm597_vm1, %v5985_v7 }
  0x5f   : > { %640 = vst.msk [vmem:[#allocation2 + $0xb0] sm:$0x1] %vm597_vm1, %v5985_v7 }
  0x60   : > { %5417 = vmatmul.msk.bf16.gmra.mxu0 %vm424_vm0, %v5513_v4  ;;  %643 = vst.msk [vmem:[#allocation2 + $0xbc] sm:$0x1] %vm597_vm1, %v5985_v7 }
  0x61   : > { %646 = vst.msk [vmem:[#allocation2 + $0xc8] sm:$0x1] %vm597_vm1, %v5985_v7 }
  0x62   : > { %649 = vst.msk [vmem:[#allocation2 + $0xd4] sm:$0x1] %vm597_vm1, %v5985_v7  ;;  %vm4944_vm1 = vcmask 1041409  }
  0x70   : > { %5418 = vmatmul.msk.bf16.gmra.mxu0 %vm424_vm0, %v5514_v5 }
  0x80   : > { %5419 = vmatmul.msk.bf16.gmra.mxu0 %vm424_vm0, %v5515_v6 }
  0x90   : > { %5420 = vmatmul.msk.bf16.gmra.mxu0 %vm424_vm0, %v5516_v8 }
  0xa0   : > { %5421 = vmatmul.msk.bf16.gmra.mxu0 %vm424_vm0, %v5517_v20  ;;  %v1022_v20 = vld [vmem:[#allocation2 + $0x20] sm:$0x1] }
  0xad   : > { %v482_v29 = vpop.f32.mrf.mxu0 }
  0xae   : > { %v483_v30 = vadd.f32 %v6226_v27, %v482_v29 }
  0xb0   : > { %v562_v31 = vmax.f32 %v483_v30, 0.0  ;;  %5422 = vmatmul.msk.bf16.gmra.mxu0 %vm424_vm0, %v5518_v28 }
  0xb2   : > { %v650_v32 = vpack.c.bf16 %v562_v31, %v562_v31 }
  0xb4   : > { %v686_v33 = vshrl.u32 %v650_v32, 16  ;;  %v689_v36 = vshll.u32 %v650_v32, 16 }
  0xb5   : > { %v484_v34 = vpop.f32.mrf.mxu0 }
  0xb6   : > { %v688_v35 = vrot.slane %v686_v33, 7  ;;  %v485_v37 = vadd.f32 %v6226_v27, %v484_v34 }
  0xb8   : > { %v691_v40 = vor.u32 %v689_v36, %v688_v35  ;;  %v563_v41 = vmax.f32 %v485_v37, 0.0  ;;  %v692_v53 = vrot.slane %v688_v35, 4 }
  0xba   : > { %v1010_v42 = vsel %vm6259_vm6, %v691_v40, %v1009_v39  ;;  %v651_v43 = vpack.c.bf16 %v563_v41, %v563_v41 }
  0xbb   : > { %1011 = vst [vmem:[#allocation2 + $0xc] sm:$0xf] %v1010_v42 }
  0xbc   : > { %v694_v44 = vshrl.u32 %v651_v43, 16  ;;  %v697_v49 = vshll.u32 %v651_v43, 16 }
  0xbd   : > { %v487_v46 = vpop.f32.mrf.mxu0 }
  0xbe   : > { %v696_v48 = vrot.slane %v694_v44, 7  ;;  %v488_v50 = vadd.f32 %v6226_v27, %v487_v46 }
  0xc0   : > { %v699_v54 = vor.u32 %v697_v49, %v696_v48  ;;  %v701_v55 = vrot.slane %v696_v48, 4  ;;  %v564_v56 = vmax.f32 %v488_v50, 0.0  ;;  %5423 = vmatmul.msk.bf16.gmra.mxu0 %vm424_vm0, %v5519_v45 }
  0xc2   : > { %v700_v57 = vsel %vm6278_vm9, %v692_v53, %v699_v54  ;;  %v1016_v58 = vsel %vm6284_vm10, %v701_v55, %v1015_v52  ;;  %v652_v59 = vpack.c.bf16 %v564_v56, %v564_v56  ;;  %v5814_v29 = vld [vmem:[#allocation2 + $0xc] sm:$0xe]  ;;  %v1025_v56 = vld [vmem:[#allocation2 + $0x24] sm:$0xf] }
  0xc3   : > { %1012 = vst.msk [vmem:[#allocation2 + $0x10] sm:$0xf] %vm594_vm2, %v700_v57 }
  0xc4   : > { %1017 = vst [vmem:[#allocation2 + $0x14] sm:$0x1] %v1016_v58  ;;  %v703_v60 = vshrl.u32 %v652_v59, 16  ;;  %v706_v63 = vshll.u32 %v652_v59, 16 }
  0xc5   : > { %v489_v61 = vpop.f32.mrf.mxu0 }
  0xc6   : > { %v705_v62 = vrot.slane %v703_v60, 7  ;;  %v490_v0 = vadd.f32 %v6226_v27, %v489_v61 }
  0xc8   : > { %v708_v2 = vor.u32 %v706_v63, %v705_v62  ;;  %v565_v3 = vmax.f32 %v490_v0, 0.0  ;;  %v709_v24 = vrot.slane %v705_v62, 4  ;;  %v5817_v0 = vld [vmem:[#allocation2 + $0xc] sm:$0xe] }
  0xca   : > { %v1019_v4 = vsel %vm6259_vm6, %v708_v2, %v1018_v1  ;;  %v653_v5 = vpack.c.bf16 %v565_v3, %v565_v3  ;;  %v6297_v6 = vld [vmem:[#allocation2 + $0xc] sm:$0xff]  }
  0xcb   : > { %v5813_v7 = vld [vmem:[#allocation2 + $0xc] sm:$0xf0]  ;;  %1020 = vst [vmem:[#allocation2 + $0x18] sm:$0xf] %v1019_v4  ;;  %v1769_v10 = vld [vmem:[#allocation2 + $0x14] sm:$0x1] }
  0xcc   : > { %v6299_v8 = vld [vmem:[#allocation2 + $0xc] sm:$0xff]   ;;  %v1156_v12 = vld [vmem:[#allocation2 + $0x14] sm:$0x1]  ;;  %v711_v13 = vshrl.u32 %v653_v5, 16  ;;  %v1897_v15 = vunpack.c.l.b16 %v1769_v10  ;;  %v714_v17 = vshll.u32 %v653_v5, 16  ;;  %v1930_v25 = vshrl.u32 %v6297_v6, 16 }
  0xcd   : > { %v6301_v9 = vld [vmem:[#allocation2 + $0xc] sm:$0xf0]  ;;  %v1284_v16 = vunpack.c.l.b16 %v1156_v12  ;;  %v492_v18 = vpop.f32.mrf.mxu0  ;;  %v1932_v26 = vshll.u32 %v6297_v6, 16  ;;  %v1331_v28 = vshll.u32 %v6299_v8, 16  ;;  %v1329_v35 = vshrl.u32 %v6299_v8, 16 }
  0xce   : > { %v713_v19 = vrot.slane %v711_v13, 7  ;;  %v493_v21 = vadd.f32 %v6226_v27, %v492_v18  ;;  %v1913_v22 = vpack.c.b16 %v1897_v15, %v1897_v15  ;;  %v5815_v53 = vor.u32 %v5814_v29, %v5813_v7  ;;  %v5521_v5 = vld [vmem:[%s6120_s16 + $0x58] sm:$0xff] }
  0xcf   : > { %v6305_v23 = vpack.c.b16 %v1284_v16, %v1284_v16  ;;  %v1934_v34 = vrot.slane %v1932_v26, 1  ;;  %v1333_v36 = vrot.slane %v1331_v28, 1 }
  0xd0   : > { %v716_v30 = vor.u32 %v714_v17, %v713_v19  ;;  %v718_v31 = vrot.slane %v713_v19, 4  ;;  %v566_v32 = vmax.f32 %v493_v21, 0.0  ;;  %5424 = vmatmul.msk.bf16.gmra.mxu0 %vm424_vm0, %v5520_v14  ;;  %v1937_v33 = vshll.u32 %v1913_v22, 16 }
  0xd1   : > { %v1336_v37 = vshll.u32 %v6305_v23, 16  ;;  %v1935_v42 = vor.u32 %v1934_v34, %v1930_v25  ;;  %v1334_v44 = vor.u32 %v1333_v36, %v1329_v35  ;;  %v2201_v59 = vrot.slane %v5815_v53, 1 }
  0xd2   : > { %v717_v39 = vsel %vm6278_vm9, %v709_v24, %v716_v30  ;;  %v1023_v40 = vsel %vm6284_vm10, %v718_v31, %v1022_v20  ;;  %v654_v41 = vpack.c.bf16 %v566_v32, %v566_v32  ;;  %v1939_v43 = vrot.slane %v1937_v33, 1  ;;  %v1029_v20 = vld [vmem:[#allocation2 + $0x2c] sm:$0x1] }
  0xd3   : > { %1021 = vst.msk [vmem:[#allocation2 + $0x1c] sm:$0xf] %vm594_vm2, %v717_v39  ;;  %v1338_v45 = vrot.slane %v1336_v37, 1  ;;  %v2202_v60 = vrot.slane %v1913_v22, 1  ;;  %v5818_v22 = vor.u32 %v5817_v0, %v6301_v9  ;;  %v5699_v37 = vld [vmem:[#allocation2 + $0x18] sm:$0xe] }
  0xd4   : > { %1024 = vst [vmem:[#allocation2 + $0x20] sm:$0x1] %v1023_v40  ;;  %v720_v46 = vshrl.u32 %v654_v41, 16  ;;  %v723_v48 = vshll.u32 %v654_v41, 16  ;;  %v1940_v50 = vsel %vm1315_vm3, %v1935_v42, %v1939_v43  ;;  %v1593_v40 = vrot.slane %v6305_v23, 1 }
  0xd5   : > { %v494_v49 = vpop.f32.mrf.mxu0  ;;  %v1339_v52 = vsel %vm1315_vm3, %v1334_v44, %v1338_v45  ;;  %2121 = vrot.lane.b32.xlu2 %v1940_v50, %s5986_s12  ;;  %v2203_v12 = vsel %vm1588_vm4, %v2201_v59, %v2202_v60  ;;  %v1592_v39 = vrot.slane %v5818_v22, 1  ;;  %v5668_v45 = vld [vmem:[#allocation2 + $0x18] sm:$0xe] }
  0xd6   : > { %v722_v54 = vrot.slane %v720_v46, 7  ;;  %v495_v55 = vadd.f32 %v6226_v27, %v494_v49  ;;  %1510 = vrot.lane.b32.xlu0 %v1339_v52, %s5986_s12 }
  0xd8   : > { %v725_v57 = vor.u32 %v723_v48, %v722_v54  ;;  %v567_v58 = vmax.f32 %v495_v55, 0.0  ;;  %v726_v14 = vrot.slane %v722_v54, 4  ;;  %v1032_v55 = vld [vmem:[#allocation2 + $0x30] sm:$0xf] }
  0xda   : > { %v1026_v61 = vsel %vm6259_vm6, %v725_v57, %v1025_v56  ;;  %v655_v62 = vpack.c.bf16 %v567_v58, %v567_v58  ;;  %v5597_v63 = vld [vmem:[#allocation2 + $0x18] sm:$0xff]   ;;  %v6353_v56 = vsel %vm1588_vm4, %v1592_v39, %v1593_v40 }
  0xdb   : > { %1027 = vst [vmem:[#allocation2 + $0x24] sm:$0xf] %v1026_v61  ;;  %v2650_v1 = vld [vmem:[#allocation2 + $0x20] sm:$0x1]  ;;  %v2813_v2 = vshll.u32 %v5597_v63, 16  ;;  %v2811_v21 = vshrl.u32 %v5597_v63, 16 }
  0xdc   : > { %v728_v3 = vshrl.u32 %v655_v62, 16  ;;  %v731_v4 = vshll.u32 %v655_v62, 16  ;;  %v2778_v7 = vunpack.c.l.b16 %v2650_v1  ;;  %v1157_v18 = vld [vmem:[#allocation2 + $0x20] sm:$0x1]  ;;  %v5698_v30 = vld [vmem:[#allocation2 + $0x18] sm:$0xf0] }
  0xdd   : > { %v497_v10 = vpop.f32.mrf.mxu0  ;;  %v2815_v13 = vrot.slane %v2813_v2, 1  ;;  %2249 = vrot.lane.b32.xlu2 %v2203_v12, %s5987_s29  ;;  %v1770_v19 = vld [vmem:[#allocation2 + $0x20] sm:$0x1]  ;;  %v1285_v31 = vunpack.c.l.b16 %v1157_v18  ;;  %v5667_v36 = vld [vmem:[#allocation2 + $0x18] sm:$0xf0]  ;;  %v5700_v44 = vor.u32 %v5699_v37, %v5698_v30 }
  0xde   : > { %v730_v15 = vrot.slane %v728_v3, 7  ;;  %v498_v16 = vadd.f32 %v6226_v27, %v497_v10  ;;  %v6329_v17 = vpack.c.b16 %v2778_v7, %v2778_v7  ;;  %v1898_v32 = vunpack.c.l.b16 %v1770_v19  ;;  %v6350_v23 = vld [vmem:[#allocation2 + $0x18] sm:$0xf0]  ;;  %v6356_v61 = vld [vmem:[#allocation2 + $0x18] sm:$0xe] }
  0xdf   : > { %v6334_v29 = vor.u32 %v2815_v13, %v2811_v21  ;;  %v6345_v48 = vpack.c.b16 %v1285_v31, %v1285_v31  ;;  %v5669_v49 = vor.u32 %v5668_v45, %v5667_v36  ;;  %v3082_v59 = vrot.slane %v5700_v44, 1  ;;  %v5522_v18 = vld [vmem:[%s6120_s16 + $0x60] sm:$0xff] }
  0xe0   : > { %v733_v24 = vor.u32 %v731_v4, %v730_v15  ;;  %v735_v25 = vrot.slane %v730_v15, 4  ;;  %v568_v26 = vmax.f32 %v498_v16, 0.0  ;;  %5425 = vmatmul.msk.bf16.gmra.mxu0 %vm424_vm0, %v5521_v5  ;;  %v2818_v28 = vshll.u32 %v6329_v17, 16 }
  0xe1   : > { %v6348_v54 = vpack.c.b16 %v1898_v32, %v1898_v32  ;;  %v3083_v60 = vrot.slane %v6329_v17, 1  ;;  %v1348_v62 = vshll.u32 %v6345_v48, 16  ;;  %v6359_v63 = vrot.slane %v5669_v49, 1 }
  0xe2   : > { %v734_v33 = vsel %vm6278_vm9, %v726_v14, %v733_v24  ;;  %v1030_v34 = vsel %vm6284_vm10, %v735_v25, %v1029_v20  ;;  %v656_v35 = vpack.c.bf16 %v568_v26, %v568_v26  ;;  %v2820_v9 = vrot.slane %v2818_v28, 1  ;;  %v5820_v53 = vld [vmem:[#allocation2 + $0x24] sm:$0xe] }
  0xe3   : > { %1028 = vst.msk [vmem:[#allocation2 + $0x28] sm:$0xf] %vm594_vm2, %v734_v33  ;;  %v5640_v0 = vor.u32 %v6356_v61, %v6350_v23  ;;  %v1949_v5 = vshll.u32 %v6348_v54, 16  ;;  %v2205_v7 = vrot.slane %v6348_v54, 1  ;;  %v6373_v13 = vld [vmem:[#allocation2 + $0x24] sm:$0xe]  ;;  %v3084_v17 = vsel %vm1588_vm4, %v3082_v59, %v3083_v60 }
  0xe4   : > { %1031 = vst [vmem:[#allocation2 + $0x2c] sm:$0x1] %v1030_v34  ;;  %v737_v41 = vshrl.u32 %v656_v35, 16  ;;  %v740_v42 = vshll.u32 %v656_v35, 16  ;;  %v2821_v43 = vsel %vm1315_vm3, %v6334_v29, %v2820_v9  ;;  %v1350_v24 = vrot.slane %v1348_v62, 1 }
  0xe5   : > { %3002 = vrot.lane.b32.xlu1 %v2821_v43, %s5986_s12  ;;  %v499_v46 = vpop.f32.mrf.mxu0  ;;  %v1036_v33 = vld [vmem:[#allocation2 + $0x38] sm:$0x1]  ;;  %v6384_v44 = vld [vmem:[#allocation2 + $0x24] sm:$0xe] }
  0xe6   : > { %v739_v50 = vrot.slane %v737_v41, 7  ;;  %v500_v52 = vadd.f32 %v6226_v27, %v499_v46 }
  0xe8   : > { %v742_v57 = vor.u32 %v740_v42, %v739_v50  ;;  %v569_v58 = vmax.f32 %v500_v52, 0.0  ;;  %v743_v25 = vrot.slane %v739_v50, 4  ;;  %v5524_v52 = vld [vmem:[%s6120_s16 + $0x70] sm:$0xff] }
  0xe9   : > { %5428 = vmatmul.msk.bf16.vlgmr.msra.gmra.mxu1 %vm424_vm0, %v5524_v52 }
  0xea   : > { %v1033_v1 = vsel %vm6259_vm6, %v742_v57, %v1032_v55  ;;  %v657_v2 = vpack.c.bf16 %v569_v58, %v569_v58  ;;  %v6365_v3 = vld [vmem:[#allocation2 + $0x24] sm:$0xff]  }
  0xeb   : > { %v5819_v4 = vld [vmem:[#allocation2 + $0x24] sm:$0xf0]  ;;  %1034 = vst [vmem:[#allocation2 + $0x30] sm:$0xf] %v1033_v1  ;;  %v2651_v14 = vld [vmem:[#allocation2 + $0x2c] sm:$0x1] }
  0xec   : > { %v6369_v10 = vld [vmem:[#allocation2 + $0x24] sm:$0xff]   ;;  %v745_v15 = vshrl.u32 %v657_v2, 16  ;;  %v748_v16 = vshll.u32 %v657_v2, 16  ;;  %v2779_v19 = vunpack.c.l.b16 %v2651_v14  ;;  %v1158_v20 = vld [vmem:[#allocation2 + $0x2c] sm:$0x1]  ;;  %v5821_v22 = vor.u32 %v5820_v53, %v5819_v4 }
  0xed   : > { %v6371_v12 = vld [vmem:[#allocation2 + $0x24] sm:$0xf0]  ;;  %3130 = vrot.lane.b32.xlu1 %v3084_v17, %s5987_s29  ;;  %v502_v21 = vpop.f32.mrf.mxu0  ;;  %v2825_v35 = vshll.u32 %v6365_v3, 16  ;;  %v1286_v9 = vunpack.c.l.b16 %v1158_v20  ;;  %v2823_v41 = vshrl.u32 %v6365_v3, 16  ;;  %v1771_v53 = vld [vmem:[#allocation2 + $0x2c] sm:$0x1]  ;;  %v2206_v20 = vsel %vm1588_vm4, %v6359_v63, %v2205_v7 }
  0xee   : > { %v747_v26 = vrot.slane %v745_v15, 7  ;;  %v503_v28 = vadd.f32 %v6226_v27, %v502_v21  ;;  %v2795_v30 = vpack.c.b16 %v2779_v19, %v2779_v19  ;;  %v6379_v31 = vld [vmem:[#allocation2 + $0x24] sm:$0xff]   ;;  %v3085_v34 = vrot.slane %v5821_v22, 1  ;;  %v1039_v19 = vld [vmem:[#allocation2 + $0x3c] sm:$0xf] }
  0xef   : > { %v5822_v32 = vld [vmem:[#allocation2 + $0x24] sm:$0xf0]  ;;  %v2827_v42 = vrot.slane %v2825_v35, 1  ;;  %v6394_v58 = vpack.c.b16 %v1286_v9, %v1286_v9  ;;  %v1355_v62 = vshll.u32 %v6369_v10, 16  ;;  %v1899_v14 = vunpack.c.l.b16 %v1771_v53  ;;  %v5523_v7 = vld [vmem:[%s6120_s16 + $0x68] sm:$0xff] }
  0xf0   : > { %v750_v36 = vor.u32 %v748_v16, %v747_v26  ;;  %v752_v37 = vrot.slane %v747_v26, 4  ;;  %v570_v39 = vmax.f32 %v503_v28, 0.0  ;;  %5426 = vmatmul.msk.bf16.gmra.mxu0 %vm424_vm0, %v5522_v18  ;;  %v3086_v40 = vrot.slane %v2795_v30, 1 }
  0xf1   : > { %v2830_v43 = vshll.u32 %v2795_v30, 16  ;;  %v2828_v55 = vor.u32 %v2827_v42, %v2823_v41  ;;  %v1360_v4 = vshll.u32 %v6394_v58, 16  ;;  %v1951_v17 = vrot.slane %v1949_v5, 1 }
  0xf2   : > { %v751_v45 = vsel %vm6278_vm9, %v743_v25, %v750_v36  ;;  %v1037_v46 = vsel %vm6284_vm10, %v752_v37, %v1036_v33  ;;  %v658_v49 = vpack.c.bf16 %v570_v39, %v570_v39  ;;  %v3087_v50 = vsel %vm1588_vm4, %v3085_v34, %v3086_v40  ;;  %v5702_v25 = vld [vmem:[#allocation2 + $0x30] sm:$0xe] }
  0xf3   : > { %1035 = vst.msk [vmem:[#allocation2 + $0x34] sm:$0xf] %vm594_vm2, %v751_v45  ;;  %3132 = vrot.lane.b32.xlu0 %v3087_v50, %s5987_s29  ;;  %v2832_v57 = vrot.slane %v2830_v43, 1  ;;  %v5824_v18 = vor.u32 %v6373_v13, %v5822_v32  ;;  %v6416_v21 = vrot.slane %v5640_v0, 1  ;;  %v1596_v22 = vrot.slane %v6345_v48, 1 }
  0xf4   : > { %1038 = vst [vmem:[#allocation2 + $0x38] sm:$0x1] %v1037_v46  ;;  %v754_v59 = vshrl.u32 %v658_v49, 16  ;;  %v757_v60 = vshll.u32 %v658_v49, 16  ;;  %v1353_v26 = vshrl.u32 %v6369_v10, 16  ;;  %v1357_v28 = vrot.slane %v1355_v62, 1 }
  0xf5   : > { %1639 = vrot.lane.b32.xlu1 %v6353_v56, %s5987_s29  ;;  %v504_v1 = vpop.f32.mrf.mxu0  ;;  %v2833_v2 = vsel %vm1315_vm3, %v2828_v55, %v2832_v57  ;;  %v1351_v56 = vsel %vm1315_vm3, %v6334_v29, %v1350_v24  ;;  %v6421_v24 = vrot.slane %v1360_v4, 1  ;;  %v6423_v54 = vpack.c.b16 %v1899_v14, %v1899_v14 }
  0xf6   : > { %v6402_v15 = vrot.slane %v754_v59, 7  ;;  %v505_v16 = vadd.f32 %v6226_v27, %v504_v1  ;;  %3004 = vrot.lane.b32.xlu2 %v2833_v2, %s5986_s12  ;;  %v1956_v63 = vshll.u32 %v6379_v31, 16  ;;  %v5827_v23 = vor.u32 %v6384_v44, %v6371_v12  ;;  %v1043_v59 = vld [vmem:[#allocation2 + $0x44] sm:$0x1] }
  0xf7   : > { %v1954_v33 = vshrl.u32 %v6379_v31, 16  ;;  %v6432_v34 = vrot.slane %v5824_v18, 1  ;;  %v1952_v9 = vsel %vm1315_vm3, %v6334_v29, %v1951_v17  ;;  %v6438_v42 = vor.u32 %v1357_v28, %v1353_v26  ;;  %v5642_v28 = vld [vmem:[#allocation2 + $0x30] sm:$0xe] }
  0xf8   : > { %v759_v5 = vor.u32 %v757_v60, %v6402_v15  ;;  %v571_v13 = vmax.f32 %v505_v16, 0.0  ;;  %v760_v35 = vrot.slane %v6402_v15, 4  ;;  %v1958_v46 = vrot.slane %v1956_v63, 1 }
  0xf9   : > { %v1961_v49 = vshll.u32 %v6423_v54, 16  ;;  %v2208_v50 = vrot.slane %v6423_v54, 1  ;;  %v1598_v52 = vrot.slane %v5827_v23, 1  ;;  %v1599_v1 = vrot.slane %v6394_v58, 1 }
  0xfa   : > { %v1040_v61 = vsel %vm6259_vm6, %v759_v5, %v1039_v19  ;;  %v659_v0 = vpack.c.bf16 %v571_v13, %v571_v13  ;;  %v5701_v30 = vld [vmem:[#allocation2 + $0x30] sm:$0xf0]  ;;  %v5671_v5 = vld [vmem:[#allocation2 + $0x30] sm:$0xe]  ;;  %v1959_v23 = vor.u32 %v1958_v46, %v1954_v33 }
  0xfb   : > { %v5691_v32 = vld [vmem:[#allocation2 + $0x30] sm:$0xff]   ;;  %1041 = vst [vmem:[#allocation2 + $0x3c] sm:$0xf] %v1040_v61  ;;  %1512 = vrot.lane.b32.xlu0 %v1351_v56, %s5986_s12  ;;  %v2652_v12 = vld [vmem:[#allocation2 + $0x38] sm:$0x1]  ;;  %v5703_v36 = vor.u32 %v5702_v25, %v5701_v30  ;;  %v1963_v61 = vrot.slane %v1961_v49, 1  ;;  %v2209_v46 = vsel %vm1588_vm4, %v6432_v34, %v2208_v50  ;;  %v1600_v49 = vsel %vm1588_vm4, %v1598_v52, %v1599_v1 }
  0xfc   : > { %v2837_v37 = vshll.u32 %v5691_v32, 16  ;;  %v762_v39 = vshrl.u32 %v659_v0, 16  ;;  %v765_v40 = vshll.u32 %v659_v0, 16  ;;  %v2780_v41 = vunpack.c.l.b16 %v2652_v12  ;;  %v1159_v43 = vld [vmem:[#allocation2 + $0x38] sm:$0x1] }
  0xfd   : > { %v1772_v44 = vld [vmem:[#allocation2 + $0x38] sm:$0x1]  ;;  %2123 = vrot.lane.b32.xlu1 %v1952_v9, %s5986_s12  ;;  %v507_v45 = vpop.f32.mrf.mxu0  ;;  %v1287_v57 = vunpack.c.l.b16 %v1159_v43  ;;  %v3088_v60 = vrot.slane %v5703_v36, 1  ;;  %v2835_v17 = vshrl.u32 %v5691_v32, 16  ;;  %v5641_v0 = vld [vmem:[#allocation2 + $0x30] sm:$0xf0]  ;;  %v1597_v32 = vsel %vm1588_vm4, %v6416_v21, %v1596_v22 }
  0xfe   : > { %v764_v29 = vrot.slane %v762_v39, 7  ;;  %v508_v53 = vadd.f32 %v6226_v27, %v507_v45  ;;  %2251 = vrot.lane.b32.xlu2 %v2206_v20, %s5987_s29  ;;  %v2796_v55 = vpack.c.b16 %v2780_v41, %v2780_v41  ;;  %v2839_v62 = vrot.slane %v2837_v37, 1  ;;  %v5670_v20 = vld [vmem:[#allocation2 + $0x30] sm:$0xf0]  ;;  %v1046_v43 = vld [vmem:[#allocation2 + $0x48] sm:$0xf] }
  0xff   : > { %v1900_v2 = vunpack.c.l.b16 %v1772_v44  ;;  %v6447_v19 = vpack.c.b16 %v1287_v57, %v1287_v57  ;;  %v5672_v9 = vor.u32 %v5671_v5, %v5670_v20  ;;  %v5643_v21 = vor.u32 %v5642_v28, %v5641_v0 }
 0x100   : > { %v767_v4 = vor.u32 %v765_v40, %v764_v29  ;;  %v769_v14 = vrot.slane %v764_v29, 4  ;;  %v572_v15 = vmax.f32 %v508_v53, 0.0  ;;  %5427 = vmatmul.msk.bf16.gmra.mxu0 %vm424_vm0, %v5523_v7  ;;  %v3089_v16 = vrot.slane %v2796_v55, 1 }
 0x101   : > { %v2842_v18 = vshll.u32 %v2796_v55, 16  ;;  %v6449_v56 = vpack.c.b16 %v1900_v2, %v1900_v2  ;;  %v6458_v54 = vor.u32 %v2839_v62, %v2835_v17  ;;  %v1372_v33 = vshll.u32 %v6447_v19, 16 }
 0x102   : > { %v768_v13 = vsel %vm6278_vm9, %v760_v35, %v767_v4  ;;  %v1044_v58 = vsel %vm6284_vm10, %v769_v14, %v1043_v59  ;;  %v660_v25 = vpack.c.bf16 %v572_v15, %v572_v15  ;;  %v3090_v26 = vsel %vm1588_vm4, %v3088_v60, %v3089_v16  ;;  %v5525_v35 = vld [vmem:[%s6120_s16 + $0x78] sm:$0xff]  ;;  %v5829_v37 = vld [vmem:[#allocation2 + $0x3c] sm:$0xe] }
 0x103   : > { %1042 = vst.msk [vmem:[#allocation2 + $0x40] sm:$0xf] %vm594_vm2, %v768_v13  ;;  %3134 = vrot.lane.b32.xlu0 %v3090_v26, %s5987_s29  ;;  %v2844_v63 = vrot.slane %v2842_v18, 1  ;;  %5429 = vmatmul.msk.bf16.gmra.mxu1 %vm424_vm0, %v5525_v35  ;;  %v1973_v48 = vshll.u32 %v6449_v56, 16  ;;  %v6473_v22 = vld [vmem:[#allocation2 + $0x3c] sm:$0xe]  ;;  %v1363_v44 = vsel %vm1315_vm3, %v6438_v42, %v6421_v24  ;;  %v1964_v45 = vsel %vm1315_vm3, %v1959_v23, %v1963_v61 }
 0x104   : > { %1045 = vst [vmem:[#allocation2 + $0x44] sm:$0x1] %v1044_v58  ;;  %v771_v7 = vshrl.u32 %v660_v25, 16  ;;  %v774_v30 = vshll.u32 %v660_v25, 16  ;;  %v6475_v41 = vld [vmem:[#allocation2 + $0x3c] sm:$0xe] }
 0x105   : > { %1641 = vrot.lane.b32.xlu1 %v1597_v32, %s5987_s29  ;;  %v509_v12 = vpop.f32.mrf.mxu0  ;;  %v2845_v36 = vsel %vm1315_vm3, %v6458_v54, %v2844_v63  ;;  %v2210_v55 = vrot.slane %v5672_v9, 1  ;;  %v1374_v57 = vrot.slane %v1372_v33, 1  ;;  %v2211_v59 = vrot.slane %v6449_v56, 1  ;;  %v1050_v63 = vld [vmem:[#allocation2 + $0x50] sm:$0x1] }
 0x106   : > { %v773_v39 = vrot.slane %v771_v7, 7  ;;  %v510_v40 = vadd.f32 %v6226_v27, %v509_v12  ;;  %3006 = vrot.lane.b32.xlu2 %v2845_v36, %s5986_s12  ;;  %v1975_v42 = vrot.slane %v1973_v48, 1  ;;  %v6489_v4 = vrot.slane %v5643_v21, 1 }
 0x107   : > { %v1602_v17 = vrot.slane %v6447_v19, 1  ;;  %v6504_v13 = vsel %vm1315_vm3, %v6458_v54, %v1374_v57 }
 0x108   : > { %v776_v29 = vor.u32 %v774_v30, %v773_v39  ;;  %v573_v53 = vmax.f32 %v510_v40, 0.0  ;;  %v777_v25 = vrot.slane %v773_v39, 4 }
 0x10a   : > { %v1047_v60 = vsel %vm6259_vm6, %v776_v29, %v1046_v43  ;;  %v661_v62 = vpack.c.bf16 %v573_v53, %v573_v53  ;;  %v6487_v2 = vld [vmem:[#allocation2 + $0x3c] sm:$0xff]   ;;  %v2212_v29 = vsel %vm1588_vm4, %v2210_v55, %v2211_v59  ;;  %v1509_v53 = vpop.permute.xlu0 %1508 }
 0x10b   : > { %v5828_v24 = vld [vmem:[#allocation2 + $0x3c] sm:$0xf0]  ;;  %1048 = vst [vmem:[#allocation2 + $0x48] sm:$0xf] %v1047_v60  ;;  %1514 = vrot.lane.b32.xlu0 %v1363_v44, %s5986_s12  ;;  %v2653_v50 = vld [vmem:[#allocation2 + $0x44] sm:$0x1] }
 0x10c   : > { %v6491_v14 = vld [vmem:[#allocation2 + $0x3c] sm:$0xff]   ;;  %v1160_v52 = vld [vmem:[#allocation2 + $0x44] sm:$0x1]  ;;  %v779_v1 = vshrl.u32 %v661_v62, 16  ;;  %v782_v15 = vshll.u32 %v661_v62, 16  ;;  %v2781_v16 = vunpack.c.l.b16 %v2653_v50  ;;  %v5830_v5 = vor.u32 %v5829_v37, %v5828_v24 }
 0x10d   : > { %v6493_v34 = vld [vmem:[#allocation2 + $0x3c] sm:$0xf0]  ;;  %2125 = vrot.lane.b32.xlu1 %v1964_v45, %s5986_s12  ;;  %v512_v20 = vpop.f32.mrf.mxu0  ;;  %v1288_v58 = vunpack.c.l.b16 %v1160_v52  ;;  %v2849_v61 = vshll.u32 %v6487_v2, 16  ;;  %v2847_v35 = vshrl.u32 %v6487_v2, 16  ;;  %v1379_v43 = vshll.u32 %v6491_v14, 16 }
 0x10e   : > { %v6497_v18 = vld [vmem:[#allocation2 + $0x3c] sm:$0xff]   ;;  %v781_v26 = vrot.slane %v779_v1, 7  ;;  %v513_v28 = vadd.f32 %v6226_v27, %v512_v20  ;;  %2253 = vrot.lane.b32.xlu2 %v2209_v46, %s5987_s29  ;;  %v2797_v19 = vpack.c.b16 %v2781_v16, %v2781_v16  ;;  %v3091_v23 = vrot.slane %v5830_v5, 1  ;;  %v1773_v44 = vld [vmem:[#allocation2 + $0x44] sm:$0x1] }
 0x10f   : > { %v6499_v56 = vld [vmem:[#allocation2 + $0x3c] sm:$0xf0]  ;;  %v2851_v9 = vrot.slane %v2849_v61, 1  ;;  %v6510_v36 = vpack.c.b16 %v1288_v58, %v1288_v58  ;;  %v1976_v24 = vsel %vm1315_vm3, %v6458_v54, %v1975_v42  ;;  %v1736_v50 = vld [vmem:[%s8534_s3 + $0x8] sm:$0xf]  ;;  %v1901_v59 = vunpack.c.l.b16 %v1773_v44 }
 0x110   : > { %v784_v0 = vor.u32 %v782_v15, %v781_v26  ;;  %v786_v7 = vrot.slane %v781_v26, 4  ;;  %v574_v30 = vmax.f32 %v513_v28, 0.0  ;;  %v3092_v32 = vrot.slane %v2797_v19, 1 }
 0x111   : > { %v2854_v12 = vshll.u32 %v2797_v19, 16  ;;  %v2852_v48 = vor.u32 %v2851_v9, %v2847_v35  ;;  %v1384_v57 = vshll.u32 %v6510_v36, 16  ;;  %v2489_v1 = vunpack.c.l.b16 %v1736_v50 }
 0x112   : > { %v785_v37 = vsel %vm6278_vm9, %v777_v25, %v784_v0  ;;  %v1051_v33 = vsel %vm6284_vm10, %v786_v7, %v1050_v63  ;;  %v662_v39 = vpack.c.bf16 %v574_v30, %v574_v30  ;;  %v3093_v40 = vsel %vm1588_vm4, %v3091_v23, %v3092_v32  ;;  %v5705_v58 = vld [vmem:[#allocation2 + $0x48] sm:$0xe] }
 0x113   : > { %1049 = vst.msk [vmem:[#allocation2 + $0x4c] sm:$0xf] %vm594_vm2, %v785_v37  ;;  %3136 = vrot.lane.b32.xlu0 %v3093_v40, %s5987_s29  ;;  %v2856_v21 = vrot.slane %v2854_v12, 1  ;;  %v6535_v15 = vsel %vm1588_vm4, %v6489_v4, %v1602_v17  ;;  %v1377_v54 = vshrl.u32 %v6491_v14, 16  ;;  %v1381_v42 = vrot.slane %v1379_v43, 1 }
 0x114   : > { %1052 = vst [vmem:[#allocation2 + $0x50] sm:$0x1] %v1051_v33  ;;  %v788_v45 = vshrl.u32 %v662_v39, 16  ;;  %v791_v46 = vshll.u32 %v662_v39, 16  ;;  %v1980_v16 = vshll.u32 %v6497_v18, 16  ;;  %v1671_v25 = vsel %vm1669_vm11, %v6167_v11, %v1509_v53  ;;  %v5527_v53 = vld [vmem:[%s8534_s3] sm:$0xff] }
 0x115   : > { %1643 = vrot.lane.b32.xlu1 %v1600_v49, %s5987_s29  ;;  %v514_v60 = vpop.f32.mrf.mxu0  ;;  %v2857_v62 = vsel %vm1315_vm3, %v2852_v48, %v2856_v21  ;;  %v1053_v49 = vld [vmem:[#allocation2 + $0x54] sm:$0xf]  ;;  %v6542_v26 = vrot.slane %v1384_v57, 1  ;;  %v6544_v28 = vpack.c.b16 %v1901_v59, %v1901_v59  ;;  %v1978_v19 = vshrl.u32 %v6497_v18, 16  ;;  %v1638_v57 = vpop.permute.xlu0 %1637 }
 0x116   : > { %v6529_v52 = vrot.slane %v788_v45, 7  ;;  %v515_v55 = vadd.f32 %v6226_v27, %v514_v60  ;;  %3008 = vrot.lane.b32.xlu2 %v2857_v62, %s5986_s12  ;;  %v2491_v4 = vpack.c.b16 %v2489_v1, %v2489_v1  ;;  %v1982_v7 = vrot.slane %v1980_v16, 1  ;;  %v5432_v40 = vld [vmem:[%s8534_s3 + $0x14] sm:$0xf]  ;;  %v1057_v60 = vld [vmem:[#allocation2 + $0x5c] sm:$0x1] }
 0x117   : > { %v6552_v35 = vor.u32 %v1381_v42, %v1377_v54  ;;  %v1985_v9 = vshll.u32 %v6544_v28, 16  ;;  %v5833_v39 = vor.u32 %v6473_v22, %v6499_v56  ;;  %v2214_v43 = vrot.slane %v6544_v28, 1 }
 0x118   : > { %v793_v20 = vor.u32 %v791_v46, %v6529_v52  ;;  %v575_v5 = vmax.f32 %v515_v55, 0.0  ;;  %v794_v17 = vrot.slane %v6529_v52, 4  ;;  %v2526_v21 = vsel %vm2391_vm12, %v2491_v4, 0 }
 0x119   : > { %v5836_v44 = vor.u32 %v6475_v41, %v6493_v34  ;;  %v1983_v56 = vor.u32 %v1982_v7, %v1978_v19  ;;  %2534 = vmatpush.bf16.msra.mxu2 %v2526_v21  ;;  %v1987_v50 = vrot.slane %v1985_v9, 1  ;;  %v2354_v52 = vunpack.c.l.b16 %v5432_v40  ;;  %v5674_v19 = vld [vmem:[#allocation2 + $0x48] sm:$0xe] }
 0x11a   : > { %v1054_v63 = vsel %vm6259_vm6, %v793_v20, %v1053_v49  ;;  %v663_v23 = vpack.c.bf16 %v575_v5, %v575_v5  ;;  %v5704_v61 = vld [vmem:[#allocation2 + $0x48] sm:$0xf0] }
 0x11b   : > { %v5692_v0 = vld [vmem:[#allocation2 + $0x48] sm:$0xff]   ;;  %1055 = vst [vmem:[#allocation2 + $0x54] sm:$0xf] %v1054_v63  ;;  %1516 = vrot.lane.b32.xlu0 %v6504_v13, %s5986_s12  ;;  %v2654_v11 = vld [vmem:[#allocation2 + $0x50] sm:$0x1]  ;;  %v5706_v30 = vor.u32 %v5705_v58, %v5704_v61  ;;  %v2356_v1 = vpack.c.b16 %v2354_v52, %v2354_v52  ;;  %v2213_v63 = vrot.slane %v5833_v39, 1 }
 0x11c   : > { %v2861_v32 = vshll.u32 %v5692_v0, 16  ;;  %v796_v12 = vshrl.u32 %v663_v23, 16  ;;  %v799_v37 = vshll.u32 %v663_v23, 16  ;;  %v2782_v33 = vunpack.c.l.b16 %v2654_v11  ;;  %v1161_v49 = vld [vmem:[#allocation2 + $0x50] sm:$0x1] }
 0x11d   : > { %2127 = vrot.lane.b32.xlu1 %v1976_v24, %s5986_s12  ;;  %v517_v13 = vpop.f32.mrf.mxu0  ;;  %v2859_v48 = vshrl.u32 %v5692_v0, 16  ;;  %v3094_v62 = vrot.slane %v5706_v30, 1  ;;  %v1774_v54 = vld [vmem:[#allocation2 + $0x50] sm:$0x1]  ;;  %2535 = vmatpush.bf16.msra.mxu2 %v5527_v53  ;;  %v5673_v58 = vld [vmem:[#allocation2 + $0x48] sm:$0xf0]  ;;  %v1289_v7 = vunpack.c.l.b16 %v1161_v49  ;;  %v2215_v53 = vsel %vm1588_vm4, %v2213_v63, %v2214_v43 }
 0x11e   : > { %v798_v45 = vrot.slane %v796_v12, 7  ;;  %v518_v46 = vadd.f32 %v6226_v27, %v517_v13  ;;  %2255 = vrot.lane.b32.xlu2 %v2212_v29, %s5987_s29  ;;  %v2798_v22 = vpack.c.b16 %v2782_v33, %v2782_v33  ;;  %v2863_v24 = vrot.slane %v2861_v32, 1  ;;  %v5644_v30 = vld [vmem:[#allocation2 + $0x48] sm:$0xf0] }
 0x11f   : > { %v1703_v29 = vsel %vm424_vm0, %v1671_v25, %v1638_v57  ;;  %v2393_v23 = vsel %vm2391_vm12, %v2356_v1, 0  ;;  %v1902_v11 = vunpack.c.l.b16 %v1774_v54  ;;  %v1605_v33 = vrot.slane %v6510_v36, 1  ;;  %v5528_v39 = vld [vmem:[%s8534_s3 + $0xc] sm:$0xff] }
 0x120   : > { %v801_v55 = vor.u32 %v799_v37, %v798_v45  ;;  %v803_v41 = vrot.slane %v798_v45, 4  ;;  %v576_v34 = vmax.f32 %v518_v46, 0.0  ;;  %v3095_v59 = vrot.slane %v2798_v22, 1  ;;  %2401 = vmatpush.bf16.msrb.mxu1 %v2393_v23  ;;  %5457 = vmatmul.msk.bf16.vlgmr.msra.gmra.mxu2 %vm2358_vm13, %v1703_v29  ;;  %v1060_v45 = vld [vmem:[#allocation2 + $0x60] sm:$0xf] }
 0x121   : > { %v2866_v27 = vshll.u32 %v2798_v22, 16  ;;  %v6578_v25 = vor.u32 %v2863_v24, %v2859_v48  ;;  %v1604_v37 = vrot.slane %v5836_v44, 1  ;;  %v5675_v40 = vor.u32 %v5674_v19, %v5673_v58  ;;  %v1064_v23 = vld [vmem:[#allocation2 + $0x68] sm:$0x1] }
 0x122   : > { %v802_v42 = vsel %vm6278_vm9, %v794_v17, %v801_v55  ;;  %v1058_v16 = vsel %vm6284_vm10, %v803_v41, %v1057_v60  ;;  %v664_v20 = vpack.c.bf16 %v576_v34, %v576_v34  ;;  %v3096_v5 = vsel %vm1588_vm4, %v3094_v62, %v3095_v59  ;;  %v5645_v17 = vld [vmem:[#allocation2 + $0x48] sm:$0xe]  ;;  %v5838_v12 = vld [vmem:[#allocation2 + $0x54] sm:$0xe] }
 0x123   : > { %1056 = vst.msk [vmem:[#allocation2 + $0x58] sm:$0xf] %vm594_vm2, %v802_v42  ;;  %3138 = vrot.lane.b32.xlu0 %v3096_v5, %s5987_s29  ;;  %v2868_v4 = vrot.slane %v2866_v27, 1  ;;  %v6597_v21 = vpack.c.b16 %v1289_v7, %v1289_v7  ;;  %v6599_v44 = vpack.c.b16 %v1902_v11, %v1902_v11  ;;  %v6601_v36 = vld [vmem:[#allocation2 + $0x54] sm:$0xe]  ;;  %v1387_v46 = vsel %vm1315_vm3, %v6552_v35, %v6542_v26 }
 0x124   : > { %1059 = vst [vmem:[#allocation2 + $0x5c] sm:$0x1] %v1058_v16  ;;  %v805_v61 = vshrl.u32 %v664_v20, 16  ;;  %v808_v0 = vshll.u32 %v664_v20, 16  ;;  %v1988_v22 = vsel %vm1315_vm3, %v1983_v56, %v1987_v50  ;;  %2402 = vmatpush.bf16.msrb.mxu1 %v5528_v39  ;;  %v5646_v62 = vor.u32 %v5645_v17, %v5644_v30  ;;  %v6610_v24 = vld [vmem:[#allocation2 + $0x54] sm:$0xe] }
 0x125   : > { %1645 = vrot.lane.b32.xlu1 %v6535_v15, %s5987_s29  ;;  %v519_v32 = vpop.f32.mrf.mxu0  ;;  %v2869_v9 = vsel %vm1315_vm3, %v6578_v25, %v2868_v4  ;;  %v6593_v15 = vld [vmem:[%s8533_s2] ss:$0 sm:$0xff]  ;;  %v1606_v52 = vsel %vm1588_vm4, %v1604_v37, %v1605_v33  ;;  %v1396_v55 = vshll.u32 %v6597_v21, 16  ;;  %v2216_v41 = vrot.slane %v5675_v40, 1 }
 0x126   : > { %v807_v13 = vrot.slane %v805_v61, 7  ;;  %v520_v48 = vadd.f32 %v6593_v15, %v519_v32  ;;  %3010 = vrot.lane.b32.xlu2 %v2869_v9, %s5986_s12  ;;  %v1997_v43 = vshll.u32 %v6599_v44, 16  ;;  %v2217_v59 = vrot.slane %v6599_v44, 1 }
 0x127   : > { %v1607_v42 = vrot.slane %v5646_v62, 1  ;;  %v1398_v5 = vrot.slane %v1396_v55, 1  ;;  %v1608_v58 = vrot.slane %v6597_v21, 1 }
 0x128   : > { %v810_v57 = vor.u32 %v808_v0, %v807_v13  ;;  %v577_v60 = vmax.f32 %v520_v48, 0.0  ;;  %v811_v34 = vrot.slane %v807_v13, 4  ;;  %v1999_v0 = vrot.slane %v1997_v43, 1 }
 0x12a   : > { %v1061_v26 = vsel %vm6259_vm6, %v810_v57, %v1060_v45  ;;  %v665_v35 = vpack.c.bf16 %v577_v60, %v577_v60  ;;  %v6616_v56 = vld [vmem:[#allocation2 + $0x54] sm:$0xff]   ;;  %v2218_v57 = vsel %vm1588_vm4, %v2216_v41, %v2217_v59  ;;  %v2000_v41 = vsel %vm1315_vm3, %v6578_v25, %v1999_v0 }
 0x12b   : > { %v5837_v28 = vld [vmem:[#allocation2 + $0x54] sm:$0xf0]  ;;  %1062 = vst [vmem:[#allocation2 + $0x60] sm:$0xf] %v1061_v26  ;;  %1518 = vrot.lane.b32.xlu0 %v1387_v46, %s5986_s12  ;;  %v2655_v50 = vld [vmem:[#allocation2 + $0x5c] sm:$0x1] }
 0x12c   : > { %v6621_v27 = vld [vmem:[#allocation2 + $0x54] sm:$0xff]   ;;  %v813_v29 = vshrl.u32 %v665_v35, 16  ;;  %v816_v49 = vshll.u32 %v665_v35, 16  ;;  %v2783_v54 = vunpack.c.l.b16 %v2655_v50  ;;  %v5839_v20 = vor.u32 %v5838_v12, %v5837_v28  ;;  %v1162_v12 = vld [vmem:[#allocation2 + $0x5c] sm:$0x1] }
 0x12d   : > { %v6623_v1 = vld [vmem:[#allocation2 + $0x54] sm:$0xf0]  ;;  %2129 = vrot.lane.b32.xlu1 %v1988_v22, %s5986_s12  ;;  %v522_v16 = vpop.f32.mrf.mxu0  ;;  %v2873_v61 = vshll.u32 %v6616_v56, 16  ;;  %v2871_v37 = vshrl.u32 %v6616_v56, 16  ;;  %v1775_v46 = vld [vmem:[#allocation2 + $0x5c] sm:$0x1]  ;;  %v1290_v60 = vunpack.c.l.b16 %v1162_v12  ;;  %v1399_v28 = vsel %vm1315_vm3, %v6578_v25, %v1398_v5 }
 0x12e   : > { %v815_v19 = vrot.slane %v813_v29, 7  ;;  %v523_v4 = vadd.f32 %v6593_v15, %v522_v16  ;;  %2257 = vrot.lane.b32.xlu2 %v2215_v53, %s5987_s29  ;;  %v2799_v63 = vpack.c.b16 %v2783_v54, %v2783_v54  ;;  %v3097_v17 = vrot.slane %v5839_v20, 1  ;;  %v6631_v40 = vld [vmem:[#allocation2 + $0x54] sm:$0xff]  }
 0x12f   : > { %v2122_v32 = vpop.permute.xlu2 %2121  ;;  %v2875_v33 = vrot.slane %v2873_v61, 1  ;;  %v6633_v13 = vld [vmem:[#allocation2 + $0x54] sm:$0xf0]  ;;  %v1903_v43 = vunpack.c.l.b16 %v1775_v46  ;;  %v6654_v59 = vpack.c.b16 %v1290_v60, %v1290_v60  ;;  %v6659_v54 = vsel %vm1588_vm4, %v1607_v42, %v1608_v58 }
 0x130   : > { %v818_v7 = vor.u32 %v816_v49, %v815_v19  ;;  %v820_v11 = vrot.slane %v815_v19, 4  ;;  %v578_v30 = vmax.f32 %v523_v4, 0.0  ;;  %v3098_v9 = vrot.slane %v2799_v63, 1  ;;  %v1067_v49 = vld [vmem:[#allocation2 + $0x6c] sm:$0xf] }
 0x131   : > { %v2878_v39 = vshll.u32 %v2799_v63, 16  ;;  %v2876_v22 = vor.u32 %v2875_v33, %v2871_v37  ;;  %v1401_v63 = vshrl.u32 %v6621_v27, 16  ;;  %v2004_v61 = vshll.u32 %v6631_v40, 16 }
 0x132   : > { %v819_v48 = vsel %vm6278_vm9, %v811_v34, %v818_v7  ;;  %v1065_v21 = vsel %vm6284_vm10, %v820_v11, %v1064_v23  ;;  %v666_v44 = vpack.c.bf16 %v578_v30, %v578_v30  ;;  %v3099_v45 = vsel %vm1588_vm4, %v3097_v17, %v3098_v9  ;;  %v5708_v4 = vld [vmem:[#allocation2 + $0x60] sm:$0xe] }
 0x133   : > { %1063 = vst.msk [vmem:[#allocation2 + $0x64] sm:$0xf] %vm594_vm2, %v819_v48  ;;  %3140 = vrot.lane.b32.xlu0 %v3099_v45, %s5987_s29  ;;  %v2880_v53 = vrot.slane %v2878_v39, 1  ;;  %v1403_v34 = vshll.u32 %v6621_v27, 16  ;;  %v1408_v23 = vshll.u32 %v6654_v59, 16  ;;  %v6665_v17 = vpack.c.b16 %v1903_v43, %v1903_v43 }
 0x134   : > { %1066 = vst [vmem:[#allocation2 + $0x68] sm:$0x1] %v1065_v21  ;;  %v822_v62 = vshrl.u32 %v666_v44, 16  ;;  %v825_v55 = vshll.u32 %v666_v44, 16  ;;  %v5845_v30 = vor.u32 %v6610_v24, %v6623_v1  ;;  %v2006_v48 = vrot.slane %v2004_v61, 1 }
 0x135   : > { %1647 = vrot.lane.b32.xlu1 %v1606_v52, %s5987_s29  ;;  %v524_v26 = vpop.f32.mrf.mxu0  ;;  %v2881_v35 = vsel %vm1315_vm3, %v2876_v22, %v2880_v53  ;;  %v2282_v52 = vsel %vm1669_vm11, %v6297_v6, %v2122_v32  ;;  %v1405_v16 = vrot.slane %v1403_v34, 1  ;;  %v5842_v6 = vor.u32 %v6601_v36, %v6633_v13  ;;  %v1071_v22 = vld [vmem:[#allocation2 + $0x74] sm:$0x1]  ;;  %v5677_v43 = vld [vmem:[#allocation2 + $0x60] sm:$0xe] }
 0x136   : > { %v6648_v50 = vrot.slane %v822_v62, 7  ;;  %v525_v29 = vadd.f32 %v6593_v15, %v524_v26  ;;  %3012 = vrot.lane.b32.xlu2 %v2881_v35, %s5986_s12  ;;  %v2009_v37 = vshll.u32 %v6665_v17, 16  ;;  %v1410_v45 = vrot.slane %v1408_v23, 1 }
 0x137   : > { %v2250_v19 = vpop.permute.xlu2 %2249  ;;  %v6677_v36 = vor.u32 %v1405_v16, %v1401_v63  ;;  %v2002_v24 = vshrl.u32 %v6631_v40, 16  ;;  %v2219_v1 = vrot.slane %v5842_v6, 1 }
 0x138   : > { %v827_v20 = vor.u32 %v825_v55, %v6648_v50  ;;  %v579_v5 = vmax.f32 %v525_v29, 0.0  ;;  %v2314_v25 = vsel %vm424_vm0, %v2282_v52, %v2250_v19  ;;  %v828_v42 = vrot.slane %v6648_v50, 4  ;;  %v5648_v50 = vld [vmem:[#allocation2 + $0x60] sm:$0xe] }
 0x139   : > { %5437 = vmatmul.msk.bf16.vlgmr.msrb.gmra.mxu1 %vm2358_vm13, %v2314_v25  ;;  %v2007_v26 = vor.u32 %v2006_v48, %v2002_v24  ;;  %v2011_v35 = vrot.slane %v2009_v37, 1  ;;  %v1610_v19 = vrot.slane %v5845_v30, 1  ;;  %v1074_v24 = vld [vmem:[#allocation2 + $0x78] sm:$0xf] }
 0x13a   : > { %v1068_v58 = vsel %vm6259_vm6, %v827_v20, %v1067_v49  ;;  %v667_v0 = vpack.c.bf16 %v579_v5, %v579_v5  ;;  %v5707_v7 = vld [vmem:[#allocation2 + $0x60] sm:$0xf0] }
 0x13b   : > { %v5693_v11 = vld [vmem:[#allocation2 + $0x60] sm:$0xff]   ;;  %1069 = vst [vmem:[#allocation2 + $0x6c] sm:$0xf] %v1068_v58  ;;  %1520 = vrot.lane.b32.xlu0 %v1399_v28, %s5986_s12  ;;  %v2656_v32 = vld [vmem:[#allocation2 + $0x68] sm:$0x1]  ;;  %v5709_v9 = vor.u32 %v5708_v4, %v5707_v7  ;;  %v2220_v28 = vrot.slane %v6665_v17, 1 }
 0x13c   : > { %v2885_v12 = vshll.u32 %v5693_v11, 16  ;;  %v830_v33 = vshrl.u32 %v667_v0, 16  ;;  %v833_v39 = vshll.u32 %v667_v0, 16  ;;  %v2784_v13 = vunpack.c.l.b16 %v2656_v32  ;;  %v1163_v55 = vld [vmem:[#allocation2 + $0x68] sm:$0x1] }
 0x13d   : > { %2131 = vrot.lane.b32.xlu1 %v2000_v41, %s5986_s12  ;;  %v527_v21 = vpop.f32.mrf.mxu0  ;;  %v2883_v62 = vshrl.u32 %v5693_v11, 16  ;;  %v3100_v34 = vrot.slane %v5709_v9, 1  ;;  %v1776_v16 = vld [vmem:[#allocation2 + $0x68] sm:$0x1]  ;;  %v5676_v4 = vld [vmem:[#allocation2 + $0x60] sm:$0xf0] }
 0x13e   : > { %v2887_v44 = vrot.slane %v2885_v12, 1  ;;  %v832_v46 = vrot.slane %v830_v33, 7  ;;  %v528_v53 = vadd.f32 %v6593_v15, %v527_v21  ;;  %2259 = vrot.lane.b32.xlu2 %v2218_v57, %s5987_s29  ;;  %v2800_v60 = vpack.c.b16 %v2784_v13, %v2784_v13  ;;  %v5647_v63 = vld [vmem:[#allocation2 + $0x60] sm:$0xf0]  ;;  %v5475_v32 = vld [vmem:[%s8534_s3 + $0x20] sm:$0xf] }
 0x13f   : > { %v1291_v57 = vunpack.c.l.b16 %v1163_v55  ;;  %v1611_v0 = vrot.slane %v6654_v59, 1  ;;  %v1904_v11 = vunpack.c.l.b16 %v1776_v16  ;;  %v5678_v9 = vor.u32 %v5677_v43, %v5676_v4 }
 0x140   : > { %v835_v29 = vor.u32 %v833_v39, %v832_v46  ;;  %v837_v41 = vrot.slane %v832_v46, 4  ;;  %v580_v49 = vmax.f32 %v528_v53, 0.0  ;;  %v3101_v52 = vrot.slane %v2800_v60, 1 }
 0x141   : > { %v6685_v20 = vor.u32 %v2887_v44, %v2883_v62  ;;  %v2890_v5 = vshll.u32 %v2800_v60, 16  ;;  %v6697_v7 = vpack.c.b16 %v1291_v57, %v1291_v57  ;;  %v5649_v12 = vor.u32 %v5648_v50, %v5647_v63  ;;  %v5529_v57 = vld [vmem:[%s8534_s3 + $0x18] sm:$0xff] }
 0x142   : > { %v836_v23 = vsel %vm6278_vm9, %v828_v42, %v835_v29  ;;  %v1072_v25 = vsel %vm6284_vm10, %v837_v41, %v1071_v22  ;;  %v668_v17 = vpack.c.bf16 %v580_v49, %v580_v49  ;;  %v3102_v61 = vsel %vm1588_vm4, %v3100_v34, %v3101_v52  ;;  %v6694_v58 = vld [vmem:[#allocation2 + $0x6c] sm:$0xe] }
 0x143   : > { %1070 = vst.msk [vmem:[#allocation2 + $0x70] sm:$0xf] %vm594_vm2, %v836_v23  ;;  %3142 = vrot.lane.b32.xlu0 %v3102_v61, %s5987_s29  ;;  %v2892_v6 = vrot.slane %v2890_v5, 1  ;;  %v3235_v59 = vunpack.c.l.b16 %v5475_v32  ;;  %v1420_v39 = vshll.u32 %v6697_v7, 16  ;;  %v6707_v13 = vpack.c.b16 %v1904_v11, %v1904_v11 }
 0x144   : > { %1073 = vst [vmem:[#allocation2 + $0x74] sm:$0x1] %v1072_v25  ;;  %v839_v42 = vshrl.u32 %v668_v17, 16  ;;  %v842_v30 = vshll.u32 %v668_v17, 16  ;;  %v1411_v44 = vsel %vm1315_vm3, %v6677_v36, %v1410_v45  ;;  %v2012_v46 = vsel %vm1315_vm3, %v2007_v26, %v2011_v35 }
 0x145   : > { %1649 = vrot.lane.b32.xlu1 %v6659_v54, %s5987_s29  ;;  %v529_v37 = vpop.f32.mrf.mxu0  ;;  %v2893_v33 = vsel %vm1315_vm3, %v6685_v20, %v2892_v6  ;;  %v2221_v54 = vsel %vm1588_vm4, %v2219_v1, %v2220_v28  ;;  %v6718_v22 = vsel %vm1588_vm4, %v1610_v19, %v1611_v0  ;;  %v3237_v53 = vpack.c.b16 %v3235_v59, %v3235_v59 }
 0x146   : > { %v6709_v48 = vrot.slane %v839_v42, 7  ;;  %v530_v21 = vadd.f32 %v6593_v15, %v529_v37  ;;  %3014 = vrot.lane.b32.xlu2 %v2893_v33, %s5986_s12  ;;  %v6721_v34 = vrot.slane %v5678_v9, 1  ;;  %v6723_v43 = vrot.slane %v5649_v12, 1  ;;  %v1078_v12 = vld [vmem:[#allocation2 + $0x80] sm:$0x1] }
 0x147   : > { %v3272_v50 = vsel %vm2391_vm12, %v3237_v53, 0  ;;  %v1422_v36 = vrot.slane %v1420_v39, 1  ;;  %v2021_v45 = vshll.u32 %v6707_v13, 16  ;;  %v2223_v1 = vrot.slane %v6707_v13, 1 }
 0x148   : > { %v844_v60 = vor.u32 %v842_v30, %v6709_v48  ;;  %v581_v62 = vmax.f32 %v530_v21, 0.0  ;;  %v1511_v55 = vpop.permute.xlu0 %1510  ;;  %v845_v26 = vrot.slane %v6709_v48, 4  ;;  %3280 = vmatpush.bf16.msra.mxu3 %v3272_v50  ;;  %v1614_v49 = vrot.slane %v6697_v7, 1 }
 0x149   : > { %v6740_v5 = vsel %vm1669_vm11, %v6299_v8, %v1511_v55  ;;  %v6754_v0 = vsel %vm1315_vm3, %v6685_v20, %v1422_v36  ;;  %v2023_v9 = vrot.slane %v2021_v45, 1  ;;  %v5850_v36 = vld [vmem:[#allocation2 + $0x6c] sm:$0xe] }
 0x14a   : > { %v1075_v35 = vsel %vm6259_vm6, %v844_v60, %v1074_v24  ;;  %v669_v28 = vpack.c.bf16 %v581_v62, %v581_v62  ;;  %v6731_v29 = vld [vmem:[#allocation2 + $0x6c] sm:$0xff]  }
 0x14b   : > { %v5846_v41 = vld [vmem:[#allocation2 + $0x6c] sm:$0xf0]  ;;  %1076 = vst [vmem:[#allocation2 + $0x78] sm:$0xf] %v1075_v35  ;;  %1522 = vrot.lane.b32.xlu0 %v1411_v44, %s5986_s12  ;;  %v2657_v19 = vld [vmem:[#allocation2 + $0x74] sm:$0x1] }
 0x14c   : > { %v6734_v52 = vld [vmem:[#allocation2 + $0x6c] sm:$0xff]   ;;  %v847_v4 = vshrl.u32 %v669_v28, 16  ;;  %v850_v63 = vshll.u32 %v669_v28, 16  ;;  %v2785_v23 = vunpack.c.l.b16 %v2657_v19  ;;  %v1164_v25 = vld [vmem:[#allocation2 + $0x74] sm:$0x1]  ;;  %v5848_v8 = vor.u32 %v6694_v58, %v5846_v41  ;;  %3281 = vmatpush.bf16.msra.mxu3 %v5529_v57 }
 0x14d   : > { %v6736_v16 = vld [vmem:[#allocation2 + $0x6c] sm:$0xf0]  ;;  %2133 = vrot.lane.b32.xlu1 %v2012_v46, %s5986_s12  ;;  %v532_v6 = vpop.f32.mrf.mxu0  ;;  %v1292_v11 = vunpack.c.l.b16 %v1164_v25  ;;  %v2897_v33 = vshll.u32 %v6731_v29, 16  ;;  %v2895_v44 = vshrl.u32 %v6731_v29, 16  ;;  %v1777_v60 = vld [vmem:[#allocation2 + $0x74] sm:$0x1] }
 0x14e   : > { %v6746_v17 = vld [vmem:[#allocation2 + $0x6c] sm:$0xff]   ;;  %v849_v42 = vrot.slane %v847_v4, 7  ;;  %v533_v30 = vadd.f32 %v6593_v15, %v532_v6  ;;  %2261 = vrot.lane.b32.xlu2 %v2221_v54, %s5987_s29  ;;  %v2801_v32 = vpack.c.b16 %v2785_v23, %v2785_v23  ;;  %v3103_v37 = vrot.slane %v5848_v8, 1 }
 0x14f   : > { %v6748_v61 = vld [vmem:[#allocation2 + $0x6c] sm:$0xf0]  ;;  %v2899_v24 = vrot.slane %v2897_v33, 1  ;;  %v6760_v53 = vpack.c.b16 %v1292_v11, %v1292_v11  ;;  %v1427_v28 = vshll.u32 %v6734_v52, 16  ;;  %v1905_v57 = vunpack.c.l.b16 %v1777_v60 }
 0x150   : > { %v852_v59 = vor.u32 %v850_v63, %v849_v42  ;;  %v854_v39 = vrot.slane %v849_v42, 4  ;;  %v582_v58 = vmax.f32 %v533_v30, 0.0  ;;  %v3005_v48 = vpop.permute.xlu2 %3004  ;;  %v3104_v21 = vrot.slane %v2801_v32, 1  ;;  %v1081_v42 = vld [vmem:[#allocation2 + $0x84] sm:$0xf] }
 0x151   : > { %v2902_v46 = vshll.u32 %v2801_v32, 16  ;;  %v2900_v45 = vor.u32 %v2899_v24, %v2895_v44  ;;  %v1429_v23 = vrot.slane %v1427_v28, 1  ;;  %v2224_v8 = vsel %vm1588_vm4, %v6721_v34, %v2223_v1  ;;  %v5853_v34 = vld [vmem:[#allocation2 + $0x6c] sm:$0xe]  ;;  %v6806_v24 = vld [vmem:[#allocation2 + $0x18] sm:$0xff]  }
 0x152   : > { %v853_v54 = vsel %vm6278_vm9, %v845_v26, %v852_v59  ;;  %v1079_v62 = vsel %vm6284_vm10, %v854_v39, %v1078_v12  ;;  %v670_v55 = vpack.c.bf16 %v582_v58, %v582_v58  ;;  %v3105_v50 = vsel %vm1588_vm4, %v3103_v37, %v3104_v21 }
 0x153   : > { %1077 = vst.msk [vmem:[#allocation2 + $0x7c] sm:$0xf] %vm594_vm2, %v853_v54  ;;  %3144 = vrot.lane.b32.xlu0 %v3105_v50, %s5987_s29  ;;  %v2904_v35 = vrot.slane %v2902_v46, 1  ;;  %v1432_v26 = vshll.u32 %v6760_v53, 16  ;;  %v1425_v11 = vshrl.u32 %v6734_v52, 16  ;;  %v2024_v32 = vsel %vm1315_vm3, %v6685_v20, %v2023_v9 }
 0x154   : > { %1080 = vst [vmem:[#allocation2 + $0x80] sm:$0x1] %v1079_v62  ;;  %v856_v41 = vshrl.u32 %v670_v55, 16  ;;  %v859_v19 = vshll.u32 %v670_v55, 16  ;;  %v6793_v12 = vsel %vm1588_vm4, %v6723_v43, %v1614_v49  ;;  %v2028_v13 = vshll.u32 %v6746_v17, 16 }
 0x155   : > { %1651 = vrot.lane.b32.xlu1 %v6718_v22, %s5987_s29  ;;  %v534_v4 = vpop.f32.mrf.mxu0  ;;  %v2905_v63 = vsel %vm1315_vm3, %v2900_v45, %v2904_v35  ;;  %v6785_v22 = vsel %vm1669_vm11, %v6365_v3, %v3005_v48  ;;  %v5711_v3 = vld [vmem:[#allocation2 + $0x78] sm:$0xe]  ;;  %v1430_v59 = vor.u32 %v1429_v23, %v1425_v11  ;;  %v1434_v39 = vrot.slane %v1432_v26, 1 }
 0x156   : > { %v6774_v25 = vrot.slane %v856_v41, 7  ;;  %v535_v6 = vadd.f32 %v6593_v15, %v534_v4  ;;  %3016 = vrot.lane.b32.xlu2 %v2905_v63, %s5986_s12  ;;  %v6800_v20 = vpack.c.b16 %v1905_v57, %v1905_v57  ;;  %v2026_v7 = vshrl.u32 %v6746_v17, 16 }
 0x157   : > { %v3003_v30 = vpop.permute.xlu1 %3002  ;;  %v5851_v43 = vor.u32 %v5850_v36, %v6748_v61  ;;  %v2030_v44 = vrot.slane %v2028_v13, 1  ;;  %v6814_v45 = vsel %vm1315_vm3, %v1430_v59, %v1434_v39 }
 0x158   : > { %v861_v1 = vor.u32 %v859_v19, %v6774_v25  ;;  %v583_v37 = vmax.f32 %v535_v6, 0.0  ;;  %v6797_v33 = vpop.permute.xlu2 %2251  ;;  %v862_v58 = vrot.slane %v6774_v25, 4  ;;  %v3163_v46 = vsel %vm1669_vm11, %v6806_v24, %v3003_v30  ;;  %v1085_v25 = vld [vmem:[#allocation2 + $0x8c] sm:$0x1] }
 0x159   : > { %v2033_v61 = vshll.u32 %v6800_v20, 16  ;;  %v2225_v19 = vrot.slane %v5851_v43, 1  ;;  %v2226_v26 = vrot.slane %v6800_v20, 1  ;;  %v5680_v43 = vld [vmem:[#allocation2 + $0x78] sm:$0xe] }
 0x15a   : > { %v1082_v49 = vsel %vm6259_vm6, %v861_v1, %v1081_v42  ;;  %v671_v9 = vpack.c.bf16 %v583_v37, %v583_v37  ;;  %v5710_v48 = vld [vmem:[#allocation2 + $0x78] sm:$0xf0]  ;;  %v2031_v42 = vor.u32 %v2030_v44, %v2026_v7 }
 0x15b   : > { %v5694_v21 = vld [vmem:[#allocation2 + $0x78] sm:$0xff]   ;;  %1083 = vst [vmem:[#allocation2 + $0x84] sm:$0xf] %v1082_v49  ;;  %1524 = vrot.lane.b32.xlu0 %v6754_v0, %s5986_s12  ;;  %v2658_v60 = vld [vmem:[#allocation2 + $0x80] sm:$0x1]  ;;  %v5712_v54 = vor.u32 %v5711_v3, %v5710_v48  ;;  %v5854_v0 = vor.u32 %v5853_v34, %v6736_v16  ;;  %v2035_v30 = vrot.slane %v2033_v61, 1 }
 0x15c   : > { %v2909_v62 = vshll.u32 %v5694_v21, 16  ;;  %v864_v55 = vshrl.u32 %v671_v9, 16  ;;  %v867_v50 = vshll.u32 %v671_v9, 16  ;;  %v2786_v36 = vunpack.c.l.b16 %v2658_v60  ;;  %v1165_v35 = vld [vmem:[#allocation2 + $0x80] sm:$0x1] }
 0x15d   : > { %2135 = vrot.lane.b32.xlu1 %v2024_v32, %s5986_s12  ;;  %v537_v28 = vpop.f32.mrf.mxu0  ;;  %v2907_v23 = vshrl.u32 %v5694_v21, 16  ;;  %v3106_v11 = vrot.slane %v5712_v54, 1  ;;  %v1293_v32 = vunpack.c.l.b16 %v1165_v35  ;;  %v1778_v16 = vld [vmem:[#allocation2 + $0x80] sm:$0x1]  ;;  %v1616_v20 = vrot.slane %v5854_v0, 1 }
 0x15e   : > { %v2911_v41 = vrot.slane %v2909_v62, 1  ;;  %v866_v57 = vrot.slane %v864_v55, 7  ;;  %v538_v4 = vadd.f32 %v6593_v15, %v537_v28  ;;  %2263 = vrot.lane.b32.xlu2 %v2224_v8, %s5987_s29  ;;  %v2802_v63 = vpack.c.b16 %v2786_v36, %v2786_v36  ;;  %v5679_v21 = vld [vmem:[#allocation2 + $0x78] sm:$0xf0] }
 0x15f   : > { %v3131_v6 = vpop.permute.xlu1 %3130  ;;  %v6829_v48 = vpack.c.b16 %v1293_v32, %v1293_v32  ;;  %v5650_v44 = vld [vmem:[#allocation2 + $0x78] sm:$0xf0]  ;;  %v1617_v61 = vrot.slane %v6760_v53, 1  ;;  %v1906_v55 = vunpack.c.l.b16 %v1778_v16  ;;  %v2227_v36 = vsel %vm1588_vm4, %v2225_v19, %v2226_v26 }
 0x160   : > { %v869_v13 = vor.u32 %v867_v50, %v866_v57  ;;  %v871_v1 = vrot.slane %v866_v57, 4  ;;  %v584_v37 = vmax.f32 %v538_v4, 0.0  ;;  %v3195_v3 = vsel %vm424_vm0, %v3163_v46, %v3131_v6  ;;  %v3007_v59 = vpop.permute.xlu2 %3006  ;;  %v5651_v46 = vld [vmem:[#allocation2 + $0x78] sm:$0xe]  ;;  %v6848_v6 = vld [vmem:[#allocation2 + $0x30] sm:$0xff]  }
 0x161   : > { %5480 = vmatmul.msk.bf16.vlgmr.msra.gmra.mxu3 %vm2358_vm13, %v3195_v3  ;;  %v3107_v34 = vrot.slane %v2802_v63, 1  ;;  %v6823_v39 = vor.u32 %v2911_v41, %v2907_v23  ;;  %v2914_v8 = vshll.u32 %v2802_v63, 16  ;;  %v1444_v35 = vshll.u32 %v6829_v48, 16 }
 0x162   : > { %v870_v7 = vsel %vm6278_vm9, %v862_v58, %v869_v13  ;;  %v1086_v49 = vsel %vm6284_vm10, %v871_v1, %v1085_v25  ;;  %v672_v9 = vpack.c.bf16 %v584_v37, %v584_v37  ;;  %v6833_v62 = vld [vmem:[#allocation2 + $0x84] sm:$0xe]  ;;  %v1922_v57 = vpack.c.b16 %v1906_v55, %v1906_v55  ;;  %v1088_v25 = vld [vmem:[#allocation2 + $0x90] sm:$0xf] }
 0x163   : > { %1084 = vst.msk [vmem:[#allocation2 + $0x88] sm:$0xf] %vm594_vm2, %v870_v7  ;;  %v3108_v60 = vsel %vm1588_vm4, %v3106_v11, %v3107_v34  ;;  %v2916_v54 = vrot.slane %v2914_v8, 1  ;;  %v5681_v53 = vor.u32 %v5680_v43, %v5679_v21  ;;  %v5652_v4 = vor.u32 %v5651_v46, %v5650_v44 }
 0x164   : > { %1087 = vst [vmem:[#allocation2 + $0x8c] sm:$0x1] %v1086_v49  ;;  %v873_v58 = vshrl.u32 %v672_v9, 16  ;;  %v876_v50 = vshll.u32 %v672_v9, 16  ;;  %3146 = vrot.lane.b32.xlu0 %v3108_v60, %s5987_s29  ;;  %v2036_v19 = vsel %vm1315_vm3, %v2031_v42, %v2035_v30  ;;  %v1446_v26 = vrot.slane %v1444_v35, 1 }
 0x165   : > { %1653 = vrot.lane.b32.xlu1 %v6793_v12, %s5987_s29  ;;  %v3133_v28 = vpop.permute.xlu0 %3132  ;;  %v539_v41 = vpop.f32.mrf.mxu0  ;;  %v2917_v0 = vsel %vm1315_vm3, %v6823_v39, %v2916_v54  ;;  %v6852_v12 = vsel %vm1669_vm11, %v6848_v6, %v3007_v59  ;;  %v6855_v32 = vsel %vm1588_vm4, %v1616_v20, %v1617_v61  ;;  %v2045_v13 = vshll.u32 %v1922_v57, 16 }
 0x166   : > { %v6843_v63 = vrot.slane %v873_v58, 7  ;;  %v540_v23 = vadd.f32 %v6593_v15, %v539_v41  ;;  %3018 = vrot.lane.b32.xlu2 %v2917_v0, %s5986_s12  ;;  %v1620_v30 = vrot.slane %v6829_v48, 1  ;;  %v3197_v59 = vsel %vm424_vm0, %v6785_v22, %v3133_v28  ;;  %v6879_v22 = vld [vmem:[#allocation2 + $0x84] sm:$0xe] }
 0x167   : > { %v1640_v11 = vpop.permute.xlu1 %1639  ;;  %v2228_v16 = vrot.slane %v5681_v53, 1  ;;  %v2229_v34 = vrot.slane %v1922_v57, 1  ;;  %v1619_v8 = vrot.slane %v5652_v4, 1  ;;  %v6881_v46 = vrot.slane %v2045_v13, 1  ;;  %v1092_v53 = vld [vmem:[#allocation2 + $0x98] sm:$0x1] }
 0x168   : > { %v878_v1 = vor.u32 %v876_v50, %v6843_v63  ;;  %v585_v37 = vmax.f32 %v540_v23, 0.0  ;;  %v6858_v3 = vpop.permute.xlu2 %2253  ;;  %v1705_v42 = vsel %vm424_vm0, %v6740_v5, %v1640_v11  ;;  %v879_v20 = vrot.slane %v6843_v63, 4 }
 0x169   : > { %5458 = vmatmul.msk.bf16.gmra.mxu2 %vm2358_vm13, %v1705_v42  ;;  %v6873_v5 = vsel %vm1315_vm3, %v6823_v39, %v1446_v26  ;;  %v6888_v28 = vsel %vm1588_vm4, %v2228_v16, %v2229_v34  ;;  %v6891_v41 = vsel %vm1588_vm4, %v1619_v8, %v1620_v30 }
 0x16a   : > { %v1089_v43 = vsel %vm6259_vm6, %v878_v1, %v1088_v25  ;;  %v673_v7 = vpack.c.bf16 %v585_v37, %v585_v37  ;;  %v6869_v49 = vld [vmem:[#allocation2 + $0x84] sm:$0xff]  }
 0x16b   : > { %v5855_v9 = vld [vmem:[#allocation2 + $0x84] sm:$0xf0]  ;;  %1090 = vst [vmem:[#allocation2 + $0x90] sm:$0xf] %v1089_v43  ;;  %v2659_v44 = vld [vmem:[#allocation2 + $0x8c] sm:$0x1] }
 0x16c   : > { %v6875_v48 = vld [vmem:[#allocation2 + $0x84] sm:$0xff]   ;;  %v881_v60 = vshrl.u32 %v673_v7, 16  ;;  %v884_v54 = vshll.u32 %v673_v7, 16  ;;  %1526 = vrot.lane.b32.xlu0 %v6814_v45, %s5986_s12  ;;  %v2787_v61 = vunpack.c.l.b16 %v2659_v44  ;;  %v1166_v55 = vld [vmem:[#allocation2 + $0x8c] sm:$0x1]  ;;  %v5857_v35 = vor.u32 %v6833_v62, %v5855_v9 }
 0x16d   : > { %v6877_v21 = vld [vmem:[#allocation2 + $0x84] sm:$0xf0]  ;;  %2137 = vrot.lane.b32.xlu1 %v2036_v19, %s5986_s12  ;;  %v1513_v58 = vpop.permute.xlu0 %1512  ;;  %v542_v50 = vpop.f32.mrf.mxu0  ;;  %v2921_v23 = vshll.u32 %v6869_v49, 16  ;;  %v1294_v19 = vunpack.c.l.b16 %v1166_v55  ;;  %v2919_v30 = vshrl.u32 %v6869_v49, 16  ;;  %v6911_v9 = vld [vmem:[#allocation2 + $0x84] sm:$0xe] }
 0x16e   : > { %v883_v0 = vrot.slane %v881_v60, 7  ;;  %v543_v57 = vadd.f32 %v6593_v15, %v542_v50  ;;  %2265 = vrot.lane.b32.xlu2 %v2227_v36, %s5987_s29  ;;  %v2803_v45 = vpack.c.b16 %v2787_v61, %v2787_v61  ;;  %v3109_v63 = vrot.slane %v5857_v35, 1  ;;  %v6898_v1 = vld [vmem:[#allocation2 + $0x84] sm:$0xff]   ;;  %v1779_v60 = vld [vmem:[#allocation2 + $0x8c] sm:$0x1]  ;;  %v552_v55 = vpop.f32.mrf.mxu1 }
 0x16f   : > { %v2124_v4 = vpop.permute.xlu1 %2123  ;;  %v6900_v37 = vld [vmem:[#allocation2 + $0x84] sm:$0xf0]  ;;  %v2923_v16 = vrot.slane %v2921_v23, 1  ;;  %v6915_v44 = vpack.c.b16 %v1294_v19, %v1294_v19  ;;  %v1451_v50 = vshll.u32 %v6875_v48, 16  ;;  %v1675_v35 = vsel %vm1669_vm11, %v6806_v24, %v1513_v58  ;;  %v1095_v19 = vld [vmem:[#allocation2 + $0x9c] sm:$0xf] }
 0x170   : > { %v886_v26 = vor.u32 %v884_v54, %v883_v0  ;;  %v888_v62 = vrot.slane %v883_v0, 4  ;;  %v586_v25 = vmax.f32 %v543_v57, 0.0  ;;  %v2284_v11 = vsel %vm1669_vm11, %v6806_v24, %v2124_v4  ;;  %v3009_v13 = vpop.permute.xlu2 %3008 }
 0x171   : > { %5481 = vmatmul.msk.bf16.gmra.mxu3 %vm2358_vm13, %v3197_v59  ;;  %v2316_v36 = vsel %vm424_vm0, %v2284_v11, %v6797_v33  ;;  %v3110_v42 = vrot.slane %v2803_v45, 1  ;;  %v2926_v7 = vshll.u32 %v2803_v45, 16  ;;  %v2924_v59 = vor.u32 %v2923_v16, %v2919_v30 }
 0x172   : > { %v887_v34 = vsel %vm6278_vm9, %v879_v20, %v886_v26  ;;  %v1093_v8 = vsel %vm6284_vm10, %v888_v62, %v1092_v53  ;;  %v674_v43 = vpack.c.bf16 %v586_v25, %v586_v25  ;;  %5438 = vmatmul.msk.bf16.gmra.mxu1 %vm2358_vm13, %v2316_v36  ;;  %v553_v45 = vadd.f32 %v6593_v15, %v552_v55 }
 0x173   : > { %1091 = vst.msk [vmem:[#allocation2 + $0x94] sm:$0xf] %vm594_vm2, %v887_v34  ;;  %v3111_v33 = vsel %vm1588_vm4, %v3109_v63, %v3110_v42  ;;  %v2928_v61 = vrot.slane %v2926_v7, 1  ;;  %v1456_v23 = vshll.u32 %v6915_v44, 16  ;;  %v1453_v58 = vrot.slane %v1451_v50, 1 }
 0x174   : > { %1094 = vst [vmem:[#allocation2 + $0x98] sm:$0x1] %v1093_v8  ;;  %v890_v54 = vshrl.u32 %v674_v43, 16  ;;  %v893_v20 = vshll.u32 %v674_v43, 16  ;;  %3148 = vrot.lane.b32.xlu0 %v3111_v33, %s5987_s29  ;;  %v590_v24 = vmax.f32 %v553_v45, 0.0  ;;  %v1907_v62 = vunpack.c.l.b16 %v1779_v60 }
 0x175   : > { %1655 = vrot.lane.b32.xlu1 %v6855_v32, %s5987_s29  ;;  %v3135_v0 = vpop.permute.xlu0 %3134  ;;  %v544_v57 = vpop.f32.mrf.mxu0  ;;  %v2929_v63 = vsel %vm1315_vm3, %v2924_v59, %v2928_v61  ;;  %v2048_v42 = vsel %vm1315_vm3, %v6823_v39, %v6881_v46  ;;  %v6939_v30 = vsel %vm1669_vm11, %v6487_v2, %v3009_v13  ;;  %v5714_v34 = vld [vmem:[#allocation2 + $0x90] sm:$0xe]  ;;  %v1449_v43 = vshrl.u32 %v6875_v48, 16 }
 0x176   : > { %v6924_v53 = vrot.slane %v890_v54, 7  ;;  %v545_v4 = vadd.f32 %v6593_v15, %v544_v57  ;;  %3020 = vrot.lane.b32.xlu2 %v2929_v63, %s5986_s12  ;;  %v3199_v16 = vsel %vm424_vm0, %v6852_v12, %v3135_v0  ;;  %v678_v8 = vpack.c.bf16 %v590_v24, %v590_v24  ;;  %v554_v0 = vpop.f32.mrf.mxu1 }
 0x177   : > { %v1642_v26 = vpop.permute.xlu1 %1641  ;;  %v6948_v60 = vrot.slane %v1456_v23, 1  ;;  %v1454_v54 = vor.u32 %v1453_v58, %v1449_v43  ;;  %v2052_v12 = vshll.u32 %v6898_v1, 16  ;;  %v2050_v63 = vshrl.u32 %v6898_v1, 16 }
 0x178   : > { %v895_v32 = vor.u32 %v893_v20, %v6924_v53  ;;  %v587_v25 = vmax.f32 %v545_v4, 0.0  ;;  %v6931_v11 = vpop.permute.xlu2 %2255  ;;  %v1707_v36 = vsel %vm424_vm0, %v1675_v35, %v1642_v26  ;;  %v896_v7 = vrot.slane %v6924_v53, 4 }
 0x179   : > { %5459 = vmatmul.msk.bf16.gmra.mxu2 %vm2358_vm13, %v1707_v36  ;;  %v6950_v20 = vpack.c.b16 %v1907_v62, %v1907_v62  ;;  %v924_v35 = vshrl.u32 %v678_v8, 16  ;;  %v5860_v23 = vor.u32 %v6879_v22, %v6900_v37  ;;  %v927_v58 = vshll.u32 %v678_v8, 16 }
 0x17a   : > { %v1096_v33 = vsel %vm6259_vm6, %v895_v32, %v1095_v19  ;;  %v675_v59 = vpack.c.bf16 %v587_v25, %v587_v25  ;;  %v5713_v39 = vld [vmem:[#allocation2 + $0x90] sm:$0xf0]  ;;  %v2054_v36 = vrot.slane %v2052_v12, 1 }
 0x17b   : > { %v5695_v46 = vld [vmem:[#allocation2 + $0x90] sm:$0xff]   ;;  %1097 = vst [vmem:[#allocation2 + $0x9c] sm:$0xf] %v1096_v33  ;;  %v2660_v2 = vld [vmem:[#allocation2 + $0x98] sm:$0x1]  ;;  %v5715_v53 = vor.u32 %v5714_v34, %v5713_v39  ;;  %v6962_v25 = vrot.slane %v924_v35, 7 }
 0x17c   : > { %v2933_v13 = vshll.u32 %v5695_v46, 16  ;;  %v898_v61 = vshrl.u32 %v675_v59, 16  ;;  %v901_v55 = vshll.u32 %v675_v59, 16  ;;  %1528 = vrot.lane.b32.xlu0 %v6873_v5, %s5986_s12  ;;  %v2788_v50 = vunpack.c.l.b16 %v2660_v2  ;;  %v1099_v5 = vld [vmem:[#allocation2 + $0xa4] sm:$0x1] }
 0x17d   : > { %2139 = vrot.lane.b32.xlu1 %v2048_v42, %s5986_s12  ;;  %v1515_v57 = vpop.permute.xlu0 %1514  ;;  %v547_v45 = vpop.f32.mrf.mxu0  ;;  %v2931_v4 = vshrl.u32 %v5695_v46, 16  ;;  %v2057_v42 = vshll.u32 %v6950_v20, 16  ;;  %v3112_v37 = vrot.slane %v5715_v53, 1  ;;  %v1109_v39 = vld [vmem:[#allocation2 + $0xb4] sm:$0xf]  ;;  %v2055_v12 = vor.u32 %v2054_v36, %v2050_v63 }
 0x17e   : > { %v900_v19 = vrot.slane %v898_v61, 7  ;;  %v548_v26 = vadd.f32 %v6593_v15, %v547_v45  ;;  %v2804_v24 = vpack.c.b16 %v2788_v50, %v2788_v50  ;;  %2267 = vrot.lane.b32.xlu2 %v6888_v28, %s5987_s29  ;;  %v2935_v32 = vrot.slane %v2933_v13, 1 }
 0x17f   : > { %v2126_v62 = vpop.permute.xlu1 %2125  ;;  %v2059_v61 = vrot.slane %v2057_v42, 1  ;;  %v1459_v63 = vsel %vm1315_vm3, %v1454_v54, %v6948_v60  ;;  %v1102_v54 = vld [vmem:[#allocation2 + $0xa8] sm:$0xf] }
 0x180   : > { %v903_v34 = vor.u32 %v901_v55, %v900_v19  ;;  %v905_v43 = vrot.slane %v900_v19, 4  ;;  %v588_v33 = vmax.f32 %v548_v26, 0.0  ;;  %v2286_v22 = vsel %vm1669_vm11, %v6379_v31, %v2126_v62  ;;  %v6967_v15 = vpop.permute.xlu2 %3010 }
 0x181   : > { %5482 = vmatmul.msk.bf16.gmra.mxu3 %vm2358_vm13, %v3199_v16  ;;  %v2318_v28 = vsel %vm424_vm0, %v2286_v22, %v6858_v3  ;;  %v3113_v8 = vrot.slane %v2804_v24, 1  ;;  %v2938_v59 = vshll.u32 %v2804_v24, 16  ;;  %v929_v31 = vor.u32 %v927_v58, %v6962_v25 }
 0x182   : > { %v904_v46 = vsel %vm6278_vm9, %v896_v7, %v903_v34  ;;  %v1100_v2 = vsel %vm6284_vm10, %v905_v43, %v1099_v5  ;;  %v676_v13 = vpack.c.bf16 %v588_v33, %v588_v33  ;;  %5439 = vmatmul.msk.bf16.gmra.mxu1 %vm2358_vm13, %v2318_v28  ;;  %v6981_v7 = vor.u32 %v2935_v32, %v2931_v4  ;;  %v6993_v4 = vld [vmem:[%s8533_s2] ss:$0 sm:$0xff]  ;;  %v5965_v58 = vld [vmem:[#allocation2 + $0x9c] sm:$0xe] }
 0x183   : > { %1098 = vst.msk [vmem:[#allocation2 + $0xa0] sm:$0xf] %vm594_vm2, %v904_v46  ;;  %v3114_v16 = vsel %vm1588_vm4, %v3112_v37, %v3113_v8  ;;  %v2940_v3 = vrot.slane %v2938_v59, 1  ;;  %v1110_v35 = vsel %vm6259_vm6, %v929_v31, %v1109_v39  ;;  %v2231_v19 = vrot.slane %v5860_v23, 1 }
 0x184   : > { %1101 = vst [vmem:[#allocation2 + $0xa4] sm:$0x1] %v1100_v2  ;;  %v907_v55 = vshrl.u32 %v676_v13, 16  ;;  %v910_v50 = vshll.u32 %v676_v13, 16  ;;  %3150 = vrot.lane.b32.xlu0 %v3114_v16, %s5987_s29  ;;  %v2232_v26 = vrot.slane %v6950_v20, 1  ;;  %v555_v24 = vadd.f32 %v6993_v4, %v554_v0 }
 0x185   : > { %1657 = vrot.lane.b32.xlu1 %v6891_v41, %s5987_s29  ;;  %v3137_v45 = vpop.permute.xlu0 %3136  ;;  %v549_v53 = vpop.f32.mrf.mxu0  ;;  %1111 = vst [vmem:[#allocation2 + $0xb4] sm:$0xf] %v1110_v35  ;;  %v1677_v41 = vsel %vm1669_vm11, %v6369_v10, %v1515_v57  ;;  %v2941_v60 = vsel %vm1315_vm3, %v6981_v7, %v2940_v3  ;;  %v930_v23 = vrot.slane %v6962_v25, 4  ;;  %v2060_v32 = vsel %vm1315_vm3, %v2055_v12, %v2059_v61  ;;  %v1167_v57 = vld [vmem:[#allocation2 + $0x98] sm:$0x1] }
 0x186   : > { %v6998_v5 = vrot.slane %v907_v55, 7  ;;  %v550_v62 = vadd.f32 %v6993_v4, %v549_v53  ;;  %3022 = vrot.lane.b32.xlu2 %v2941_v60, %s5986_s12  ;;  %v3201_v0 = vsel %vm424_vm0, %v6939_v30, %v3137_v45  ;;  %v591_v36 = vmax.f32 %v555_v24, 0.0  ;;  %v557_v10 = vpop.f32.mrf.mxu1  ;;  %v1780_v13 = vld [vmem:[#allocation2 + $0x98] sm:$0x1] }
 0x187   : > { %v1644_v20 = vpop.permute.xlu1 %1643  ;;  %v2233_v22 = vsel %vm1588_vm4, %v2231_v19, %v2232_v26  ;;  %v5863_v28 = vor.u32 %v6911_v9, %v6877_v21  ;;  %v1623_v30 = vrot.slane %v6915_v44, 1  ;;  %v558_v46 = vadd.f32 %v6993_v4, %v557_v10  ;;  %v1113_v19 = vld [vmem:[#allocation2 + $0xbc] sm:$0x1] }
 0x188   : > { %v912_v42 = vor.u32 %v910_v50, %v6998_v5  ;;  %v589_v34 = vmax.f32 %v550_v62, 0.0  ;;  %v7009_v43 = vpop.permute.xlu2 %2257  ;;  %v1709_v33 = vsel %vm424_vm0, %v1677_v41, %v1644_v20  ;;  %v679_v25 = vpack.c.bf16 %v591_v36, %v591_v36  ;;  %v1106_v41 = vld [vmem:[#allocation2 + $0xb0] sm:$0x1] }
 0x189   : > { %5460 = vmatmul.msk.bf16.gmra.mxu2 %vm2358_vm13, %v1709_v33  ;;  %v1295_v2 = vunpack.c.l.b16 %v1167_v57  ;;  %v913_v12 = vrot.slane %v6998_v5, 4  ;;  %v1622_v35 = vrot.slane %v5863_v28, 1  ;;  %v1908_v45 = vunpack.c.l.b16 %v1780_v13  ;;  %v5683_v33 = vld [vmem:[#allocation2 + $0x90] sm:$0xe] }
 0x18a   : > { %v1103_v37 = vsel %vm6259_vm6, %v912_v42, %v1102_v54  ;;  %v677_v8 = vpack.c.bf16 %v589_v34, %v589_v34  ;;  %v7019_v59 = vld [vmem:[#allocation2 + $0x9c] sm:$0xff]   ;;  %v932_v31 = vshrl.u32 %v679_v25, 16  ;;  %v935_v16 = vshll.u32 %v679_v25, 16 }
 0x18b   : > { %v5964_v39 = vld [vmem:[#allocation2 + $0x9c] sm:$0xf0]  ;;  %1104 = vst [vmem:[#allocation2 + $0xa8] sm:$0xf] %v1103_v37  ;;  %v2661_v3 = vld [vmem:[#allocation2 + $0xa4] sm:$0x1]  ;;  %v1624_v13 = vsel %vm1588_vm4, %v1622_v35, %v1623_v30 }
 0x18c   : > { %v915_v21 = vshrl.u32 %v677_v8, 16  ;;  %v918_v9 = vshll.u32 %v677_v8, 16  ;;  %1530 = vrot.lane.b32.xlu0 %v1459_v63, %s5986_s12  ;;  %v2789_v44 = vunpack.c.l.b16 %v2661_v3  ;;  %v934_v55 = vrot.slane %v932_v31, 7  ;;  %v5682_v37 = vld [vmem:[#allocation2 + $0x90] sm:$0xf0] }
 0x18d   : > { %2141 = vrot.lane.b32.xlu1 %v2060_v32, %s5986_s12  ;;  %v1517_v61 = vpop.permute.xlu0 %1516  ;;  %v5966_v50 = vor.u32 %v5965_v58, %v5964_v39  ;;  %v592_v24 = vmax.f32 %v558_v46, 0.0  ;;  %v7026_v63 = vpack.c.b16 %v1295_v2, %v1295_v2  ;;  %v7047_v46 = vpack.c.b16 %v1908_v45, %v1908_v45  ;;  %v5654_v2 = vld [vmem:[#allocation2 + $0x90] sm:$0xe]  ;;  %v7054_v45 = vld [vmem:[#allocation2 + $0x48] sm:$0xff]  }
 0x18e   : > { %v917_v53 = vrot.slane %v915_v21, 7  ;;  %v2805_v26 = vpack.c.b16 %v2789_v44, %v2789_v44  ;;  %2269 = vrot.lane.b32.xlu2 %v2233_v22, %s5987_s29  ;;  %v937_v62 = vor.u32 %v935_v16, %v934_v55  ;;  %v939_v60 = vrot.slane %v934_v55, 4  ;;  %v559_v22 = vpop.f32.mrf.mxu1 }
 0x18f   : > { %v2128_v5 = vpop.permute.xlu1 %2127  ;;  %v3115_v54 = vrot.slane %v5966_v50, 1  ;;  %v680_v8 = vpack.c.bf16 %v592_v24, %v592_v24  ;;  %v1468_v39 = vshll.u32 %v7026_v63, 16  ;;  %v2943_v31 = vshrl.u32 %v7019_v59, 16 }
 0x190   : > { %v920_v20 = vor.u32 %v918_v9, %v917_v53  ;;  %v922_v32 = vrot.slane %v917_v53, 4  ;;  %v2288_v58 = vsel %vm1669_vm11, %v6848_v6, %v2128_v5  ;;  %v3013_v36 = vpop.permute.xlu2 %3012  ;;  %v3116_v10 = vrot.slane %v2805_v26, 1 }
 0x191   : > { %5483 = vmatmul.msk.bf16.gmra.mxu3 %vm2358_vm13, %v3201_v0  ;;  %v938_v57 = vsel %vm6278_vm9, %v930_v23, %v937_v62  ;;  %v1114_v42 = vsel %vm6284_vm10, %v939_v60, %v1113_v19  ;;  %v2320_v34 = vsel %vm424_vm0, %v2288_v58, %v6931_v11  ;;  %v2945_v0 = vshll.u32 %v7019_v59, 16  ;;  %v7066_v62 = vld [vmem:[#allocation2 + $0x9c] sm:$0xff]  }
 0x192   : > { %v921_v25 = vsel %vm6278_vm9, %v913_v12, %v920_v20  ;;  %v1107_v28 = vsel %vm6284_vm10, %v922_v32, %v1106_v41  ;;  %1112 = vst.msk [vmem:[#allocation2 + $0xb8] sm:$0xf] %vm594_vm2, %v938_v57  ;;  %5440 = vmatmul.msk.bf16.gmra.mxu1 %vm2358_vm13, %v2320_v34  ;;  %v3117_v23 = vsel %vm1588_vm4, %v3115_v54, %v3116_v10  ;;  %v2950_v11 = vshll.u32 %v2805_v26, 16  ;;  %v5653_v12 = vld [vmem:[#allocation2 + $0x90] sm:$0xf0] }
 0x193   : > { %1105 = vst.msk [vmem:[#allocation2 + $0xac] sm:$0xf] %vm594_vm2, %v921_v25  ;;  %v2947_v16 = vrot.slane %v2945_v0, 1  ;;  %v560_v3 = vadd.f32 %v6993_v4, %v559_v22  ;;  %v941_v44 = vshrl.u32 %v680_v8, 16  ;;  %v944_v55 = vshll.u32 %v680_v8, 16 }
 0x194   : > { %1108 = vst [vmem:[#allocation2 + $0xb0] sm:$0x1] %v1107_v28  ;;  %3152 = vrot.lane.b32.xlu0 %v3117_v23, %s5987_s29  ;;  %v2952_v9 = vrot.slane %v2950_v11, 1  ;;  %v5684_v50 = vor.u32 %v5683_v33, %v5682_v37  ;;  %v3171_v30 = vsel %vm1669_vm11, %v7054_v45, %v6967_v15  ;;  %v1470_v53 = vrot.slane %v1468_v39, 1  ;;  %v7068_v60 = vld [vmem:[#allocation2 + $0x9c] sm:$0xf0] }
 0x195   : > { %1115 = vst [vmem:[#allocation2 + $0xbc] sm:$0x1] %v1114_v42  ;;  %1659 = vrot.lane.b32.xlu1 %v1624_v13, %s5987_s29  ;;  %v3139_v21 = vpop.permute.xlu0 %3138  ;;  %v2948_v35 = vor.u32 %v2947_v16, %v2943_v31  ;;  %v2069_v19 = vshll.u32 %v7047_v46, 16  ;;  %v1679_v4 = vsel %vm1669_vm11, %v6848_v6, %v1517_v61  ;;  %v7064_v26 = vsel %vm1669_vm11, %v6616_v56, %v3013_v36  ;;  %v1116_v32 = vld [vmem:[#allocation2 + $0xc0] sm:$0xf] }
 0x196   : > { %v943_v41 = vrot.slane %v941_v44, 7  ;;  %v593_v5 = vmax.f32 %v560_v3, 0.0  ;;  %8560 = vst [vmem:[#allocation10_spill] sm:$0xff] %v7066_v62  ;;  %v5717_v6 = vld [vmem:[#allocation2 + $0xa8] sm:$0xe]  ;;  %v5655_v61 = vor.u32 %v5654_v2, %v5653_v12  ;;  %v2234_v36 = vrot.slane %v5684_v50, 1 }
 0x197   : > { %v1646_v24 = vpop.permute.xlu1 %1645  ;;  %v2953_v15 = vsel %vm1315_vm3, %v2948_v35, %v2952_v9  ;;  %v2071_v58 = vrot.slane %v2069_v19, 1  ;;  %v2235_v10 = vrot.slane %v7047_v46, 1  ;;  %v1168_v42 = vld [vmem:[#allocation2 + $0xa4] sm:$0x1]  ;;  %v1471_v34 = vsel %vm1315_vm3, %v6981_v7, %v1470_v53  ;;  %v1120_v12 = vld [vmem:[#allocation2 + $0xc8] sm:$0x1] }
 0x198   : > { %v7071_v54 = vpop.permute.xlu2 %2259  ;;  %v1711_v20 = vsel %vm424_vm0, %v1679_v4, %v1646_v24  ;;  %3024 = vrot.lane.b32.xlu2 %v2953_v15, %s5986_s12  ;;  %v946_v56 = vor.u32 %v944_v55, %v943_v41  ;;  %v681_v57 = vpack.c.bf16 %v593_v5, %v593_v5  ;;  %v1626_v22 = vrot.slane %v7026_v63, 1  ;;  %v7089_v55 = vld [vmem:[#allocation2 + $0x9c] sm:$0xff]   ;;  %v1781_v15 = vld [vmem:[#allocation2 + $0xa4] sm:$0x1] }
 0x199   : > { %5461 = vmatmul.msk.bf16.gmra.mxu2 %vm2358_vm13, %v1711_v20  ;;  %v2072_v8 = vsel %vm1315_vm3, %v6981_v7, %v2071_v58  ;;  %v1625_v46 = vrot.slane %v5655_v61, 1  ;;  %v1296_v2 = vunpack.c.l.b16 %v1168_v42  ;;  %v947_v13 = vrot.slane %v943_v41, 4  ;;  %8561 = vst [vmem:[#allocation11_spill] sm:$0xff] %v7089_v55  ;;  %v5864_v7 = vld [vmem:[#allocation2 + $0x9c] sm:$0xf0] }
 0x19a   : > { %v5716_v33 = vld [vmem:[#allocation2 + $0xa8] sm:$0xf0]  ;;  %v1117_v28 = vsel %vm6259_vm6, %v946_v56, %v1116_v32  ;;  %v949_v23 = vshrl.u32 %v681_v57, 16  ;;  %v952_v0 = vshll.u32 %v681_v57, 16  ;;  %v2236_v16 = vsel %vm1588_vm4, %v2234_v36, %v2235_v10  ;;  %v5865_v20 = vld [vmem:[#allocation2 + $0x9c] sm:$0xe] }
 0x19b   : > { %v5696_v25 = vld [vmem:[#allocation2 + $0xa8] sm:$0xff]   ;;  %v2662_v37 = vld [vmem:[#allocation2 + $0xb0] sm:$0x1]  ;;  %v5718_v11 = vor.u32 %v5717_v6, %v5716_v33  ;;  %1118 = vst [vmem:[#allocation2 + $0xc0] sm:$0xf] %v1117_v28  ;;  %v3203_v3 = vsel %vm424_vm0, %v3171_v30, %v3139_v21  ;;  %v1627_v44 = vsel %vm1588_vm4, %v1625_v46, %v1626_v22  ;;  %v1475_v4 = vshll.u32 %v7066_v62, 16 }
 0x19c   : > { %1532 = vrot.lane.b32.xlu0 %v1471_v34, %s5986_s12  ;;  %v2790_v39 = vunpack.c.l.b16 %v2662_v37  ;;  %v951_v31 = vrot.slane %v949_v23, 7  ;;  %v2957_v38 = vshll.u32 %v5696_v25, 16  ;;  %v7096_v30 = vpack.c.b16 %v1296_v2, %v1296_v2  ;;  %v5867_v61 = vld [vmem:[#allocation2 + $0xb4] sm:$0xf0]  ;;  %v2663_v42 = vld [vmem:[#allocation2 + $0xbc] sm:$0x1] }
 0x19d   : > { %2143 = vrot.lane.b32.xlu1 %v2072_v8, %s5986_s12  ;;  %v1519_v63 = vpop.permute.xlu0 %1518  ;;  %v3118_v19 = vrot.slane %v5718_v11, 1  ;;  %v1477_v10 = vrot.slane %v1475_v4, 1  ;;  %v2955_v47 = vshrl.u32 %v5696_v25, 16  ;;  %v1909_v51 = vunpack.c.l.b16 %v1781_v15  ;;  %v5868_v34 = vld [vmem:[#allocation2 + $0xb4] sm:$0xe] }
 0x19e   : > { %v2806_v9 = vpack.c.b16 %v2790_v39, %v2790_v39  ;;  %v954_v35 = vor.u32 %v952_v0, %v951_v31  ;;  %v956_v53 = vrot.slane %v951_v31, 4  ;;  %v2959_v6 = vrot.slane %v2957_v38, 1  ;;  %v5871_v39 = vld [vmem:[#allocation2 + $0x9c] sm:$0xe] }
 0x19f   : > { %v2130_v50 = vpop.permute.xlu1 %2129  ;;  %v1480_v57 = vshll.u32 %v7096_v30, 16  ;;  %v1473_v22 = vshrl.u32 %v7066_v62, 16  ;;  %v1925_v23 = vpack.c.b16 %v1909_v51, %v1909_v51  ;;  %v2791_v0 = vunpack.c.l.b16 %v2663_v42 }
 0x1a0   : > { %v2290_v24 = vsel %vm1669_vm11, %v6497_v18, %v2130_v50  ;;  %v7094_v41 = vpop.permute.xlu2 %3014  ;;  %v3119_v5 = vrot.slane %v2806_v9, 1  ;;  %v2962_v21 = vshll.u32 %v2806_v9, 16  ;;  %2271 = vrot.lane.b32.xlu2 %v2236_v16, %s5987_s29  ;;  %v955_v32 = vsel %vm6278_vm9, %v947_v13, %v954_v35  ;;  %v7104_v18 = vld [vmem:[#allocation2 + $0xb4] sm:$0xff]  }
 0x1a1   : > { %5484 = vmatmul.msk.bf16.gmra.mxu3 %vm2358_vm13, %v3203_v3  ;;  %v1121_v58 = vsel %vm6284_vm10, %v956_v53, %v1120_v12  ;;  %8562 = vst [vmem:[#allocation12_spill] sm:$0xff] %v7104_v18  ;;  %v2322_v56 = vsel %vm424_vm0, %v2290_v24, %v7009_v43  ;;  %v7115_v28 = vor.u32 %v2959_v6, %v2955_v47  ;;  %v1482_v11 = vrot.slane %v1480_v57, 1  ;;  %v5686_v6 = vld [vmem:[#allocation2 + $0xa8] sm:$0xe] }
 0x1a2   : > { %1119 = vst.msk [vmem:[#allocation2 + $0xc4] sm:$0xf] %vm594_vm2, %v955_v32  ;;  %v3120_v36 = vsel %vm1588_vm4, %v3118_v19, %v3119_v5  ;;  %5441 = vmatmul.msk.bf16.gmra.mxu1 %vm2358_vm13, %v2322_v56  ;;  %v2964_v33 = vrot.slane %v2962_v21, 1  ;;  %v1478_v37 = vor.u32 %v1477_v10, %v1473_v22  ;;  %v5866_v8 = vor.u32 %v5865_v20, %v5864_v7  ;;  %v1782_v7 = vld [vmem:[#allocation2 + $0xb0] sm:$0x1] }
 0x1a3   : > { %1122 = vst [vmem:[#allocation2 + $0xc8] sm:$0x1] %v1121_v58  ;;  %v1681_v25 = vsel %vm1669_vm11, %v6491_v14, %v1519_v63  ;;  %v2076_v2 = vshll.u32 %v7089_v55, 16  ;;  %v2081_v13 = vshll.u32 %v1925_v23, 16  ;;  %v2074_v3 = vshrl.u32 %v7089_v55, 16 }
 0x1a4   : > { %3154 = vrot.lane.b32.xlu0 %v3120_v36, %s5987_s29  ;;  %v2965_v31 = vsel %vm1315_vm3, %v7115_v28, %v2964_v33  ;;  %v2807_v12 = vpack.c.b16 %v2791_v0, %v2791_v0  ;;  %v5869_v63 = vor.u32 %v5868_v34, %v5867_v61  ;;  %v1483_v50 = vsel %vm1315_vm3, %v1478_v37, %v1482_v11  ;;  %v5685_v58 = vld [vmem:[#allocation2 + $0xa8] sm:$0xf0]  ;;  %v5720_v61 = vld [vmem:[#allocation2 + $0xc0] sm:$0xe] }
 0x1a5   : > { %1661 = vrot.lane.b32.xlu1 %v1627_v44, %s5987_s29  ;;  %v3141_v43 = vpop.permute.xlu0 %3140  ;;  %v2078_v9 = vrot.slane %v2076_v2, 1  ;;  %v2083_v14 = vrot.slane %v2081_v13, 1  ;;  %v1169_v44 = vld [vmem:[#allocation2 + $0xb0] sm:$0x1]  ;;  %v2237_v35 = vrot.slane %v5866_v8, 1  ;;  %v2238_v53 = vrot.slane %v1925_v23, 1 }
 0x1a6   : > { %v2967_v19 = vshrl.u32 %v7104_v18, 16  ;;  %v5872_v24 = vor.u32 %v5871_v39, %v7068_v60  ;;  %v2969_v5 = vshll.u32 %v7104_v18, 16  ;;  %v2974_v21 = vshll.u32 %v2807_v12, 16 }
 0x1a7   : > { %v1648_v46 = vpop.permute.xlu1 %1647  ;;  %v2079_v4 = vor.u32 %v2078_v9, %v2074_v3  ;;  %v3205_v15 = vsel %vm424_vm0, %v7064_v26, %v3141_v43  ;;  %v1297_v20 = vunpack.c.l.b16 %v1169_v44  ;;  %v1910_v32 = vunpack.c.l.b16 %v1782_v7 }
 0x1a8   : > { %v7122_v38 = vpop.permute.xlu2 %2261  ;;  %v1713_v16 = vsel %vm424_vm0, %v1681_v25, %v1648_v46  ;;  %3026 = vrot.lane.b32.xlu2 %v2965_v31, %s5986_s12  ;;  %v3121_v10 = vrot.slane %v5869_v63, 1  ;;  %v3122_v57 = vrot.slane %v2807_v12, 1  ;;  %v2971_v42 = vrot.slane %v2969_v5, 1  ;;  %v7149_v31 = vld [vmem:[#allocation2 + $0x60] sm:$0xff]   ;;  %v5657_v12 = vld [vmem:[#allocation2 + $0xa8] sm:$0xe] }
 0x1a9   : > { %5462 = vmatmul.msk.bf16.gmra.mxu2 %vm2358_vm13, %v1713_v16  ;;  %v2084_v56 = vsel %vm1315_vm3, %v2079_v4, %v2083_v14  ;;  %v5719_v60 = vld [vmem:[#allocation2 + $0xc0] sm:$0xf0]  ;;  %v2239_v47 = vsel %vm1588_vm4, %v2237_v35, %v2238_v53  ;;  %v1629_v51 = vrot.slane %v7096_v30, 1  ;;  %v7139_v34 = vpack.c.b16 %v1297_v20, %v1297_v20  ;;  %v7154_v14 = vld [vmem:[#allocation2 + $0xb4] sm:$0xff]   ;;  %v5656_v35 = vld [vmem:[#allocation2 + $0xa8] sm:$0xf0] }
 0x1aa   : > { %v1926_v26 = vpack.c.b16 %v1910_v32, %v1910_v32  ;;  %v2664_v33 = vld [vmem:[#allocation2 + $0xc8] sm:$0x1]  ;;  %v1628_v43 = vrot.slane %v5872_v24, 1  ;;  %v2972_v23 = vor.u32 %v2971_v42, %v2967_v19  ;;  %v2976_v0 = vrot.slane %v2974_v21, 1  ;;  %v5697_v9 = vld [vmem:[#allocation2 + $0xc0] sm:$0xff]   ;;  %8563 = vst [vmem:[#allocation13_spill] sm:$0xff] %v7154_v14 }
 0x1ab   : > { %v5687_v37 = vor.u32 %v5686_v6, %v5685_v58  ;;  %v1492_v39 = vshll.u32 %v7139_v34, 16  ;;  %v5721_v46 = vor.u32 %v5720_v61, %v5719_v60  ;;  %v3123_v2 = vsel %vm1588_vm4, %v3121_v10, %v3122_v57  ;;  %v7156_v63 = vld [vmem:[#allocation2 + $0xb4] sm:$0xf0]  ;;  %v1170_v53 = vld [vmem:[#allocation2 + $0xbc] sm:$0x1] }
 0x1ac   : > { %1534 = vrot.lane.b32.xlu0 %v1483_v50, %s5986_s12  ;;  %v2093_v25 = vshll.u32 %v1926_v26, 16  ;;  %v2792_v13 = vunpack.c.l.b16 %v2664_v33  ;;  %v3175_v16 = vsel %vm1669_vm11, %v7149_v31, %v7094_v41  ;;  %v2241_v3 = vrot.slane %v1926_v26, 1  ;;  %v7168_v5 = vld [vmem:[#allocation2 + $0xb4] sm:$0xff]   ;;  %v1783_v61 = vld [vmem:[#allocation2 + $0xbc] sm:$0x1] }
 0x1ad   : > { %v1521_v36 = vpop.permute.xlu0 %1520  ;;  %2145 = vrot.lane.b32.xlu1 %v2084_v56, %s5986_s12  ;;  %v1494_v7 = vrot.slane %v1492_v39, 1  ;;  %v2240_v50 = vrot.slane %v5687_v37, 1  ;;  %v2977_v19 = vsel %vm1315_vm3, %v2972_v23, %v2976_v0  ;;  %v3124_v24 = vrot.slane %v5721_v46, 1  ;;  %8564 = vst [vmem:[#allocation14_spill] sm:$0xff] %v7168_v5  ;;  %v5874_v57 = vld [vmem:[#allocation2 + $0xb4] sm:$0xe] }
 0x1ae   : > { %v1683_v44 = vsel %vm1669_vm11, %v7054_v45, %v1521_v36  ;;  %v2095_v4 = vrot.slane %v2093_v25, 1  ;;  %v2981_v20 = vshll.u32 %v5697_v9, 16  ;;  %v5658_v58 = vor.u32 %v5657_v12, %v5656_v35  ;;  %v5876_v26 = vld [vmem:[#allocation2 + $0xcc] sm:$0xf0]  ;;  %v2665_v0 = vld [vmem:[#allocation2 + $0xd4] sm:$0x1] }
 0x1af   : > { %v2132_v22 = vpop.permute.xlu1 %2131  ;;  %v2242_v32 = vsel %vm1588_vm4, %v2240_v50, %v2241_v3  ;;  %v1298_v6 = vunpack.c.l.b16 %v1170_v53  ;;  %v1495_v36 = vsel %vm1315_vm3, %v7115_v28, %v1494_v7  ;;  %v2979_v10 = vshrl.u32 %v5697_v9, 16 }
 0x1b0   : > { %v2292_v11 = vsel %vm1669_vm11, %v7054_v45, %v2132_v22  ;;  %v3017_v8 = vpop.permute.xlu2 %3016  ;;  %2273 = vrot.lane.b32.xlu2 %v2239_v47, %s5987_s29  ;;  %v5873_v45 = vld [vmem:[#allocation2 + $0xb4] sm:$0xf0]  ;;  %v2096_v60 = vsel %vm1315_vm3, %v7115_v28, %v2095_v4  ;;  %v2983_v33 = vrot.slane %v2981_v20, 1  ;;  %v1911_v23 = vunpack.c.l.b16 %v1783_v61 }
 0x1b1   : > { %5485 = vmatmul.msk.bf16.gmra.mxu3 %vm2358_vm13, %v3205_v15  ;;  %v2324_v30 = vsel %vm424_vm0, %v2292_v11, %v7071_v54  ;;  %v1630_v54 = vsel %vm1588_vm4, %v1628_v43, %v1629_v51  ;;  %v7164_v41 = vsel %vm1669_vm11, %v6731_v29, %v3017_v8  ;;  %v2808_v15 = vpack.c.b16 %v2792_v13, %v2792_v13  ;;  %v7180_v51 = vld [vmem:[#allocation2 + $0xcc] sm:$0xff]  }
 0x1b2   : > { %5442 = vmatmul.msk.bf16.gmra.mxu1 %vm2358_vm13, %v2324_v30  ;;  %v1632_v29 = vrot.slane %v7139_v34, 1  ;;  %v7178_v47 = vpack.c.b16 %v1298_v6, %v1298_v6  ;;  %8565 = vst [vmem:[#allocation15_spill] sm:$0xff] %v7180_v51  ;;  %v1499_v43 = vshll.u32 %v7154_v14, 16  ;;  %v1497_v37 = vshrl.u32 %v7154_v14, 16  ;;  %v5877_v30 = vld [vmem:[#allocation2 + $0xcc] sm:$0xe] }
 0x1b3   : > { %v2986_v22 = vshll.u32 %v2808_v15, 16  ;;  %v1927_v8 = vpack.c.b16 %v1911_v23, %v1911_v23  ;;  %v3125_v39 = vrot.slane %v2808_v15, 1  ;;  %v2100_v25 = vshll.u32 %v7168_v5, 16 }
 0x1b4   : > { %3156 = vrot.lane.b32.xlu0 %v3123_v2, %s5987_s29  ;;  %v1504_v28 = vshll.u32 %v7178_v47, 16  ;;  %v1501_v11 = vrot.slane %v1499_v43, 1  ;;  %v5875_v46 = vor.u32 %v5874_v57, %v5873_v45  ;;  %v2793_v2 = vunpack.c.l.b16 %v2665_v0  ;;  %v300_v57 = vld [vmem:[%s6120_s16] sm:$0xff]  }
 0x1b5   : > { %v3143_v21 = vpop.permute.xlu0 %3142  ;;  %1663 = vrot.lane.b32.xlu1 %v1630_v54, %s5987_s29  ;;  %v1631_v12 = vrot.slane %v5658_v58, 1  ;;  %v7192_v9 = vor.u32 %v2983_v33, %v2979_v10  ;;  %v5880_v54 = vld [vmem:[#allocation2 + $0xb4] sm:$0xe]  ;;  %v2098_v35 = vshrl.u32 %v7168_v5, 16  ;;  %v2105_v53 = vshll.u32 %v1927_v8, 16 }
 0x1b6   : > { %v3207_v3 = vsel %vm424_vm0, %v3175_v16, %v3143_v21  ;;  %v1502_v7 = vor.u32 %v1501_v11, %v1497_v37  ;;  %v1506_v50 = vrot.slane %v1504_v28, 1  ;;  %v2102_v4 = vrot.slane %v2100_v25, 1  ;;  %v306_v33 = vld [vmem:[%s6120_s16 + $0x18] sm:$0xff]   ;;  %v7221_v11 = vld [vmem:[#allocation2 + $0x78] sm:$0xff]  }
 0x1b7   : > { %v1650_v56 = vpop.permute.xlu1 %1649  ;;  %v2244_v45 = vrot.slane %v1927_v8, 1  ;;  %v2243_v20 = vrot.slane %v5875_v46, 1  ;;  %v2809_v16 = vpack.c.b16 %v2793_v2, %v2793_v2  ;;  %v3126_v58 = vsel %vm1588_vm4, %v3124_v24, %v3125_v39 }
 0x1b8   : > { %v1715_v42 = vsel %vm424_vm0, %v1683_v44, %v1650_v56  ;;  %3028 = vrot.lane.b32.xlu2 %v2977_v19, %s5986_s12  ;;  %v7183_v34 = vpop.permute.xlu2 %2263  ;;  %v2988_v44 = vrot.slane %v2986_v22, 1  ;;  %v5878_v6 = vor.u32 %v5877_v30, %v5876_v26  ;;  %v2103_v10 = vor.u32 %v2102_v4, %v2098_v35  ;;  %v304_v26 = vld [vmem:[%s6120_s16 + $0x10] sm:$0xff]  }
 0x1b9   : > { %5463 = vmatmul.msk.bf16.gmra.mxu2 %vm2358_vm13, %v1715_v42  ;;  %v2993_v24 = vshll.u32 %v7180_v51, 16  ;;  %v302_v42 = vld [vmem:[%s6120_s16 + $0x8] sm:$0xff]   ;;  %v5988_v22 = vmov 2.0   ;;  %v2991_v0 = vshrl.u32 %v7180_v51, 16  ;;  %v2998_v28 = vshll.u32 %v2809_v16, 16 }
 0x1ba   : > { %v2989_v56 = vsel %vm1315_vm3, %v7192_v9, %v2988_v44  ;;  %5799 = vrcp.f32 %v5988_v22  ;;  %v3127_v23 = vrot.slane %v5878_v6, 1  ;;  %v4159_v39 = vunpack.c.l.bf16 %v300_v57  ;;  %v308_v22 = vld [vmem:[%s6120_s16 + $0x20] sm:$0xff]  }
 0x1bb   : > { %v2995_v37 = vrot.slane %v2993_v24, 1  ;;  %v4161_v25 = vunpack.c.l.bf16 %v302_v42  ;;  %v4162_v2 = vunpack.c.h.bf16 %v302_v42  ;;  %v1635_v44 = vrot.slane %v7178_v47, 1 }
 0x1bc   : > { %1536 = vrot.lane.b32.xlu0 %v1495_v36, %s5986_s12  ;;  %v3000_v4 = vrot.slane %v2998_v28, 1  ;;  %v4191_v47 = vsel %vm424_vm0, %v4159_v39, 0.0  ;;  %v7251_v28 = vld [vmem:[%s6120_s16 + $0x30] sm:$0xff]   ;;  %v4167_v39 = vunpack.c.l.bf16 %v308_v22  ;;  %vm4946_vm2 = vcmask 1042434  }
 0x1bd   : > { %v1523_v13 = vpop.permute.xlu0 %1522  ;;  %2147 = vrot.lane.b32.xlu1 %v2096_v60, %s5986_s12  ;;  %v5881_v60 = vor.u32 %v5880_v54, %v7156_v63  ;;  %v4160_v63 = vunpack.c.h.bf16 %v300_v57  ;;  %v4164_v54 = vunpack.c.h.bf16 %v304_v26  ;;  %vm4954_vm6 = vcmask 1046534  }
 0x1be   : > { %v1685_v61 = vsel %vm1669_vm11, %v6621_v27, %v1523_v13  ;;  %v7215_v27 = vsel %vm1588_vm4, %v2243_v20, %v2244_v45  ;;  %v4163_v13 = vunpack.c.l.bf16 %v304_v26  ;;  %v5688_v45 = vld [vmem:[#allocation2 + $0xc0] sm:$0xf0] }
 0x1bf   : > { %v2134_v19 = vpop.permute.xlu1 %2133 }
 0x1c0   : > { %v2294_v15 = vsel %vm1669_vm11, %v6631_v40, %v2134_v19  ;;  %2275 = vrot.lane.b32.xlu2 %v2242_v32, %s5987_s29  ;;  %v1633_v40 = vsel %vm1588_vm4, %v1631_v12, %v1632_v29  ;;  %v1507_v32 = vsel %vm1315_vm3, %v1502_v7, %v1506_v50  ;;  %v3019_v36 = vpop.permute.xlu2 %3018  ;;  %v3128_v29 = vrot.slane %v2809_v16, 1  ;;  %v1784_v50 = vld [vmem:[#allocation2 + $0xc8] sm:$0x1]  ;;  %v5800_v20 = vpop.eup %5799 }
 0x1c1   : > { %5486 = vmatmul.msk.bf16.gmra.mxu3 %vm2358_vm13, %v3207_v3  ;;  %v2326_v21 = vsel %vm424_vm0, %v2294_v15, %v7122_v38  ;;  %v2107_v38 = vrot.slane %v2105_v53, 1  ;;  %v7225_v8 = vsel %vm1669_vm11, %v7221_v11, %v3019_v36  ;;  %v4165_v3 = vunpack.c.l.bf16 %v306_v33  ;;  %v5689_v15 = vld [vmem:[#allocation2 + $0xc0] sm:$0xe] }
 0x1c2   : > { %5443 = vmatmul.msk.bf16.gmra.mxu1 %vm2358_vm13, %v2326_v21  ;;  %v4166_v7 = vunpack.c.h.bf16 %v306_v33  ;;  %v3129_v35 = vsel %vm1588_vm4, %v3127_v23, %v3128_v29  ;;  %v1634_v53 = vrot.slane %v5881_v60, 1  ;;  %v2996_v19 = vor.u32 %v2995_v37, %v2991_v0 }
 0x1c3   : > { %v2108_v30 = vsel %vm1315_vm3, %v2103_v10, %v2107_v38  ;;  %v4192_v21 = vsel %vm424_vm0, %v4161_v25, 0.0  ;;  %v3512_v6 = vmul.f32 2.0, %v5800_v20  ;;  %v4200_v36 = vsel %vm424_vm0, %v4164_v54, 0.0 }
 0x1c4   : > { %3158 = vrot.lane.b32.xlu0 %v3126_v58, %s5987_s29  ;;  %v4194_v58 = vsel %vm424_vm0, %v4160_v63, 0.0  ;;  %v1912_v10 = vunpack.c.l.b16 %v1784_v50  ;;  %v5690_v38 = vor.u32 %v5689_v15, %v5688_v45  ;;  %v1636_v24 = vsel %vm1588_vm4, %v1634_v53, %v1635_v44 }
 0x1c5   : > { %v3145_v43 = vpop.permute.xlu0 %3144  ;;  %1665 = vrot.lane.b32.xlu1 %v1633_v40, %s5987_s29  ;;  %v4197_v40 = vsel %vm424_vm0, %v4163_v13, 0.0  ;;  %v3001_v57 = vsel %vm1315_vm3, %v2996_v19, %v3000_v4  ;;  %v3513_v42 = vsub.f32 1.0, %v3512_v6  ;;  %v4193_v29 = vadd.f32 %v4192_v21, %v4191_v47  ;;  %v7256_v13 = vld [vmem:[%s6120_s16 + $0x38] sm:$0xff]  }
 0x1c6   : > { %v3209_v16 = vsel %vm424_vm0, %v7164_v41, %v3145_v43  ;;  %v4201_v41 = vsel %vm424_vm0, %v4166_v7, 0.0  ;;  %vm3516_vm14 = vweird.f32 %v5800_v20  ;;  %v1928_v33 = vpack.c.b16 %v1912_v10, %v1912_v10  ;;  %v310_v43 = vld [vmem:[%s6120_s16 + $0x28] sm:$0xff]  }
 0x1c7   : > { %v1652_v46 = vpop.permute.xlu1 %1651  ;;  %v3514_v0 = vmul.f32 %v5800_v20, %v3513_v42  ;;  %v4202_v37 = vadd.f32 %v4201_v41, %v4200_v36  ;;  %v4169_v63 = vunpack.c.l.bf16 %v310_v43  ;;  %v4203_v50 = vsel %vm424_vm0, %v4167_v39, 0.0 }
 0x1c8   : > { %v1717_v12 = vsel %vm424_vm0, %v1685_v61, %v1652_v46  ;;  %3030 = vrot.lane.b32.xlu2 %v2989_v56, %s5986_s12  ;;  %v4195_v61 = vsel %vm424_vm0, %v4162_v2, 0.0  ;;  %v4198_v56 = vsel %vm424_vm0, %v4165_v3, 0.0  ;;  %v2117_v46 = vshll.u32 %v1928_v33, 16 }
 0x1c9   : > { %5464 = vmatmul.msk.bf16.gmra.mxu2 %vm2358_vm13, %v1717_v12  ;;  %v4199_v26 = vadd.f32 %v4198_v56, %v4197_v40  ;;  %v2247_v2 = vrot.slane %v1928_v33, 1  ;;  %v3515_v44 = vadd.f32 %v5800_v20, %v3514_v0  ;;  %v4204_v53 = vsel %vm424_vm0, %v4169_v63, 0.0 }
 0x1ca   : > { %v2119_v54 = vrot.slane %v2117_v46, 1  ;;  %v4170_v19 = vunpack.c.h.bf16 %v310_v43 }
 0x1cc   : > { %1538 = vrot.lane.b32.xlu0 %v1507_v32, %s5986_s12  ;;  %v4196_v32 = vadd.f32 %v4195_v61, %v4194_v58  ;;  %v7286_v58 = vadd.f32 %v4204_v53, %v4203_v50 }
 0x1cd   : > { %2149 = vrot.lane.b32.xlu1 %v2108_v30, %s5986_s12  ;;  %v1525_v60 = vpop.permute.xlu0 %1524  ;;  %v2246_v30 = vrot.slane %v5690_v38, 1  ;;  %v7294_v38 = vsel %vm424_vm0, %v4170_v19, 0.0 }
 0x1ce   : > { %v1687_v3 = vsel %vm1669_vm11, %v7149_v31, %v1525_v60 }
 0x1cf   : > { %v2136_v23 = vpop.permute.xlu1 %2135 }
 0x1d0   : > { %v2296_v25 = vsel %vm1669_vm11, %v7149_v31, %v2136_v23  ;;  %2277 = vrot.lane.b32.xlu2 %v7215_v27, %s5987_s29  ;;  %v7270_v31 = vsel %vm3516_vm14, %v5800_v20, %v3515_v44  ;;  %v4168_v27 = vunpack.c.h.bf16 %v308_v22  ;;  %v2120_v20 = vsel %vm1315_vm3, %v7192_v9, %v2119_v54 }
 0x1d1   : > { %5487 = vmatmul.msk.bf16.gmra.mxu3 %vm2358_vm13, %v3209_v16  ;;  %v2328_v12 = vsel %vm424_vm0, %v2296_v25, %v7183_v34  ;;  %v4239_v34 = vmul.f32 %v4193_v29, %v7270_v31  ;;  %v4240_v45 = vmul.f32 %v4196_v32, %v7270_v31  ;;  %v7277_v15 = vmul.f32 %v4199_v26, %v7270_v31 }
 0x1d2   : > { %5444 = vmatmul.msk.bf16.gmra.mxu1 %vm2358_vm13, %v2328_v12  ;;  %v2248_v16 = vsel %vm1588_vm4, %v2246_v30, %v2247_v2  ;;  %v7281_v47 = vmul.f32 %v4202_v37, %v7270_v31  ;;  %v7291_v10 = vsel %vm424_vm0, %v4168_v27, 0.0  ;;  %vm4948_vm3 = vcmask 1043459  }
 0x1d3   : > { %v4272_v6 = vrot.slane %v4239_v34, 4  ;;  %v4273_v61 = vrot.slane %v4239_v34, 6  ;;  %v4274_v36 = vrot.slane %v4240_v45, 2  ;;  %v4275_v41 = vrot.slane %v4240_v45, 4 }
 0x1d4   : > { %3160 = vrot.lane.b32.xlu0 %v3129_v35, %s5987_s29  ;;  %v4271_v35 = vrot.slane %v4239_v34, 2  ;;  %v4276_v42 = vrot.slane %v4240_v45, 6  ;;  %v4277_v29 = vrot.slane %v7277_v15, 2  ;;  %v4279_v60 = vrot.slane %v7277_v15, 6 }
 0x1d5   : > { %1667 = vrot.lane.b32.xlu1 %v1636_v24, %s5987_s29  ;;  %v4278_v24 = vrot.slane %v7277_v15, 4  ;;  %v4368_v32 = vsel %vm4367_vm15, %v4239_v34, 0.0  ;;  %v4382_v33 = vsel %vm4367_vm15, %v4272_v6, 0.0  ;;  %v4389_v0 = vsel %vm4367_vm15, %v4273_v61, 0.0 }
 0x1d6   : > { %v4375_v26 = vsel %vm4367_vm15, %v4271_v35, 0.0  ;;  %v4369_v22 = vrot.slane %v4368_v32, 4  ;;  %v4383_v23 = vrot.slane %v4382_v33, 4  ;;  %v4390_v37 = vrot.slane %v4389_v0, 4 }
 0x1d7   : > { %v1654_v56 = vpop.permute.xlu1 %1653  ;;  %v4376_v43 = vrot.slane %v4375_v26, 4  ;;  %v4396_v39 = vsel %vm4367_vm15, %v4240_v45, 0.0  ;;  %v4410_v63 = vsel %vm4367_vm15, %v4275_v41, 0.0  ;;  %v4417_v54 = vsel %vm4367_vm15, %v4276_v42, 0.0 }
 0x1d8   : > { %v1719_v9 = vsel %vm424_vm0, %v1687_v3, %v1654_v56  ;;  %3032 = vrot.lane.b32.xlu2 %v3001_v57, %s5986_s12  ;;  %v4403_v57 = vsel %vm4367_vm15, %v4274_v36, 0.0  ;;  %v4370_v25 = vadd.f32 %v4369_v22, %v4368_v32  ;;  %v4384_v30 = vadd.f32 %v4383_v23, %v4382_v33 }
 0x1d9   : > { %5465 = vmatmul.msk.bf16.gmra.mxu2 %vm2358_vm13, %v1719_v9  ;;  %v4377_v46 = vadd.f32 %v4376_v43, %v4375_v26  ;;  %v4397_v2 = vrot.slane %v4396_v39, 4  ;;  %v4391_v3 = vadd.f32 %v4390_v37, %v4389_v0  ;;  %v4404_v12 = vrot.slane %v4403_v57, 4 }
 0x1da   : > { %v4411_v44 = vrot.slane %v4410_v63, 4  ;;  %v4371_v50 = vrot.slane %v4370_v25, 2  ;;  %v4385_v27 = vrot.slane %v4384_v30, 2  ;;  %v4418_v6 = vrot.slane %v4417_v54, 4 }
 0x1db   : > { %v4378_v53 = vrot.slane %v4377_v46, 2  ;;  %v4398_v19 = vadd.f32 %v4397_v2, %v4396_v39  ;;  %v4392_v34 = vrot.slane %v4391_v3, 2  ;;  %v4405_v45 = vadd.f32 %v4404_v12, %v4403_v57 }
 0x1dc   : > { %v4412_v35 = vadd.f32 %v4411_v44, %v4410_v63  ;;  %v4372_v61 = vadd.f32 %v4371_v50, %v4370_v25  ;;  %v4386_v36 = vadd.f32 %v4385_v27, %v4384_v30  ;;  %v4419_v33 = vadd.f32 %v4418_v6, %v4417_v54 }
 0x1dd   : > { %2151 = vrot.lane.b32.xlu1 %v2120_v20, %s5986_s12  ;;  %v4379_v56 = vadd.f32 %v4378_v53, %v4377_v46  ;;  %v4399_v41 = vrot.slane %v4398_v19, 2  ;;  %v4393_v9 = vadd.f32 %v4392_v34, %v4391_v3  ;;  %v4406_v32 = vrot.slane %v4405_v45, 2 }
 0x1de   : > { %v4413_v26 = vrot.slane %v4412_v35, 2  ;;  %v4373_v42 = vrot.slane %v4372_v61, 1  ;;  %v4387_v43 = vrot.slane %v4386_v36, 1  ;;  %v4420_v39 = vrot.slane %v4419_v33, 2 }
 0x1df   : > { %v4380_v22 = vrot.slane %v4379_v56, 1  ;;  %v4400_v23 = vadd.f32 %v4399_v41, %v4398_v19  ;;  %v4394_v0 = vrot.slane %v4393_v9, 1  ;;  %v4407_v20 = vadd.f32 %v4406_v32, %v4405_v45  ;;  %v7329_v45 = vpop.permute.xlu2 %2265 }
 0x1e0   : > { %2279 = vrot.lane.b32.xlu2 %v2248_v16, %s5987_s29  ;;  %v4414_v37 = vadd.f32 %v4413_v26, %v4412_v35  ;;  %v4280_v57 = vrot.slane %v7281_v47, 2  ;;  %v4281_v63 = vrot.slane %v7281_v47, 4  ;;  %v4282_v25 = vrot.slane %v7281_v47, 6  ;;  %s8403_s29 = scalar_lea.vmem [#allocation6], %s5345_s20 }
 0x1e1   : > { %v4401_v46 = vrot.slane %v4400_v23, 1  ;;  %v7315_v30 = vadd.f32 %v4373_v42, %v4372_v61  ;;  %v7317_v2 = vadd.f32 %v4380_v22, %v4379_v56  ;;  %v7319_v16 = vadd.f32 %v4387_v43, %v4386_v36  ;;  %s5261_s8 = sshll.u32 %s8403_s29, 4  ;;  %s5262_s8 = int_to_ptr.vmem [resolvable:$true] %s5261_s8 }
 0x1e2   : > { %v4421_v3 = vadd.f32 %v4420_v39, %v4419_v33  ;;  %v7321_v12 = vadd.f32 %v4394_v0, %v4393_v9  ;;  %v4424_v44 = vsel %vm4367_vm15, %v7277_v15, 0.0  ;;  %v4431_v54 = vsel %vm4367_vm15, %v4277_v29, 0.0 }
 0x1e3   : > { %v4438_v50 = vsel %vm4367_vm15, %v4278_v24, 0.0  ;;  %v7327_v53 = vadd.f32 %v4401_v46, %v4400_v23  ;;  %v4408_v27 = vrot.slane %v4407_v20, 1  ;;  %v4415_v19 = vrot.slane %v4414_v37, 1 }
 0x1e4   : > { %v4425_v34 = vrot.slane %v4424_v44, 4  ;;  %v4432_v35 = vrot.slane %v4431_v54, 4  ;;  %v4439_v6 = vrot.slane %v4438_v50, 4  ;;  %v4445_v61 = vsel %vm4367_vm15, %v4279_v60, 0.0 }
 0x1e5   : > { %v4452_v56 = vsel %vm4367_vm15, %v7281_v47, 0.0  ;;  %v4422_v36 = vrot.slane %v4421_v3, 1  ;;  %v4446_v41 = vrot.slane %v4445_v61, 4  ;;  %v4459_v26 = vsel %vm4367_vm15, %v4280_v57, 0.0 }
 0x1e6   : > { %v4426_v29 = vadd.f32 %v4425_v34, %v4424_v44  ;;  %v4453_v24 = vrot.slane %v4452_v56, 4  ;;  %v4433_v9 = vadd.f32 %v4432_v35, %v4431_v54  ;;  %v4440_v32 = vadd.f32 %v4439_v6, %v4438_v50 }
 0x1e7   : > { %v4466_v33 = vsel %vm4367_vm15, %v4281_v63, 0.0  ;;  %v4447_v22 = vadd.f32 %v4446_v41, %v4445_v61  ;;  %v4460_v23 = vrot.slane %v4459_v26, 4  ;;  %v4473_v39 = vsel %vm4367_vm15, %v4282_v25, 0.0 }
 0x1e8   : > { %v4427_v42 = vrot.slane %v4426_v29, 2  ;;  %v4454_v43 = vadd.f32 %v4453_v24, %v4452_v56  ;;  %v4434_v15 = vrot.slane %v4433_v9, 2  ;;  %v4441_v0 = vrot.slane %v4440_v32, 2 }
 0x1e9   : > { %v4467_v60 = vrot.slane %v4466_v33, 4  ;;  %v4448_v46 = vrot.slane %v4447_v22, 2  ;;  %v4461_v34 = vadd.f32 %v4460_v23, %v4459_v26  ;;  %v4474_v35 = vrot.slane %v4473_v39, 4 }
 0x1ea   : > { %v4428_v47 = vadd.f32 %v4427_v42, %v4426_v29  ;;  %v4455_v44 = vrot.slane %v4454_v43, 2  ;;  %v4435_v40 = vadd.f32 %v4434_v15, %v4433_v9  ;;  %v4442_v54 = vadd.f32 %v4441_v0, %v4440_v32  ;;  %v7339_v29 = vpop.permute.xlu2 %3020 }
 0x1eb   : > { %v4468_v50 = vadd.f32 %v4467_v60, %v4466_v33  ;;  %v4449_v6 = vadd.f32 %v4448_v46, %v4447_v22  ;;  %v4462_v21 = vrot.slane %v4461_v34, 2  ;;  %v4475_v24 = vadd.f32 %v4474_v35, %v4473_v39  ;;  %v2138_v35 = vpop.permute.xlu1 %2137 }
 0x1ec   : > { %v4429_v57 = vrot.slane %v4428_v47, 1  ;;  %v4456_v63 = vadd.f32 %v4455_v44, %v4454_v43  ;;  %v4436_v61 = vrot.slane %v4435_v40, 1  ;;  %v4443_v56 = vrot.slane %v4442_v54, 1  ;;  %v7341_v44 = vpop.f32.mrf.mxu2 }
 0x1ed   : > { %v4469_v41 = vrot.slane %v4468_v50, 2  ;;  %v4409_v4 = vadd.f32 %v4408_v27, %v4407_v20  ;;  %v4450_v7 = vrot.slane %v4449_v6, 1  ;;  %v4463_v25 = vadd.f32 %v4462_v21, %v4461_v34  ;;  %v2404_v27 = vpop.f32.mrf.mxu1 }
 0x1ee   : > { %v4457_v5 = vrot.slane %v4456_v63, 1  ;;  %v4416_v42 = vadd.f32 %v4415_v19, %v4414_v37  ;;  %v4423_v26 = vadd.f32 %v4422_v36, %v4421_v3  ;;  %v4476_v32 = vrot.slane %v4475_v24, 2 }
 0x1ef   : > { %v4470_v9 = vadd.f32 %v4469_v41, %v4468_v50  ;;  %v4430_v33 = vadd.f32 %v4429_v57, %v4428_v47  ;;  %v4437_v23 = vadd.f32 %v4436_v61, %v4435_v40  ;;  %v4444_v15 = vadd.f32 %v4443_v56, %v4442_v54  ;;  %v3147_v40 = vpop.permute.xlu0 %3146 }
 0x1f0   : > { %v4464_v22 = vrot.slane %v4463_v25, 1  ;;  %v4451_v43 = vadd.f32 %v4450_v7, %v4449_v6  ;;  %v4458_v0 = vadd.f32 %v4457_v5, %v4456_v63  ;;  %v4477_v46 = vadd.f32 %v4476_v32, %v4475_v24 }
 0x1f1   : > { %v4471_v60 = vrot.slane %v4470_v9, 1  ;;  %v4816_v21 = vmul.f32 %v7315_v30, %v7270_v31  ;;  %v4817_v37 = vmul.f32 %v7317_v2, %v7270_v31  ;;  %v4818_v3 = vmul.f32 %v7319_v16, %v7270_v31 }
 0x1f2   : > { %v4465_v20 = vadd.f32 %v4464_v22, %v4463_v25  ;;  %v4478_v36 = vrot.slane %v4477_v46, 1  ;;  %v4819_v5 = vmul.f32 %v7321_v12, %v7270_v31  ;;  %v4820_v7 = vmul.f32 %v7327_v53, %v7270_v31  ;;  %v7368_v56 = vpop.permute.xlu2 %2267 }
 0x1f3   : > { %v4472_v19 = vadd.f32 %v4471_v60, %v4470_v9  ;;  %v4821_v39 = vmul.f32 %v4409_v4, %v7270_v31  ;;  %v4822_v30 = vmul.f32 %v4416_v42, %v7270_v31  ;;  %v4824_v47 = vmul.f32 %v4430_v33, %v7270_v31 }
 0x1f4   : > { %v4825_v2 = vmul.f32 %v4437_v23, %v7270_v31  ;;  %v4479_v34 = vadd.f32 %v4478_v36, %v4477_v46  ;;  %v4823_v16 = vmul.f32 %v4423_v26, %v7270_v31  ;;  %v4826_v54 = vmul.f32 %v4444_v15, %v7270_v31  ;;  %v2539_v15 = vpop.f32.mrf.mxu2 }
 0x1f5   : > { %v4827_v50 = vmul.f32 %v4451_v43, %v7270_v31  ;;  %v4828_v12 = vmul.f32 %v4458_v0, %v7270_v31  ;;  %v4829_v53 = vmul.f32 %v4465_v20, %v7270_v31  ;;  %v4830_v4 = vmul.f32 %v4472_v19, %v7270_v31  ;;  %v2406_v60 = vpop.f32.mrf.mxu1 }
 0x1f6   : > { %v4831_v57 = vmul.f32 %v4479_v34, %v7270_v31  ;;  %vm4950_vm4 = vcmask 1044484   ;;  %v5079_v6 = vsel %vm4944_vm1, %v4817_v37, %v4816_v21  ;;  %v5086_v63 = vsel %vm4944_vm1, %v4825_v2, %v4824_v47 }
 0x1f7   : > { %v2298_v61 = vsel %vm1669_vm11, %v6746_v17, %v2138_v35  ;;  %v5080_v41 = vsel %vm4946_vm2, %v4818_v3, %v5079_v6  ;;  %v5087_v24 = vsel %vm4946_vm2, %v4826_v54, %v5086_v63  ;;  %v3211_v25 = vsel %vm424_vm0, %v7225_v8, %v3147_v40  ;;  %v1527_v21 = vpop.permute.xlu0 %1526 }
 0x1f8   : > { %v5081_v42 = vsel %vm4948_vm3, %v4819_v5, %v5080_v41  ;;  %v5088_v26 = vsel %vm4948_vm3, %v4827_v50, %v5087_v24  ;;  %5488 = vmatmul.msk.bf16.gmra.mxu3 %vm2358_vm13, %v3211_v25  ;;  %v2330_v17 = vsel %vm424_vm0, %v2298_v61, %v7329_v45  ;;  %v4208_v33 = vadd.f32 %v7294_v38, %v7291_v10 }
 0x1f9   : > { %v5082_v9 = vsel %vm4950_vm4, %v4820_v7, %v5081_v42  ;;  %v5089_v32 = vsel %vm4950_vm4, %v4828_v12, %v5088_v26  ;;  %5445 = vmatmul.msk.bf16.gmra.mxu1 %vm2358_vm13, %v2330_v17  ;;  %v8566_v8 = vunpack.c.l.bf16 %v7251_v28  ;;  %v8567_v45 = vunpack.c.l.bf16 %v7256_v13  ;;  %v3283_v7 = vpop.f32.mrf.mxu3 }
 0x1fa   : > { %v5083_v22 = vsel %vm4952_vm5, %v4821_v39, %v5082_v9  ;;  %v5090_v43 = vsel %vm4952_vm5, %v4829_v53, %v5089_v32  ;;  %v8568_v38 = vunpack.c.h.bf16 %v7251_v28  ;;  %v8569_v19 = vunpack.c.h.bf16 %v7256_v13  ;;  %v7423_v12 = vpop.permute.xlu2 %3022 }
 0x1fb   : > { %v4209_v23 = vsel %vm424_vm0, %v8566_v8, 0.0  ;;  %v4210_v0 = vsel %vm424_vm0, %v8567_v45, 0.0  ;;  %v5084_v46 = vsel %vm4954_vm6, %v4822_v30, %v5083_v22  ;;  %v5091_v20 = vsel %vm4954_vm6, %v4830_v4, %v5090_v43 }
 0x1fc   : > { %v4211_v10 = vadd.f32 %v4210_v0, %v4209_v23  ;;  %v4212_v37 = vsel %vm424_vm0, %v8568_v38, 0.0  ;;  %v5085_v3 = vsel %vm4956_vm7, %v4823_v16, %v5084_v46  ;;  %v5092_v40 = vsel %vm4956_vm7, %v4831_v57, %v5091_v20 }
 0x1fd   : > { %v4213_v36 = vsel %vm424_vm0, %v8569_v19, 0.0  ;;  %v5776_v5 = vpack.i.bf16 %v5092_v40, %v5085_v3  ;;  %v4243_v30 = vmul.f32 %v7286_v58, %v7270_v31  ;;  %v4244_v47 = vmul.f32 %v4208_v33, %v7270_v31 }
 0x1fe   : > { %v4214_v39 = vadd.f32 %v4213_v36, %v4212_v37  ;;  %v2538_v28 = vadd.f32 %v7341_v44, %v2404_v27  ;;  %v7406_v2 = vadd.f32 %v2539_v15, %v2406_v60  ;;  %v7409_v34 = vmul.f32 %v4211_v10, %v7270_v31 }
 0x1ff   : > { %v7414_v13 = vsel %vm1669_vm11, %v6869_v49, %v7339_v29  ;;  %5777 = vrot.lane.b32.xlu0 %v5776_v5, %s5986_s12  ;;  %v4283_v16 = vrot.slane %v4243_v30, 2  ;;  %v4284_v54 = vrot.slane %v4243_v30, 4  ;;  %v4285_v50 = vrot.slane %v4243_v30, 6  ;;  %v7438_v32 = vpop.permute.xlu0 %3148 }
 0x200   : > { %v7419_v58 = vsel %vm1669_vm11, %v6734_v52, %v1527_v21  ;;  %v7421_v44 = vadd.f32 %v3283_v7, %v2538_v28  ;;  %v4286_v27 = vrot.slane %v4244_v47, 2  ;;  %v4287_v35 = vrot.slane %v4244_v47, 4 }
 0x201   : > { %v7426_v53 = vmul.f32 %v4214_v39, %v7270_v31  ;;  %v4288_v49 = vrot.slane %v4244_v47, 6  ;;  %v4289_v29 = vrot.slane %v7409_v34, 2  ;;  %v4290_v4 = vrot.slane %v7409_v34, 4 }
 0x202   : > { %v4291_v57 = vrot.slane %v7409_v34, 6  ;;  %v4480_v6 = vsel %vm4367_vm15, %v4243_v30, 0.0  ;;  %v4487_v52 = vsel %vm4367_vm15, %v4283_v16, 0.0  ;;  %v4494_v63 = vsel %vm4367_vm15, %v4284_v54, 0.0 }
 0x203   : > { %v4481_v61 = vrot.slane %v4480_v6, 4  ;;  %v4488_v41 = vrot.slane %v4487_v52, 4  ;;  %v4495_v24 = vrot.slane %v4494_v63, 4  ;;  %v4501_v25 = vsel %vm4367_vm15, %v4285_v50, 0.0 }
 0x204   : > { %v4502_v42 = vrot.slane %v4501_v25, 4  ;;  %v4508_v26 = vsel %vm4367_vm15, %v4244_v47, 0.0  ;;  %v4515_v17 = vsel %vm4367_vm15, %v4286_v27, 0.0  ;;  %v4522_v9 = vsel %vm4367_vm15, %v4287_v35, 0.0  ;;  %v7441_v27 = vpop.permute.xlu1 %1655  ;;  %v7443_v35 = vpop.permute.xlu2 %2269 }
 0x205   : > { %v4482_v33 = vadd.f32 %v4481_v61, %v4480_v6  ;;  %v4489_v8 = vadd.f32 %v4488_v41, %v4487_v52  ;;  %v4496_v23 = vadd.f32 %v4495_v24, %v4494_v63  ;;  %v4509_v15 = vrot.slane %v4508_v26, 4  ;;  %v7449_v61 = vpop.f32.mrf.mxu2  ;;  %v7451_v41 = vpop.f32.mrf.mxu3 }
 0x206   : > { %v4503_v22 = vadd.f32 %v4502_v42, %v4501_v25  ;;  %v4516_v43 = vrot.slane %v4515_v17, 4  ;;  %v4523_v45 = vrot.slane %v4522_v9, 4  ;;  %v4529_v0 = vsel %vm4367_vm15, %v4288_v49, 0.0 }
 0x207   : > { %v4483_v60 = vrot.slane %v4482_v33, 2  ;;  %v4490_v46 = vrot.slane %v4489_v8, 2  ;;  %v4497_v20 = vrot.slane %v4496_v23, 2  ;;  %v4510_v21 = vadd.f32 %v4509_v15, %v4508_v26 }
 0x208   : > { %v4504_v10 = vrot.slane %v4503_v22, 2  ;;  %v4517_v38 = vadd.f32 %v4516_v43, %v4515_v17  ;;  %v4524_v37 = vadd.f32 %v4523_v45, %v4522_v9  ;;  %v4530_v3 = vrot.slane %v4529_v0, 4  ;;  %v7470_v45 = vpop.permute.xlu0 %1528 }
 0x209   : > { %v4484_v40 = vadd.f32 %v4483_v60, %v4482_v33  ;;  %v4491_v19 = vadd.f32 %v4490_v46, %v4489_v8  ;;  %v4498_v36 = vadd.f32 %v4497_v20, %v4496_v23  ;;  %v4511_v5 = vrot.slane %v4510_v21, 2 }
 0x20a   : > { %v4505_v7 = vadd.f32 %v4504_v10, %v4503_v22  ;;  %v4518_v39 = vrot.slane %v4517_v38, 2  ;;  %v4525_v30 = vrot.slane %v4524_v37, 2  ;;  %v4531_v47 = vadd.f32 %v4530_v3, %v4529_v0 }
 0x20b   : > { %v4485_v28 = vrot.slane %v4484_v40, 1  ;;  %v4492_v16 = vrot.slane %v4491_v19, 1  ;;  %v4499_v54 = vrot.slane %v4498_v36, 1  ;;  %v4512_v50 = vadd.f32 %v4511_v5, %v4510_v21 }
 0x20c   : > { %v4506_v49 = vrot.slane %v4505_v7, 1  ;;  %v7445_v6 = vadd.f32 %v4518_v39, %v4517_v38  ;;  %v7447_v52 = vadd.f32 %v4525_v30, %v4524_v37  ;;  %v4532_v63 = vrot.slane %v4531_v47, 2  ;;  %v7481_v37 = vpop.f32.mrf.mxu1  ;;  %v7486_v30 = vpop.permute.xlu1 %2139 }
 0x20d   : > { %v4292_v24 = vrot.slane %v7426_v53, 2  ;;  %v4293_v25 = vrot.slane %v7426_v53, 4  ;;  %v4294_v42 = vrot.slane %v7426_v53, 6  ;;  %v4513_v26 = vrot.slane %v4512_v50, 1 }
 0x20e   : > { %v7456_v17 = vadd.f32 %v4485_v28, %v4484_v40  ;;  %v7458_v9 = vadd.f32 %v4492_v16, %v4491_v19  ;;  %v7460_v33 = vadd.f32 %v4499_v54, %v4498_v36  ;;  %v7462_v8 = vadd.f32 %v4532_v63, %v4531_v47 }
 0x20f   : > { %v7464_v23 = vadd.f32 %v4506_v49, %v4505_v7  ;;  %v4536_v15 = vsel %vm4367_vm15, %v7409_v34, 0.0  ;;  %v4543_v22 = vsel %vm4367_vm15, %v4289_v29, 0.0  ;;  %v4550_v43 = vsel %vm4367_vm15, %v4290_v4, 0.0  ;;  %v7488_v34 = vpop.permute.xlu2 %3024 }
 0x210   : > { %v7472_v0 = vadd.f32 %v4513_v26, %v4512_v50  ;;  %v4520_v60 = vrot.slane %v7445_v6, 1  ;;  %v4527_v46 = vrot.slane %v7447_v52, 1  ;;  %v4537_v20 = vrot.slane %v4536_v15, 4 }
 0x211   : > { %v4544_v21 = vrot.slane %v4543_v22, 4  ;;  %v4551_v10 = vrot.slane %v4550_v43, 4  ;;  %v4557_v38 = vsel %vm4367_vm15, %v4291_v57, 0.0  ;;  %v4564_v29 = vsel %vm4367_vm15, %v7426_v53, 0.0 }
 0x212   : > { %v4534_v4 = vrot.slane %v7462_v8, 1  ;;  %v4538_v3 = vadd.f32 %v4537_v20, %v4536_v15  ;;  %v4558_v40 = vrot.slane %v4557_v38, 4  ;;  %v4565_v19 = vrot.slane %v4564_v29, 4 }
 0x213   : > { %v4545_v36 = vadd.f32 %v4544_v21, %v4543_v22  ;;  %v4552_v5 = vadd.f32 %v4551_v10, %v4550_v43  ;;  %v4571_v7 = vsel %vm4367_vm15, %v4292_v24, 0.0  ;;  %v4578_v39 = vsel %vm4367_vm15, %v4293_v25, 0.0  ;;  %v7491_v24 = vpop.f32.mrf.mxu2  ;;  %v7493_v25 = vpop.f32.mrf.mxu3 }
 0x214   : > { %v4539_v57 = vrot.slane %v4538_v3, 2  ;;  %v4559_v47 = vadd.f32 %v4558_v40, %v4557_v38  ;;  %v4566_v53 = vadd.f32 %v4565_v19, %v4564_v29  ;;  %v4572_v28 = vrot.slane %v4571_v7, 4 }
 0x215   : > { %v4546_v16 = vrot.slane %v4545_v36, 2  ;;  %v4553_v54 = vrot.slane %v4552_v5, 2  ;;  %v4579_v50 = vrot.slane %v4578_v39, 4  ;;  %v4585_v49 = vsel %vm4367_vm15, %v4294_v42, 0.0 }
 0x216   : > { %v4540_v63 = vadd.f32 %v4539_v57, %v4538_v3  ;;  %v4560_v26 = vrot.slane %v4559_v47, 2  ;;  %v4567_v15 = vrot.slane %v4566_v53, 2  ;;  %v4573_v22 = vadd.f32 %v4572_v28, %v4571_v7  ;;  %v7495_v3 = vpop.permute.xlu0 %3150 }
 0x217   : > { %v4547_v43 = vadd.f32 %v4546_v16, %v4545_v36  ;;  %v4554_v20 = vadd.f32 %v4553_v54, %v4552_v5  ;;  %v4580_v21 = vadd.f32 %v4579_v50, %v4578_v39  ;;  %v4586_v10 = vrot.slane %v4585_v49, 4  ;;  %v7499_v54 = vpop.f32.mrf.mxu1  ;;  %v7504_v18 = vpop.permute.xlu2 %2271 }
 0x218   : > { %v4541_v38 = vrot.slane %v4540_v63, 1  ;;  %v4561_v29 = vadd.f32 %v4560_v26, %v4559_v47  ;;  %v4568_v40 = vadd.f32 %v4567_v15, %v4566_v53  ;;  %v4574_v19 = vrot.slane %v4573_v22, 2  ;;  %v7501_v47 = vpop.permute.xlu1 %1657 }
 0x219   : > { %v4548_v14 = vrot.slane %v4547_v43, 1  ;;  %v4555_v51 = vrot.slane %v4554_v20, 1  ;;  %v4581_v62 = vrot.slane %v4580_v21, 2  ;;  %v4587_v42 = vadd.f32 %v4586_v10, %v4585_v49 }
 0x21a   : > { %v4521_v7 = vadd.f32 %v4520_v60, %v7445_v6  ;;  %v4562_v57 = vrot.slane %v4561_v29, 1  ;;  %v4569_v28 = vrot.slane %v4568_v40, 1  ;;  %v4575_v55 = vadd.f32 %v4574_v19, %v4573_v22 }
 0x21b   : > { %v4528_v36 = vadd.f32 %v4527_v46, %v7447_v52  ;;  %v4542_v5 = vadd.f32 %v4541_v38, %v4540_v63  ;;  %v4582_v39 = vadd.f32 %v4581_v62, %v4580_v21  ;;  %v4588_v16 = vrot.slane %v4587_v42, 2 }
 0x21c   : > { %v4549_v53 = vadd.f32 %v4548_v14, %v4547_v43  ;;  %v4556_v50 = vadd.f32 %v4555_v51, %v4554_v20  ;;  %v4563_v26 = vadd.f32 %v4562_v57, %v4561_v29  ;;  %v4576_v49 = vrot.slane %v4575_v55, 1  ;;  %v3290_v20 = vpop.f32.mrf.mxu3  ;;  %v5173_v57 = vld [vmem:[%s8536_s5 + $0x8] sm:$0xf] }
 0x21d   : > { %v4535_v15 = vadd.f32 %v4534_v4, %v7462_v8  ;;  %v4570_v10 = vadd.f32 %v4569_v28, %v4568_v40  ;;  %v4583_v6 = vrot.slane %v4582_v39, 1  ;;  %v4589_v60 = vadd.f32 %v4588_v16, %v4587_v42 }
 0x21e   : > { %v4577_v22 = vadd.f32 %v4576_v49, %v4575_v55  ;;  %v4832_v62 = vmul.f32 %v7456_v17, %v7270_v31  ;;  %v4833_v52 = vmul.f32 %v7458_v9, %v7270_v31  ;;  %v4834_v14 = vmul.f32 %v7460_v33, %v7270_v31  ;;  %v2547_v9 = vpop.f32.mrf.mxu2  ;;  %v7523_v29 = vpop.permute.xlu0 %1530 }
 0x21f   : > { %v4584_v51 = vadd.f32 %v4583_v6, %v4582_v39  ;;  %v4590_v46 = vrot.slane %v4589_v60, 1  ;;  %v4835_v8 = vmul.f32 %v7464_v23, %v7270_v31  ;;  %v4836_v4 = vmul.f32 %v7472_v0, %v7270_v31  ;;  %v7528_v0 = vld [vmem:[%s8535_s4] ss:$0 sm:$0xff]  ;;  %v2414_v16 = vpop.f32.mrf.mxu1 }
 0x220   : > { %v4840_v63 = vmul.f32 %v4542_v5, %v7270_v31  ;;  %v4841_v55 = vmul.f32 %v4549_v53, %v7270_v31  ;;  %v4842_v17 = vmul.f32 %v4556_v50, %v7270_v31  ;;  %v4843_v43 = vmul.f32 %v4563_v26, %v7270_v31  ;;  %v2142_v53 = vpop.permute.xlu1 %2141 }
 0x221   : > { %v4591_v21 = vadd.f32 %v4590_v46, %v4589_v60  ;;  %v4837_v33 = vmul.f32 %v4521_v7, %v7270_v31  ;;  %v4838_v38 = vmul.f32 %v4528_v36, %v7270_v31  ;;  %v4844_v23 = vmul.f32 %v4570_v10, %v7270_v31  ;;  %v3027_v60 = vpop.permute.xlu2 %3026 }
 0x222   : > { %v4845_v40 = vmul.f32 %v4577_v22, %v7270_v31  ;;  %v5093_v19 = vsel %vm4944_vm1, %v4833_v52, %v4832_v62  ;;  %v5100_v42 = vsel %vm4944_vm1, %v4841_v55, %v4840_v63  ;;  %v1721_v7 = vsel %vm424_vm0, %v7419_v58, %v7441_v27 }
 0x223   : > { %v4839_v28 = vmul.f32 %v4535_v15, %v7270_v31  ;;  %v4846_v36 = vmul.f32 %v4584_v51, %v7270_v31  ;;  %v5094_v5 = vsel %vm4946_vm2, %v4834_v14, %v5093_v19  ;;  %v5101_v39 = vsel %vm4946_vm2, %v4842_v17, %v5100_v42  ;;  %5466 = vmatmul.msk.bf16.gmra.mxu2 %vm2358_vm13, %v1721_v7 }
 0x224   : > { %v4847_v50 = vmul.f32 %v4591_v21, %v7270_v31  ;;  %v5095_v58 = vsel %vm4948_vm3, %v4835_v8, %v5094_v5  ;;  %v5102_v27 = vsel %vm4948_vm3, %v4843_v43, %v5101_v39  ;;  %v3364_v26 = vadd.f32 %v7451_v41, %v7406_v2 }
 0x225   : > { %v5096_v49 = vsel %vm4950_vm4, %v4836_v4, %v5095_v58  ;;  %v5103_v15 = vsel %vm4950_vm4, %v4844_v23, %v5102_v27  ;;  %v5183_v10 = vunpack.c.l.b16 %v5173_v57  ;;  %v2300_v6 = vsel %vm1669_vm11, %v7221_v11, %v7486_v30 }
 0x226   : > { %v3399_v22 = vadd.f32 %v7528_v0, %v7421_v44  ;;  %v5097_v62 = vsel %vm4952_vm5, %v4837_v33, %v5096_v49  ;;  %v5104_v52 = vsel %vm4952_vm5, %v4845_v40, %v5103_v15  ;;  %v2543_v2 = vadd.f32 %v7449_v61, %v7481_v37  ;;  %v2549_v4 = vpop.f32.mrf.mxu2  ;;  %v3293_v61 = vpop.f32.mrf.mxu3  ;;  %v7609_v49 = vld [vmem:[#allocation2 + $0xa8] sm:$0xff]  }
 0x227   : > { %v5098_v41 = vsel %vm4954_vm6, %v4838_v38, %v5097_v62  ;;  %v5105_v14 = vsel %vm4954_vm6, %v4846_v36, %v5104_v52  ;;  %v5185_v51 = vpack.c.b16 %v5183_v10, %v5183_v10  ;;  %v3213_v30 = vsel %vm424_vm0, %v7414_v13, %v7438_v32  ;;  %v3153_v32 = vpop.permute.xlu0 %3152  ;;  %v2416_v33 = vpop.f32.mrf.mxu1 }
 0x228   : > { %v5099_v46 = vsel %vm4956_vm7, %v4839_v28, %v5098_v41  ;;  %v5106_v44 = vsel %vm4956_vm7, %v4847_v50, %v5105_v14  ;;  %5489 = vmatmul.msk.bf16.gmra.mxu3 %vm2358_vm13, %v3213_v30  ;;  %v2332_v8 = vsel %vm424_vm0, %v2300_v6, %v7368_v56  ;;  %v3400_v63 = vadd.f32 %v7528_v0, %v3364_v26  ;;  %v1660_v38 = vpop.permute.xlu1 %1659 }
 0x229   : > { %v5781_v37 = vpack.i.bf16 %v5106_v44, %v5099_v46  ;;  %v5200_v55 = vsel %vm2391_vm12, %v5185_v51, 0  ;;  %5446 = vmatmul.msk.bf16.gmra.mxu1 %vm2358_vm13, %v2332_v8  ;;  %v3365_v13 = vadd.f32 %v7493_v25, %v2543_v2  ;;  %v2545_v17 = vadd.f32 %v7491_v24, %v7499_v54  ;;  %v7578_v7 = vpop.permute.xlu2 %2273  ;;  %v7580_v25 = vld [vmem:[#allocation2 + $0x90] sm:$0xff]  }
 0x22a   : > { %5208 = vmatpush.bf16.msrb.mxu0 %v5200_v55  ;;  %v2548_v43 = vadd.f32 %v2547_v9, %v2414_v16  ;;  %v3431_v21 = vmax.f32 %v3399_v22, 0.0  ;;  %v3432_v19 = vmax.f32 %v3400_v63, 0.0  ;;  %v3183_v24 = vsel %vm1669_vm11, %v7580_v25, %v7423_v12 }
 0x22b   : > { %5782 = vrot.lane.b32.xlu1 %v5781_v37, %s5986_s12  ;;  %v3401_v56 = vadd.f32 %v7528_v0, %v3365_v13  ;;  %v3366_v23 = vadd.f32 %v3290_v20, %v2545_v17  ;;  %v1691_v54 = vsel %vm1669_vm11, %v7221_v11, %v7470_v45  ;;  %v3185_v28 = vsel %vm1669_vm11, %v7019_v59, %v7488_v34 }
 0x22c   : > { %v3367_v40 = vadd.f32 %v3293_v61, %v2548_v43  ;;  %v3463_v20 = vsel %vm1669_vm11, %v3431_v21, 0.0  ;;  %v1723_v5 = vsel %vm424_vm0, %v1691_v54, %v7501_v47  ;;  %v2302_v11 = vsel %vm1669_vm11, %v6898_v1, %v2142_v53 }
 0x22d   : > { %v3433_v42 = vmax.f32 %v3401_v56, 0.0  ;;  %v3402_v9 = vadd.f32 %v7528_v0, %v3366_v23  ;;  %v2550_v45 = vadd.f32 %v2549_v4, %v2416_v33  ;;  %v3466_v58 = vsel %vm1669_vm11, %v3432_v19, 0.0 }
 0x22e   : > { %v3403_v57 = vadd.f32 %v7528_v0, %v3367_v40  ;;  %v7599_v16 = vpop.f32.mrf.mxu2  ;;  %v3295_v50 = vpop.f32.mrf.mxu3  ;;  %v1693_v59 = vsel %vm1669_vm11, %v6875_v48, %v7523_v29  ;;  %v7613_v1 = vsel %vm1669_vm11, %v7609_v49, %v3027_v60  ;;  %v3215_v48 = vsel %vm424_vm0, %v3183_v24, %v7495_v3 }
 0x22f   : > { %v3464_v36 = vsel %vm1669_vm11, %v3433_v42, 0.0  ;;  %v3434_v39 = vmax.f32 %v3402_v9, 0.0  ;;  %v7605_v27 = vpop.permute.xlu0 %1532  ;;  %v3368_v53 = vadd.f32 %v3295_v50, %v2550_v45  ;;  %v2334_v29 = vsel %vm424_vm0, %v2302_v11, %v7443_v35  ;;  %v2419_v6 = vpop.f32.mrf.mxu1 }
 0x230   : > { %v3465_v12 = vadd.f32 %v3464_v36, %v3463_v20  ;;  %v3435_v34 = vmax.f32 %v3403_v57, 0.0  ;;  %v7621_v10 = vsel %vm424_vm0, %v1693_v59, %v1660_v38  ;;  %v2144_v22 = vpop.permute.xlu1 %2143  ;;  %v7629_v30 = vsel %vm424_vm0, %v3185_v28, %v3153_v32 }
 0x231   : > { %v3467_v26 = vsel %vm1669_vm11, %v3434_v39, 0.0  ;;  %v3029_v3 = vpop.permute.xlu2 %3028  ;;  %v3404_v8 = vadd.f32 %v7528_v0, %v3368_v53 }
 0x232   : > { %v3518_v47 = vmul.f32 %v7270_v31, %v3465_v12  ;;  %v3468_v15 = vadd.f32 %v3467_v26, %v3466_v58  ;;  %v7626_v51 = vsel %vm1669_vm11, %v3435_v34, 0.0 }
 0x233   : > { %5467 = vmatmul.msk.bf16.gmra.mxu2 %vm2358_vm13, %v1723_v5  ;;  %v3436_v54 = vmax.f32 %v3404_v8, 0.0 }
 0x234   : > { %v3550_v62 = vrot.slane %v3518_v47, 2  ;;  %v3551_v52 = vrot.slane %v3518_v47, 4  ;;  %v3552_v2 = vrot.slane %v3518_v47, 6  ;;  %v3647_v60 = vsel %vm3646_vm8, %v3518_v47, 0.0 }
 0x235   : > { %v3648_v41 = vrot.slane %v3647_v60, 4  ;;  %v3519_v14 = vmul.f32 %v7270_v31, %v3468_v15  ;;  %v1695_v15 = vsel %vm1669_vm11, %v7580_v25, %v7605_v27 }
 0x236   : > { %v3654_v35 = vsel %vm3646_vm8, %v3550_v62, 0.0  ;;  %v3661_v46 = vsel %vm3646_vm8, %v3551_v52, 0.0  ;;  %v3668_v44 = vsel %vm3646_vm8, %v3552_v2, 0.0  ;;  %v2554_v32 = vpop.f32.mrf.mxu2  ;;  %v3298_v21 = vpop.f32.mrf.mxu3 }
 0x237   : > { %v3649_v4 = vadd.f32 %v3648_v41, %v3647_v60  ;;  %v3655_v61 = vrot.slane %v3654_v35, 4  ;;  %v3662_v37 = vrot.slane %v3661_v46, 4  ;;  %v3669_v63 = vrot.slane %v3668_v44, 4  ;;  %v3155_v40 = vpop.permute.xlu0 %3154  ;;  %v2421_v36 = vpop.f32.mrf.mxu1 }
 0x238   : > { %v3553_v55 = vrot.slane %v3519_v14, 2  ;;  %v3554_v13 = vrot.slane %v3519_v14, 4  ;;  %v3555_v17 = vrot.slane %v3519_v14, 6  ;;  %v3675_v43 = vsel %vm3646_vm8, %v3519_v14, 0.0  ;;  %5490 = vmatmul.msk.bf16.gmra.mxu3 %vm2358_vm13, %v3215_v48  ;;  %v1662_v5 = vpop.permute.xlu1 %1661 }
 0x239   : > { %v3650_v56 = vrot.slane %v3649_v4, 2  ;;  %v3656_v33 = vadd.f32 %v3655_v61, %v3654_v35  ;;  %v3663_v38 = vadd.f32 %v3662_v37, %v3661_v46  ;;  %v3670_v23 = vadd.f32 %v3669_v63, %v3668_v44  ;;  %5447 = vmatmul.msk.bf16.gmra.mxu1 %vm2358_vm13, %v2334_v29  ;;  %v7643_v47 = vpop.permute.xlu2 %2275  ;;  %v316_v37 = vld [vmem:[%s6120_s16 + $0x40] sm:$0xff]  }
 0x23a   : > { %v3676_v19 = vrot.slane %v3675_v43, 4  ;;  %v3682_v42 = vsel %vm3646_vm8, %v3553_v55, 0.0  ;;  %v3689_v24 = vsel %vm3646_vm8, %v3554_v13, 0.0  ;;  %v7641_v45 = vsel %vm3646_vm8, %v3555_v17, 0.0  ;;  %v318_v13 = vld [vmem:[%s6120_s16 + $0x48] sm:$0xff]  }
 0x23b   : > { %v3651_v9 = vadd.f32 %v3650_v56, %v3649_v4  ;;  %v3657_v57 = vrot.slane %v3656_v33, 2  ;;  %v3664_v20 = vrot.slane %v3663_v38, 2  ;;  %v3671_v28 = vrot.slane %v3670_v23, 2 }
 0x23c   : > { %v3677_v12 = vadd.f32 %v3676_v19, %v3675_v43  ;;  %v3683_v39 = vrot.slane %v3682_v42, 4  ;;  %v3690_v11 = vrot.slane %v3689_v24, 4  ;;  %v2304_v48 = vsel %vm1669_vm11, %v7580_v25, %v2144_v22  ;;  %v8570_v22 = vld [vmem:[#allocation12_spill] sm:$0xff] }
 0x23d   : > { %v3652_v50 = vrot.slane %v3651_v9, 1  ;;  %v3658_v58 = vadd.f32 %v3657_v57, %v3656_v33  ;;  %v3665_v59 = vadd.f32 %v3664_v20, %v3663_v38  ;;  %v3672_v34 = vadd.f32 %v3671_v28, %v3670_v23 }
 0x23e   : > { %v3678_v26 = vrot.slane %v3677_v12, 2  ;;  %v7645_v53 = vadd.f32 %v3683_v39, %v3682_v42  ;;  %v7654_v41 = vadd.f32 %v3690_v11, %v3689_v24  ;;  %v2553_v35 = vadd.f32 %v7599_v16, %v2419_v6  ;;  %v2557_v46 = vpop.f32.mrf.mxu2  ;;  %v3300_v44 = vpop.f32.mrf.mxu3  ;;  %v320_v42 = vld [vmem:[%s6120_s16 + $0x50] sm:$0xff]   ;;  %v7681_v24 = vld [vmem:[%s6120_s16 + $0x58] sm:$0xff]  }
 0x23f   : > { %v3653_v29 = vadd.f32 %v3652_v50, %v3651_v9  ;;  %v3659_v62 = vrot.slane %v3658_v58, 1  ;;  %v3666_v52 = vrot.slane %v3665_v59, 1  ;;  %v3673_v2 = vrot.slane %v3672_v34, 1  ;;  %v1535_v61 = vpop.permute.xlu0 %1534 }
 0x240   : > { %v7652_v60 = vadd.f32 %v3678_v26, %v3677_v12  ;;  %v3685_v8 = vrot.slane %v7645_v53, 2  ;;  %v3472_v25 = vsel %vm1669_vm11, %v3436_v54, 0.0  ;;  %v3189_v4 = vsel %vm1669_vm11, %v8570_v22, %v3029_v3  ;;  %v2424_v3 = vpop.f32.mrf.mxu1  ;;  %v2146_v33 = vpop.permute.xlu1 %2145 }
 0x241   : > { %v3660_v27 = vadd.f32 %v3659_v62, %v3658_v58  ;;  %v7663_v63 = vadd.f32 %v3666_v52, %v3665_v59  ;;  %v2336_v55 = vsel %vm424_vm0, %v2304_v48, %v7504_v18  ;;  %v3369_v16 = vadd.f32 %v3298_v21, %v2553_v35  ;;  %v8571_v21 = vld [vmem:[#allocation11_spill] sm:$0xff]  ;;  %v3031_v11 = vpop.permute.xlu2 %3030 }
 0x242   : > { %v2555_v6 = vadd.f32 %v2554_v32, %v2421_v36  ;;  %v7668_v17 = vadd.f32 %v3673_v2, %v3672_v34  ;;  %v7671_v43 = vmul.f32 %v3653_v29, %v7270_v31  ;;  %v3680_v56 = vrot.slane %v7652_v60, 1  ;;  %v8572_v36 = vld [vmem:[#allocation10_spill] sm:$0xff]  ;;  %v7713_v2 = vld [vmem:[#allocation2 + $0xc0] sm:$0xff]  }
 0x243   : > { %5468 = vmatmul.msk.bf16.gmra.mxu2 %vm2358_vm13, %v7621_v10  ;;  %v4175_v38 = vunpack.c.l.bf16 %v316_v37  ;;  %v3405_v23 = vadd.f32 %v7528_v0, %v3369_v16  ;;  %v2558_v19 = vadd.f32 %v2557_v46, %v2424_v3  ;;  %v2306_v32 = vsel %vm1669_vm11, %v8571_v21, %v2146_v33 }
 0x244   : > { %v3370_v18 = vadd.f32 %v3300_v44, %v2555_v6  ;;  %v7684_v54 = vmul.f32 %v3660_v27, %v7270_v31  ;;  %v7688_v9 = vsel %vm424_vm0, %v7613_v1, %v3155_v40  ;;  %v7691_v10 = vsel %vm424_vm0, %v1695_v15, %v1662_v5 }
 0x245   : > { %v4177_v57 = vunpack.c.l.bf16 %v318_v13  ;;  %v3437_v20 = vmax.f32 %v3405_v23, 0.0  ;;  %v7696_v12 = vsel %vm1669_vm11, %v8572_v36, %v1535_v61  ;;  %v4176_v39 = vunpack.c.h.bf16 %v316_v37 }
 0x246   : > { %v3406_v28 = vadd.f32 %v7528_v0, %v3370_v18  ;;  %v7700_v50 = vsel %vm424_vm0, %v2306_v32, %v7578_v7  ;;  %v4178_v58 = vunpack.c.h.bf16 %v318_v13  ;;  %v4179_v1 = vunpack.c.l.bf16 %v320_v42  ;;  %v3303_v34 = vpop.f32.mrf.mxu3  ;;  %v2559_v46 = vpop.f32.mrf.mxu2 }
 0x247   : > { %v4181_v40 = vunpack.c.l.bf16 %v7681_v24  ;;  %v3470_v5 = vsel %vm1669_vm11, %v3437_v20, 0.0  ;;  %v4215_v26 = vsel %vm424_vm0, %v4175_v38, 0.0  ;;  %v4216_v15 = vsel %vm424_vm0, %v4177_v57, 0.0  ;;  %v3157_v29 = vpop.permute.xlu0 %3156 }
 0x248   : > { %5491 = vmatmul.msk.bf16.gmra.mxu3 %vm2358_vm13, %v7629_v30  ;;  %v3438_v59 = vmax.f32 %v3406_v28, 0.0  ;;  %v3471_v7 = vadd.f32 %v3470_v5, %v7626_v51  ;;  %v3371_v48 = vadd.f32 %v3303_v34, %v2558_v19  ;;  %v4218_v62 = vsel %vm424_vm0, %v4176_v39, 0.0  ;;  %v2426_v37 = vpop.f32.mrf.mxu1 }
 0x249   : > { %5448 = vmatmul.msk.bf16.gmra.mxu1 %vm2358_vm13, %v2336_v55  ;;  %v4219_v52 = vsel %vm424_vm0, %v4178_v58, 0.0  ;;  %v7717_v35 = vsel %vm1669_vm11, %v7713_v2, %v3031_v11  ;;  %v4180_v44 = vunpack.c.h.bf16 %v320_v42  ;;  %v4182_v27 = vunpack.c.h.bf16 %v7681_v24  ;;  %v1664_v55 = vpop.permute.xlu1 %1663  ;;  %v7743_v34 = vpop.permute.xlu2 %2277 }
 0x24a   : > { %v3473_v30 = vsel %vm1669_vm11, %v3438_v59, 0.0  ;;  %v3520_v51 = vmul.f32 %v7270_v31, %v3471_v7  ;;  %v7722_v61 = vadd.f32 %v7528_v0, %v3371_v48  ;;  %v7724_v16 = vadd.f32 %v4216_v15, %v4215_v26 }
 0x24b   : > { %v3474_v22 = vadd.f32 %v3473_v30, %v3472_v25  ;;  %v7727_v6 = vsel %vm424_vm0, %v3189_v4, %v3157_v29  ;;  %v7729_v13 = vadd.f32 %v2559_v46, %v2426_v37  ;;  %v7731_v3 = vadd.f32 %v4219_v52, %v4218_v62 }
 0x24c   : > { %v4221_v33 = vsel %vm424_vm0, %v4179_v1, 0.0  ;;  %v3556_v38 = vrot.slane %v3520_v51, 2  ;;  %v3557_v23 = vrot.slane %v3520_v51, 4  ;;  %v3558_v18 = vrot.slane %v3520_v51, 6 }
 0x24d   : > { %v3703_v25 = vsel %vm3646_vm8, %v3520_v51, 0.0  ;;  %v3521_v21 = vmul.f32 %v7270_v31, %v3474_v22  ;;  %v4222_v32 = vsel %vm424_vm0, %v4181_v40, 0.0  ;;  %v4224_v42 = vsel %vm424_vm0, %v4180_v44, 0.0 }
 0x24e   : > { %v3704_v19 = vrot.slane %v3703_v25, 4  ;;  %v3710_v4 = vsel %vm3646_vm8, %v3556_v38, 0.0  ;;  %v3717_v24 = vsel %vm3646_vm8, %v3557_v23, 0.0  ;;  %v3724_v57 = vsel %vm3646_vm8, %v3558_v18, 0.0  ;;  %v3305_v58 = vpop.f32.mrf.mxu3  ;;  %v2562_v23 = vpop.f32.mrf.mxu2 }
 0x24f   : > { %v3439_v20 = vmax.f32 %v7722_v61, 0.0  ;;  %v3711_v36 = vrot.slane %v3710_v4, 4  ;;  %v3718_v39 = vrot.slane %v3717_v24, 4  ;;  %v3725_v11 = vrot.slane %v3724_v57, 4  ;;  %v1537_v26 = vpop.permute.xlu0 %1536 }
 0x250   : > { %v3705_v28 = vadd.f32 %v3704_v19, %v3703_v25  ;;  %v3559_v1 = vrot.slane %v3521_v21, 2  ;;  %v3560_v5 = vrot.slane %v3521_v21, 4  ;;  %v3561_v59 = vrot.slane %v3521_v21, 6  ;;  %v2429_v46 = vpop.f32.mrf.mxu1 }
 0x251   : > { %v3731_v40 = vsel %vm3646_vm8, %v3521_v21, 0.0  ;;  %v3712_v7 = vadd.f32 %v3711_v36, %v3710_v4  ;;  %v3719_v48 = vadd.f32 %v3718_v39, %v3717_v24  ;;  %v3726_v29 = vadd.f32 %v3725_v11, %v3724_v57  ;;  %v2148_v44 = vpop.permute.xlu1 %2147 }
 0x252   : > { %v3706_v15 = vrot.slane %v3705_v28, 2  ;;  %v3732_v62 = vrot.slane %v3731_v40, 4  ;;  %v3738_v52 = vsel %vm3646_vm8, %v3559_v1, 0.0  ;;  %v3745_v30 = vsel %vm3646_vm8, %v3560_v5, 0.0 }
 0x253   : > { %5469 = vmatmul.msk.bf16.gmra.mxu2 %vm2358_vm13, %v7691_v10  ;;  %v4225_v51 = vsel %vm424_vm0, %v4182_v27, 0.0  ;;  %v3713_v61 = vrot.slane %v3712_v7, 2  ;;  %v3720_v37 = vrot.slane %v3719_v48, 2  ;;  %v3727_v38 = vrot.slane %v3726_v29, 2 }
 0x254   : > { %v3707_v22 = vadd.f32 %v3706_v15, %v3705_v28  ;;  %v3733_v18 = vadd.f32 %v3732_v62, %v3731_v40  ;;  %v3739_v25 = vrot.slane %v3738_v52, 4  ;;  %v3746_v19 = vrot.slane %v3745_v30, 4 }
 0x255   : > { %v7751_v21 = vsel %vm3646_vm8, %v3561_v59, 0.0  ;;  %v3714_v4 = vadd.f32 %v3713_v61, %v3712_v7  ;;  %v3721_v24 = vadd.f32 %v3720_v37, %v3719_v48  ;;  %v3728_v57 = vadd.f32 %v3727_v38, %v3726_v29  ;;  %v3033_v61 = vpop.permute.xlu2 %3032 }
 0x256   : > { %v3708_v10 = vrot.slane %v3707_v22, 1  ;;  %v3734_v36 = vrot.slane %v3733_v18, 2  ;;  %v7753_v39 = vadd.f32 %v3739_v25, %v3738_v52  ;;  %v1729_v27 = vsel %vm424_vm0, %v7696_v12, %v1664_v55  ;;  %v3308_v59 = vpop.f32.mrf.mxu3 }
 0x257   : > { %v4223_v28 = vadd.f32 %v4222_v32, %v4221_v33  ;;  %v3715_v1 = vrot.slane %v3714_v4, 1  ;;  %v3722_v5 = vrot.slane %v3721_v24, 1  ;;  %v3729_v40 = vrot.slane %v3728_v57, 1  ;;  %v3159_v29 = vpop.permute.xlu0 %3158 }
 0x258   : > { %v3709_v11 = vadd.f32 %v3708_v10, %v3707_v22  ;;  %5492 = vmatmul.msk.bf16.gmra.mxu3 %vm2358_vm13, %v7688_v9  ;;  %v7759_v15 = vadd.f32 %v3734_v36, %v3733_v18  ;;  %v3372_v48 = vadd.f32 %v3305_v58, %v7729_v13  ;;  %v4226_v12 = vadd.f32 %v4225_v51, %v4224_v42 }
 0x259   : > { %5449 = vmatmul.msk.bf16.gmra.mxu1 %vm2358_vm13, %v7700_v50  ;;  %v3716_v55 = vadd.f32 %v3715_v1, %v3714_v4  ;;  %v7766_v32 = vadd.f32 %v3746_v19, %v3745_v30  ;;  %v3475_v62 = vsel %vm1669_vm11, %v3439_v20, 0.0  ;;  %v1699_v52 = vsel %vm1669_vm11, %v7609_v49, %v1537_v26  ;;  %v2431_v20 = vpop.f32.mrf.mxu1  ;;  %v1666_v51 = vpop.permute.xlu1 %1665 }
 0x25a   : > { %v3408_v9 = vadd.f32 %v7528_v0, %v3372_v48  ;;  %v2563_v22 = vadd.f32 %v2562_v23, %v2429_v46  ;;  %v2308_v50 = vsel %vm1669_vm11, %v7609_v49, %v2148_v44  ;;  %v7774_v13 = vadd.f32 %v3722_v5, %v3721_v24  ;;  %v8573_v46 = vld [vmem:[#allocation15_spill] sm:$0xff]  ;;  %v2564_v23 = vpop.f32.mrf.mxu2 }
 0x25b   : > { %v7776_v42 = vadd.f32 %v3729_v40, %v3728_v57  ;;  %v7779_v58 = vmul.f32 %v3709_v11, %v7270_v31  ;;  %v7783_v37 = vmul.f32 %v3716_v55, %v7270_v31  ;;  %v7787_v38 = vsel %vm1669_vm11, %v8573_v46, %v3033_v61  ;;  %v8574_v55 = vld [vmem:[#allocation13_spill] sm:$0xff] }
 0x25c   : > { %v3440_v26 = vmax.f32 %v3408_v9, 0.0  ;;  %v3373_v49 = vadd.f32 %v3308_v59, %v2563_v22  ;;  %v2340_v44 = vsel %vm424_vm0, %v2308_v50, %v7643_v47  ;;  %v7793_v18 = vsel %vm424_vm0, %v7717_v35, %v3159_v29 }
 0x25d   : > { %v4247_v25 = vmul.f32 %v7724_v16, %v7270_v31  ;;  %v7799_v19 = vmul.f32 %v7731_v3, %v7270_v31  ;;  %v2565_v4 = vadd.f32 %v2564_v23, %v2431_v20  ;;  %v7803_v24 = vsel %vm424_vm0, %v1699_v52, %v1666_v51 }
 0x25e   : > { %v3409_v10 = vadd.f32 %v7528_v0, %v3373_v49  ;;  %v7806_v47 = vmul.f32 %v4223_v28, %v7270_v31  ;;  %v3478_v57 = vsel %vm1669_vm11, %v3440_v26, 0.0  ;;  %v3310_v35 = vpop.f32.mrf.mxu3  ;;  %v7810_v36 = vmul.f32 %v4226_v12, %v7270_v31 }
 0x25f   : > { %v4295_v16 = vrot.slane %v4247_v25, 2  ;;  %v7815_v3 = vadd.f32 %v3680_v56, %v7652_v60  ;;  %v3374_v1 = vadd.f32 %v3310_v35, %v2565_v4  ;;  %v1539_v5 = vpop.permute.xlu0 %1538  ;;  %v4296_v40 = vrot.slane %v4247_v25, 4 }
 0x260   : > { %v3441_v11 = vmax.f32 %v3409_v10, 0.0  ;;  %v7820_v28 = vadd.f32 %v3685_v8, %v7645_v53  ;;  %v4297_v59 = vrot.slane %v4247_v25, 6  ;;  %v4298_v48 = vrot.slane %v7799_v19, 2 }
 0x261   : > { %v4299_v29 = vrot.slane %v7799_v19, 4  ;;  %v4300_v12 = vrot.slane %v7799_v19, 6  ;;  %v3410_v56 = vadd.f32 %v7528_v0, %v3374_v1  ;;  %v7830_v9 = vsel %vm1669_vm11, %v8574_v55, %v1539_v5 }
 0x262   : > { %v3476_v60 = vsel %vm1669_vm11, %v3441_v11, 0.0  ;;  %v4301_v53 = vrot.slane %v7806_v47, 2  ;;  %v4302_v52 = vrot.slane %v7806_v47, 4  ;;  %v4592_v22 = vsel %vm4367_vm15, %v4247_v25, 0.0 }
 0x263   : > { %5470 = vmatmul.msk.bf16.gmra.mxu2 %vm2358_vm13, %v1729_v27  ;;  %v3477_v8 = vadd.f32 %v3476_v60, %v3475_v62  ;;  %v4599_v50 = vsel %vm4367_vm15, %v4295_v16, 0.0  ;;  %v3442_v61 = vmax.f32 %v3410_v56, 0.0  ;;  %v4593_v20 = vrot.slane %v4592_v22, 4 }
 0x264   : > { %v4600_v27 = vrot.slane %v4599_v50, 4  ;;  %v4606_v51 = vsel %vm4367_vm15, %v4296_v40, 0.0 }
 0x265   : > { %v3522_v0 = vmul.f32 %v7270_v31, %v3477_v8  ;;  %v3479_v62 = vsel %vm1669_vm11, %v3442_v61, 0.0  ;;  %v4594_v23 = vadd.f32 %v4593_v20, %v4592_v22  ;;  %v4607_v25 = vrot.slane %v4606_v51, 4 }
 0x266   : > { %v4601_v10 = vadd.f32 %v4600_v27, %v4599_v50  ;;  %v3480_v5 = vadd.f32 %v3479_v62, %v3478_v57  ;;  %v4613_v22 = vsel %vm4367_vm15, %v4297_v59, 0.0 }
 0x267   : > { %v3562_v4 = vrot.slane %v3522_v0, 2  ;;  %v3563_v35 = vrot.slane %v3522_v0, 4  ;;  %v3564_v16 = vrot.slane %v3522_v0, 6  ;;  %v3759_v11 = vsel %vm3646_vm8, %v3522_v0, 0.0 }
 0x268   : > { %5493 = vmatmul.msk.bf16.gmra.mxu3 %vm2358_vm13, %v7727_v6  ;;  %v3760_v1 = vrot.slane %v3759_v11, 4  ;;  %v4595_v40 = vrot.slane %v4594_v23, 2  ;;  %v4602_v60 = vrot.slane %v4601_v10, 2  ;;  %v3523_v27 = vmul.f32 %v7270_v31, %v3480_v5 }
 0x269   : > { %5450 = vmatmul.msk.bf16.gmra.mxu1 %vm2358_vm13, %v2340_v44  ;;  %v3766_v56 = vsel %vm3646_vm8, %v3562_v4, 0.0  ;;  %v3773_v55 = vsel %vm3646_vm8, %v3563_v35, 0.0  ;;  %v3780_v8 = vsel %vm3646_vm8, %v3564_v16, 0.0  ;;  %v4608_v7 = vadd.f32 %v4607_v25, %v4606_v51 }
 0x26a   : > { %v3761_v6 = vadd.f32 %v3760_v1, %v3759_v11  ;;  %v3767_v50 = vrot.slane %v3766_v56, 4  ;;  %v3774_v61 = vrot.slane %v3773_v55, 4  ;;  %v3781_v20 = vrot.slane %v3780_v8, 4 }
 0x26b   : > { %v4596_v0 = vadd.f32 %v4595_v40, %v4594_v23  ;;  %v4603_v44 = vadd.f32 %v4602_v60, %v4601_v10  ;;  %v3565_v4 = vrot.slane %v3523_v27, 2  ;;  %v3566_v14 = vrot.slane %v3523_v27, 4 }
 0x26c   : > { %v3762_v57 = vrot.slane %v3761_v6, 2  ;;  %v3768_v62 = vadd.f32 %v3767_v50, %v3766_v56  ;;  %v3775_v30 = vadd.f32 %v3774_v61, %v3773_v55  ;;  %v3782_v33 = vadd.f32 %v3781_v20, %v3780_v8 }
 0x26d   : > { %v3567_v35 = vrot.slane %v3523_v27, 6  ;;  %v3787_v16 = vsel %vm3646_vm8, %v3523_v27, 0.0  ;;  %v3794_v26 = vsel %vm3646_vm8, %v3565_v4, 0.0  ;;  %v3801_v23 = vsel %vm3646_vm8, %v3566_v14, 0.0 }
 0x26e   : > { %v3763_v49 = vadd.f32 %v3762_v57, %v3761_v6  ;;  %v3769_v59 = vrot.slane %v3768_v62, 2  ;;  %v3776_v11 = vrot.slane %v3775_v30, 2  ;;  %v3783_v1 = vrot.slane %v3782_v33, 2 }
 0x26f   : > { %v3788_v46 = vrot.slane %v3787_v16, 4  ;;  %v7855_v51 = vsel %vm3646_vm8, %v3567_v35, 0.0  ;;  %v3795_v56 = vrot.slane %v3794_v26, 4  ;;  %v3802_v55 = vrot.slane %v3801_v23, 4 }
 0x270   : > { %8575 = vst [vmem:[#allocation12_spill] sm:$0xff] %v7855_v51  ;;  %v3764_v10 = vrot.slane %v3763_v49, 1  ;;  %v3770_v25 = vadd.f32 %v3769_v59, %v3768_v62  ;;  %v3777_v5 = vadd.f32 %v3776_v11, %v3775_v30  ;;  %v7857_v40 = vadd.f32 %v3783_v1, %v3782_v33 }
 0x271   : > { %v3789_v60 = vadd.f32 %v3788_v46, %v3787_v16  ;;  %v4609_v8 = vrot.slane %v4608_v7, 2  ;;  %v4614_v14 = vrot.slane %v4613_v22, 4  ;;  %v4597_v57 = vrot.slane %v4596_v0, 1 }
 0x272   : > { %v3771_v6 = vrot.slane %v3770_v25, 1  ;;  %v3778_v50 = vrot.slane %v3777_v5, 1  ;;  %v4620_v33 = vsel %vm4367_vm15, %v7799_v19, 0.0  ;;  %v7865_v30 = vadd.f32 %v3764_v10, %v3763_v49 }
 0x273   : > { %5471 = vmatmul.msk.bf16.gmra.mxu2 %vm2358_vm13, %v7803_v24  ;;  %v3790_v20 = vrot.slane %v3789_v60, 2  ;;  %v7868_v62 = vadd.f32 %v3795_v56, %v3794_v26  ;;  %v4604_v4 = vrot.slane %v4603_v44, 1  ;;  %v7874_v16 = vadd.f32 %v3802_v55, %v3801_v23 }
 0x274   : > { %v7870_v35 = vadd.f32 %v3771_v6, %v3770_v25  ;;  %v7872_v24 = vadd.f32 %v3778_v50, %v3777_v5  ;;  %v4610_v59 = vadd.f32 %v4609_v8, %v4608_v7  ;;  %v7878_v1 = vadd.f32 %v4597_v57, %v4596_v0 }
 0x275   : > { %8577 = vst [vmem:[#allocation10_spill] sm:$0xff] %v7874_v16  ;;  %v7876_v11 = vadd.f32 %v3790_v20, %v3789_v60  ;;  %v4615_v27 = vadd.f32 %v4614_v14, %v4613_v22  ;;  %v4621_v61 = vrot.slane %v4620_v33, 4  ;;  %v7880_v49 = vadd.f32 %v4604_v4, %v4603_v44 }
 0x276   : > { %8576 = vst [vmem:[#allocation11_spill] sm:$0xff] %v7872_v24  ;;  %v4611_v10 = vrot.slane %v4610_v59, 1  ;;  %v4627_v26 = vsel %vm4367_vm15, %v4298_v48, 0.0  ;;  %v4634_v25 = vsel %vm4367_vm15, %v4299_v29, 0.0  ;;  %v4641_v44 = vsel %vm4367_vm15, %v4300_v12, 0.0 }
 0x277   : > { %v4616_v7 = vrot.slane %v4615_v27, 2  ;;  %v4622_v23 = vadd.f32 %v4621_v61, %v4620_v33  ;;  %v4628_v0 = vrot.slane %v4627_v26, 4  ;;  %v4635_v5 = vrot.slane %v4634_v25, 4 }
 0x278   : > { %5494 = vmatmul.msk.bf16.gmra.mxu3 %vm2358_vm13, %v7793_v18  ;;  %v7890_v22 = vadd.f32 %v4611_v10, %v4610_v59  ;;  %v4648_v48 = vsel %vm4367_vm15, %v7806_v47, 0.0  ;;  %v4655_v29 = vsel %vm4367_vm15, %v4301_v53, 0.0  ;;  %v4642_v8 = vrot.slane %v4641_v44, 4 }
 0x279   : > { %v4617_v60 = vadd.f32 %v4616_v7, %v4615_v27  ;;  %v4623_v56 = vrot.slane %v4622_v23, 2  ;;  %v4629_v18 = vadd.f32 %v4628_v0, %v4627_v26  ;;  %v4636_v55 = vadd.f32 %v4635_v5, %v4634_v25 }
 0x27a   : > { %v4649_v6 = vrot.slane %v4648_v48, 4  ;;  %v4656_v50 = vrot.slane %v4655_v29, 4  ;;  %v4662_v19 = vsel %vm4367_vm15, %v4302_v52, 0.0  ;;  %v4643_v57 = vadd.f32 %v4642_v8, %v4641_v44 }
 0x27b   : > { %v4618_v61 = vrot.slane %v4617_v60, 1  ;;  %v4624_v12 = vadd.f32 %v4623_v56, %v4622_v23  ;;  %v4630_v14 = vrot.slane %v4629_v18, 2  ;;  %v4637_v20 = vrot.slane %v4636_v55, 2 }
 0x27c   : > { %v4650_v33 = vadd.f32 %v4649_v6, %v4648_v48  ;;  %v4657_v4 = vadd.f32 %v4656_v50, %v4655_v29  ;;  %v4663_v59 = vrot.slane %v4662_v19, 4  ;;  %v4644_v25 = vrot.slane %v4643_v57, 2 }
 0x27d   : > { %v4619_v53 = vadd.f32 %v4618_v61, %v4617_v60  ;;  %v4625_v27 = vrot.slane %v4624_v12, 1  ;;  %v4631_v10 = vadd.f32 %v4630_v14, %v4629_v18  ;;  %v4638_v26 = vadd.f32 %v4637_v20, %v4636_v55 }
 0x27e   : > { %v4651_v7 = vrot.slane %v4650_v33, 2  ;;  %v4658_v0 = vrot.slane %v4657_v4, 2  ;;  %v4664_v5 = vadd.f32 %v4663_v59, %v4662_v19  ;;  %v8578_v52 = vrot.slane %v7806_v47, 6 }
 0x27f   : > { %v4626_v46 = vadd.f32 %v4625_v27, %v4624_v12  ;;  %v4632_v24 = vrot.slane %v4631_v10, 1  ;;  %v4639_v51 = vrot.slane %v4638_v26, 1  ;;  %v4645_v56 = vadd.f32 %v4644_v25, %v4643_v57 }
 0x280   : > { %v4669_v23 = vsel %vm4367_vm15, %v8578_v52, 0.0  ;;  %v4652_v44 = vadd.f32 %v4651_v7, %v4650_v33  ;;  %v4659_v48 = vadd.f32 %v4658_v0, %v4657_v4  ;;  %v4665_v29 = vrot.slane %v4664_v5, 2 }
 0x281   : > { %v4633_v8 = vadd.f32 %v4632_v24, %v4631_v10  ;;  %v4640_v60 = vadd.f32 %v4639_v51, %v4638_v26  ;;  %v4670_v6 = vrot.slane %v4669_v23, 4  ;;  %v4676_v18 = vsel %vm4367_vm15, %v7810_v36, 0.0  ;;  %v2434_v24 = vpop.f32.mrf.mxu1  ;;  %v2567_v10 = vpop.f32.mrf.mxu2 }
 0x282   : > { %v4646_v55 = vrot.slane %v4645_v56, 1  ;;  %v4653_v50 = vrot.slane %v4652_v44, 1  ;;  %v4660_v19 = vrot.slane %v4659_v48, 1  ;;  %v4666_v61 = vadd.f32 %v4665_v29, %v4664_v5 }
 0x283   : > { %v4671_v12 = vadd.f32 %v4670_v6, %v4669_v23  ;;  %v4677_v14 = vrot.slane %v4676_v18, 4  ;;  %v8579_v47 = vrot.slane %v7810_v36, 2  ;;  %v8580_v57 = vrot.slane %v7810_v36, 4 }
 0x284   : > { %v4647_v51 = vadd.f32 %v4646_v55, %v4645_v56  ;;  %v4654_v4 = vadd.f32 %v4653_v50, %v4652_v44  ;;  %v4661_v59 = vadd.f32 %v4660_v19, %v4659_v48  ;;  %v4667_v27 = vrot.slane %v4666_v61, 1  ;;  %v3313_v50 = vpop.f32.mrf.mxu3 }
 0x285   : > { %v4683_v20 = vsel %vm4367_vm15, %v8579_v47, 0.0  ;;  %v4690_v33 = vsel %vm4367_vm15, %v8580_v57, 0.0  ;;  %v4672_v26 = vrot.slane %v4671_v12, 2  ;;  %v4678_v25 = vadd.f32 %v4677_v14, %v4676_v18  ;;  %v5530_v18 = vld [vmem:[%s8536_s5] sm:$0xff]  ;;  %v2150_v14 = vpop.permute.xlu1 %2149 }
 0x286   : > { %v4684_v7 = vrot.slane %v4683_v20, 4  ;;  %v4691_v0 = vrot.slane %v4690_v33, 4  ;;  %v4668_v5 = vadd.f32 %v4667_v27, %v4666_v61  ;;  %v8581_v52 = vrot.slane %v7810_v36, 6  ;;  %5209 = vmatpush.bf16.msrb.mxu0 %v5530_v18 }
 0x287   : > { %v4848_v29 = vmul.f32 %v7878_v1, %v7270_v31  ;;  %v4849_v6 = vmul.f32 %v7880_v49, %v7270_v31  ;;  %v4673_v56 = vadd.f32 %v4672_v26, %v4671_v12  ;;  %v4679_v44 = vrot.slane %v4678_v25, 2 }
 0x288   : > { %v4697_v23 = vsel %vm4367_vm15, %v8581_v52, 0.0  ;;  %v4685_v48 = vadd.f32 %v4684_v7, %v4683_v20  ;;  %v4692_v55 = vadd.f32 %v4691_v0, %v4690_v33  ;;  %v4850_v36 = vmul.f32 %v7890_v22, %v7270_v31 }
 0x289   : > { %v4698_v19 = vrot.slane %v4697_v23, 4  ;;  %v4851_v61 = vmul.f32 %v4619_v53, %v7270_v31  ;;  %v4852_v1 = vmul.f32 %v4626_v46, %v7270_v31  ;;  %v4674_v47 = vrot.slane %v4673_v56, 1 }
 0x28a   : > { %v4680_v49 = vadd.f32 %v4679_v44, %v4678_v25  ;;  %v4686_v12 = vrot.slane %v4685_v48, 2  ;;  %v4693_v57 = vrot.slane %v4692_v55, 2  ;;  %v4853_v33 = vmul.f32 %v4633_v8, %v7270_v31 }
 0x28b   : > { %v4699_v20 = vadd.f32 %v4698_v19, %v4697_v23  ;;  %v4854_v27 = vmul.f32 %v4640_v60, %v7270_v31  ;;  %v4855_v26 = vmul.f32 %v4647_v51, %v7270_v31  ;;  %v4675_v7 = vadd.f32 %v4674_v47, %v4673_v56  ;;  %v2436_v19 = vpop.f32.mrf.mxu1 }
 0x28c   : > { %v4681_v0 = vrot.slane %v4680_v49, 1  ;;  %v4687_v22 = vadd.f32 %v4686_v12, %v4685_v48  ;;  %v4694_v52 = vadd.f32 %v4693_v57, %v4692_v55  ;;  %v4856_v46 = vmul.f32 %v4654_v4, %v7270_v31  ;;  %v2569_v12 = vpop.f32.mrf.mxu2 }
 0x28d   : > { %v4700_v53 = vrot.slane %v4699_v20, 2  ;;  %v4857_v16 = vmul.f32 %v4661_v59, %v7270_v31  ;;  %v4858_v25 = vmul.f32 %v4668_v5, %v7270_v31  ;;  %v4859_v8 = vmul.f32 %v4675_v7, %v7270_v31  ;;  %v8582_v7 = vld [vmem:[#allocation14_spill] sm:$0xff] }
 0x28e   : > { %v4682_v44 = vadd.f32 %v4681_v0, %v4680_v49  ;;  %v4688_v18 = vrot.slane %v4687_v22, 1  ;;  %v4695_v23 = vrot.slane %v4694_v52, 1  ;;  %v5107_v51 = vsel %vm4944_vm1, %v4849_v6, %v4848_v29  ;;  %v3315_v6 = vpop.f32.mrf.mxu3 }
 0x28f   : > { %v4701_v60 = vadd.f32 %v4700_v53, %v4699_v20  ;;  %v5114_v56 = vsel %vm4944_vm1, %v4857_v16, %v4856_v46  ;;  %v2568_v48 = vadd.f32 %v2567_v10, %v2434_v24  ;;  %v5108_v59 = vsel %vm4946_vm2, %v4850_v36, %v5107_v51  ;;  %v1668_v53 = vpop.permute.xlu1 %1667 }
 0x290   : > { %v4689_v55 = vadd.f32 %v4688_v18, %v4687_v22  ;;  %v4696_v47 = vadd.f32 %v4695_v23, %v4694_v52  ;;  %v4860_v4 = vmul.f32 %v4682_v44, %v7270_v31  ;;  %v5109_v49 = vsel %vm4948_vm3, %v4851_v61, %v5108_v59  ;;  %v3161_v52 = vpop.permute.xlu0 %3160 }
 0x291   : > { %v4702_v5 = vrot.slane %v4701_v60, 1  ;;  %v5115_v57 = vsel %vm4946_vm2, %v4858_v25, %v5114_v56  ;;  %v2310_v20 = vsel %vm1669_vm11, %v8582_v7, %v2150_v14  ;;  %v5110_v24 = vsel %vm4950_vm4, %v4852_v1, %v5109_v49 }
 0x292   : > { %v4861_v29 = vmul.f32 %v4689_v55, %v7270_v31  ;;  %v4862_v16 = vmul.f32 %v4696_v47, %v7270_v31  ;;  %v5116_v10 = vsel %vm4948_vm3, %v4859_v8, %v5115_v57  ;;  %v5111_v36 = vsel %vm4952_vm5, %v4853_v33, %v5110_v24  ;;  %v7973_v8 = vld [vmem:[%s8535_s4] ss:$0 sm:$0xff] }
 0x293   : > { %v4703_v0 = vadd.f32 %v4702_v5, %v4701_v60  ;;  %v5117_v22 = vsel %vm4950_vm4, %v4860_v4, %v5116_v10  ;;  %v2342_v61 = vsel %vm424_vm0, %v2310_v20, %v7743_v34  ;;  %v5112_v14 = vsel %vm4954_vm6, %v4854_v27, %v5111_v36  ;;  %v2439_v4 = vpop.f32.mrf.mxu1 }
 0x294   : > { %v5118_v46 = vsel %vm4952_vm5, %v4861_v29, %v5117_v22  ;;  %5451 = vmatmul.msk.bf16.gmra.mxu1 %vm2358_vm13, %v2342_v61  ;;  %v3375_v1 = vadd.f32 %v3313_v50, %v2568_v48  ;;  %v3225_v25 = vsel %vm424_vm0, %v7787_v38, %v3161_v52  ;;  %v7958_v33 = vmul.f32 %v7865_v30, %v7270_v31 }
 0x295   : > { %v4863_v44 = vmul.f32 %v4703_v0, %v7270_v31  ;;  %v5113_v34 = vsel %vm4956_vm7, %v4855_v26, %v5112_v14  ;;  %v5119_v18 = vsel %vm4954_vm6, %v4862_v16, %v5118_v46  ;;  %5495 = vmatmul.msk.bf16.gmra.mxu3 %vm2358_vm13, %v3225_v25  ;;  %v3797_v27 = vrot.slane %v7868_v62, 2 }
 0x296   : > { %v1733_v50 = vsel %vm424_vm0, %v7830_v9, %v1668_v53  ;;  %v3687_v23 = vrot.slane %v7820_v28, 1  ;;  %v3692_v38 = vrot.slane %v7654_v41, 2  ;;  %v7976_v26 = vadd.f32 %v7973_v8, %v3375_v1  ;;  %v3318_v22 = vpop.f32.mrf.mxu3 }
 0x297   : > { %v5120_v30 = vsel %vm4956_vm7, %v4863_v44, %v5119_v18  ;;  %v2570_v60 = vadd.f32 %v2569_v12, %v2436_v19  ;;  %5472 = vmatmul.msk.bf16.gmra.mxu2 %vm2358_vm13, %v1733_v50  ;;  %v8583_v9 = vrot.slane %v7641_v45, 4  ;;  %v7984_v56 = vmul.f32 %v7870_v35, %v7270_v31 }
 0x298   : > { %v3792_v48 = vrot.slane %v7876_v11, 1  ;;  %v5786_v55 = vpack.i.bf16 %v5120_v30, %v5113_v34  ;;  %v3693_v47 = vadd.f32 %v3692_v38, %v7654_v41  ;;  %v8584_v19 = vrot.slane %v7753_v39, 2  ;;  %v5778_v44 = vpop.permute.xlu0 %5777  ;;  %v2152_v30 = vpop.permute.xlu1 %2151 }
 0x299   : > { %v3698_v51 = vadd.f32 %v8583_v9, %v7641_v45  ;;  %v3376_v59 = vadd.f32 %v3315_v6, %v2570_v60  ;;  %v3748_v49 = vrot.slane %v7766_v32, 2  ;;  %v2572_v45 = vpop.f32.mrf.mxu2  ;;  %v3688_v35 = vadd.f32 %v3687_v23, %v7820_v28 }
 0x29a   : > { %v3742_v12 = vadd.f32 %v8584_v19, %v7753_v39  ;;  %5787 = vrot.lane.b32.xlu2 %v5786_v55, %s5986_s12  ;;  %v3694_v57 = vrot.slane %v3693_v47, 1  ;;  %v8585_v7 = vrot.slane %v7759_v15, 1  ;;  %v8586_v41 = vrot.slane %v7751_v21, 4 }
 0x29b   : > { %v3699_v5 = vrot.slane %v3698_v51, 2  ;;  %v3443_v16 = vmax.f32 %v7976_v26, 0.0  ;;  %v3749_v10 = vadd.f32 %v3748_v49, %v7766_v32  ;;  %v4097_v28 = vmul.f32 %v7663_v63, %v7270_v31 }
 0x29c   : > { %v3737_v20 = vadd.f32 %v8585_v7, %v7759_v15  ;;  %v3754_v29 = vadd.f32 %v8586_v41, %v7751_v21  ;;  %v3743_v39 = vrot.slane %v3742_v12, 1  ;;  %v3695_v6 = vadd.f32 %v3694_v57, %v3693_v47  ;;  %v2280_v47 = vpop.permute.xlu2 %2279 }
 0x29d   : > { %v3700_v24 = vadd.f32 %v3699_v5, %v3698_v51  ;;  %v4098_v36 = vmul.f32 %v7668_v17, %v7270_v31  ;;  %v3750_v52 = vrot.slane %v3749_v10, 1  ;;  %v4099_v21 = vmul.f32 %v7815_v3, %v7270_v31 }
 0x29e   : > { %v3755_v0 = vrot.slane %v3754_v29, 2  ;;  %v3744_v61 = vadd.f32 %v3743_v39, %v3742_v12  ;;  %v4100_v14 = vmul.f32 %v3688_v35, %v7270_v31  ;;  %v4101_v32 = vmul.f32 %v3695_v6, %v7270_v31 }
 0x29f   : > { %v3701_v15 = vrot.slane %v3700_v24, 1  ;;  %v4105_v46 = vmul.f32 %v7774_v13, %v7270_v31  ;;  %v3751_v63 = vadd.f32 %v3750_v52, %v3749_v10  ;;  %v4106_v17 = vmul.f32 %v7776_v42, %v7270_v31 }
 0x2a0   : > { %v3756_v53 = vadd.f32 %v3755_v0, %v3754_v29  ;;  %v4107_v25 = vmul.f32 %v3737_v20, %v7270_v31  ;;  %v4108_v18 = vmul.f32 %v3744_v61, %v7270_v31  ;;  %v4945_v3 = vsel %vm4944_vm1, %v7684_v54, %v7671_v43  ;;  %v2441_v43 = vpop.f32.mrf.mxu1  ;;  %v8588_v61 = vld [vmem:[#allocation10_spill] sm:$0xff] }
 0x2a1   : > { %v3702_v1 = vadd.f32 %v3701_v15, %v3700_v24  ;;  %v4958_v50 = vsel %vm4944_vm1, %v7783_v37, %v7779_v58  ;;  %v4109_v23 = vmul.f32 %v3751_v63, %v7270_v31  ;;  %v4947_v42 = vsel %vm4946_vm2, %v4097_v28, %v4945_v3  ;;  %v2574_v35 = vpop.f32.mrf.mxu2 }
 0x2a2   : > { %v3757_v34 = vrot.slane %v3756_v53, 1  ;;  %v4959_v38 = vsel %vm4946_vm2, %v4105_v46, %v4958_v50  ;;  %v4949_v60 = vsel %vm4948_vm3, %v4098_v36, %v4947_v42  ;;  %v5780_v51 = vunpack.i.h.bf16 %v5778_v44 }
 0x2a3   : > { %v4102_v13 = vmul.f32 %v3702_v1, %v7270_v31  ;;  %v4960_v9 = vsel %vm4948_vm3, %v4106_v17, %v4959_v38  ;;  %v4951_v54 = vsel %vm4950_vm4, %v4099_v21, %v4949_v60  ;;  %v5779_v37 = vunpack.i.l.bf16 %v5778_v44  ;;  %v8589_v21 = vld [vmem:[#allocation12_spill] sm:$0xff] }
 0x2a4   : > { %v3758_v26 = vadd.f32 %v3757_v34, %v3756_v53  ;;  %v4961_v58 = vsel %vm4950_vm4, %v4107_v25, %v4960_v9  ;;  %v2573_v55 = vadd.f32 %v2572_v45, %v2439_v4  ;;  %v4953_v19 = vsel %vm4952_vm5, %v4100_v14, %v4951_v54 }
 0x2a5   : > { %v4962_v12 = vsel %vm4952_vm5, %v4108_v18, %v4961_v58  ;;  %v2312_v49 = vsel %vm1669_vm11, %v7713_v2, %v2152_v30  ;;  %v4955_v57 = vsel %vm4954_vm6, %v4101_v32, %v4953_v19  ;;  %v3481_v4 = vsel %vm1669_vm11, %v3443_v16, 0.0  ;;  %v3320_v2 = vpop.f32.mrf.mxu3  ;;  %v8591_v32 = vld [vmem:[#allocation11_spill] sm:$0xff] }
 0x2a6   : > { %v4110_v5 = vmul.f32 %v3758_v26, %v7270_v31  ;;  %v4963_v7 = vsel %vm4954_vm6, %v4109_v23, %v4962_v12  ;;  %v2344_v20 = vsel %vm424_vm0, %v2312_v49, %v2280_v47  ;;  %v3377_v41 = vadd.f32 %v3318_v22, %v2573_v55 }
 0x2a7   : > { %v8040_v45 = vadd.f32 %v7973_v8, %v3376_v59  ;;  %v4957_v29 = vsel %vm4956_vm7, %v4102_v13, %v4955_v57  ;;  %5452 = vmatmul.msk.bf16.gmra.mxu1 %vm2358_vm13, %v2344_v20  ;;  %v2575_v0 = vadd.f32 %v2574_v35, %v2441_v43  ;;  %v8587_v16 = vrot.slane %v7857_v40, 1 }
 0x2a8   : > { %v4964_v24 = vsel %vm4956_vm7, %v4110_v5, %v4963_v7  ;;  %v5159_v10 = vsel %vm1669_vm11, %v4957_v29, %v5779_v37  ;;  %v3413_v6 = vadd.f32 %v7973_v8, %v3377_v41  ;;  %v3793_v36 = vadd.f32 %v3792_v48, %v7876_v11  ;;  %v2444_v3 = vpop.f32.mrf.mxu1 }
 0x2a9   : > { %v5160_v39 = vsel %vm1669_vm11, %v4964_v24, %v5780_v51  ;;  %v3786_v59 = vadd.f32 %v8587_v16, %v7857_v40  ;;  %v3798_v22 = vadd.f32 %v3797_v27, %v7868_v62  ;;  %v3804_v52 = vrot.slane %v8588_v61, 2 }
 0x2aa   : > { %v5167_v28 = vpack.c.bf16 %v5160_v39, %v5159_v10  ;;  %v3445_v15 = vmax.f32 %v3413_v6, 0.0  ;;  %v8590_v53 = vrot.slane %v8589_v21, 4  ;;  %v4113_v46 = vmul.f32 %v8591_v32, %v7270_v31 }
 0x2ab   : > { %v3799_v40 = vrot.slane %v3798_v22, 1  ;;  %v4114_v1 = vmul.f32 %v3786_v59, %v7270_v31  ;;  %v4115_v11 = vmul.f32 %v3793_v36, %v7270_v31  ;;  %v4965_v62 = vsel %vm4944_vm1, %v7984_v56, %v7958_v33  ;;  %v2577_v56 = vpop.f32.mrf.mxu2  ;;  %v8092_v36 = vpop.permute.xlu1 %5782 }
 0x2ac   : > { %v3810_v14 = vadd.f32 %v8590_v53, %v8589_v21  ;;  %5500 = vmatmul.msk.bf16.vlgmr.msrb.gmra.mxu0 %vm2358_vm13, %v5167_v28  ;;  %v3482_v27 = vsel %vm1669_vm11, %v3445_v15, 0.0  ;;  %v3805_v48 = vadd.f32 %v3804_v52, %v8588_v61  ;;  %v4966_v17 = vsel %vm4946_vm2, %v4113_v46, %v4965_v62  ;;  %v324_v15 = vld [vmem:[%s6120_s16 + $0x60] sm:$0xff]  }
 0x2ad   : > { %v3483_v25 = vadd.f32 %v3482_v27, %v3481_v4  ;;  %v3800_v44 = vadd.f32 %v3799_v40, %v3798_v22  ;;  %v4967_v34 = vsel %vm4948_vm3, %v4114_v1, %v4966_v17  ;;  %v3378_v18 = vadd.f32 %v3320_v2, %v2575_v0  ;;  %v3323_v37 = vpop.f32.mrf.mxu3 }
 0x2ae   : > { %v3811_v63 = vrot.slane %v3810_v14, 2  ;;  %v3806_v50 = vrot.slane %v3805_v48, 1  ;;  %v4968_v23 = vsel %vm4950_vm4, %v4115_v11, %v4967_v34  ;;  %v3444_v30 = vmax.f32 %v8040_v45, 0.0 }
 0x2af   : > { %v3524_v42 = vmul.f32 %v7270_v31, %v3483_v25  ;;  %v4116_v33 = vmul.f32 %v3800_v44, %v7270_v31  ;;  %v3414_v38 = vadd.f32 %v7973_v8, %v3378_v18  ;;  %v2578_v9 = vadd.f32 %v2577_v56, %v2444_v3  ;;  %v326_v18 = vld [vmem:[%s6120_s16 + $0x68] sm:$0xff]   ;;  %v328_v3 = vld [vmem:[%s6120_s16 + $0x70] sm:$0xff]  }
 0x2b0   : > { %v3812_v13 = vadd.f32 %v3811_v63, %v3810_v14  ;;  %v3807_v26 = vadd.f32 %v3806_v50, %v3805_v48  ;;  %v3484_v2 = vsel %vm1669_vm11, %v3444_v30, 0.0  ;;  %v2446_v1 = vpop.f32.mrf.mxu1  ;;  %v4183_v27 = vunpack.c.l.bf16 %v324_v15 }
 0x2b1   : > { %v3568_v51 = vrot.slane %v3524_v42, 2  ;;  %v3569_v43 = vrot.slane %v3524_v42, 4  ;;  %v3570_v54 = vrot.slane %v3524_v42, 6  ;;  %v3815_v58 = vsel %vm3646_vm8, %v3524_v42, 0.0 }
 0x2b2   : > { %v3813_v60 = vrot.slane %v3812_v13, 1  ;;  %v3816_v55 = vrot.slane %v3815_v58, 4  ;;  %v4117_v5 = vmul.f32 %v3807_v26, %v7270_v31  ;;  %v4969_v19 = vsel %vm4952_vm5, %v4116_v33, %v4968_v23  ;;  %v330_v26 = vld [vmem:[%s6120_s16 + $0x78] sm:$0xff]   ;;  %s5928_s16 = scalar_lea.hbm %s5927_s28, 64 }
 0x2b3   : > { %v3822_v12 = vsel %vm3646_vm8, %v3568_v51, 0.0  ;;  %v3829_v49 = vsel %vm3646_vm8, %v3569_v43, 0.0  ;;  %v3836_v35 = vsel %vm3646_vm8, %v3570_v54, 0.0  ;;  %v3446_v57 = vmax.f32 %v3414_v38, 0.0  ;;  %v2579_v34 = vpop.f32.mrf.mxu2  ;;  %p5929_p6 = scmp.ne.s32.totalorder %s5927_s28, %s5928_s16  ;;  %p5934_p1 = scmp.lt.s32.totalorder %s5932_s15, %s5928_s16 }
 0x2b4   : > { %v3814_v47 = vadd.f32 %v3813_v60, %v3812_v13  ;;  %v3817_v7 = vadd.f32 %v3816_v55, %v3815_v58  ;;  %v3823_v20 = vrot.slane %v3822_v12, 4  ;;  %v3830_v41 = vrot.slane %v3829_v49, 4 }
 0x2b5   : > { %v3379_v4 = vadd.f32 %v3323_v37, %v2578_v9  ;;  %v4970_v29 = vsel %vm4954_vm6, %v4117_v5, %v4969_v19  ;;  %v3485_v24 = vsel %vm1669_vm11, %v3446_v57, 0.0  ;;  %v3837_v6 = vrot.slane %v3836_v35, 4  ;;  %p5930_p9 = pnand %p5929_p6, %p6080_p11  ;;  %p5935_p3 = por %p5934_p1, %p5933_p0 }
 0x2b6   : > { %v4118_v45 = vmul.f32 %v3814_v47, %v7270_v31  ;;  %v3818_v39 = vrot.slane %v3817_v7, 2  ;;  %v3824_v10 = vadd.f32 %v3823_v20, %v3822_v12  ;;  %v3486_v28 = vadd.f32 %v3485_v24, %v3484_v2 }
 0x2b7   : > { %v3831_v16 = vadd.f32 %v3830_v41, %v3829_v49  ;;  %v3415_v59 = vadd.f32 %v7973_v8, %v3379_v4  ;;  %v3838_v21 = vadd.f32 %v3837_v6, %v3836_v35  ;;  %v4184_v48 = vunpack.c.h.bf16 %v324_v15  ;;  %p5931_p13 = pneg %p5930_p9 }
 0x2b8   : > { %v8089_v0 = vsel %vm4956_vm7, %v4118_v45, %v4970_v29  ;;  %v3525_v22 = vmul.f32 %v7270_v31, %v3486_v28  ;;  %v3819_v61 = vadd.f32 %v3818_v39, %v3817_v7  ;;  %v3825_v52 = vrot.slane %v3824_v10, 2 }
 0x2b9   : > { %v3832_v11 = vrot.slane %v3831_v16, 2  ;;  %v3447_v62 = vmax.f32 %v3415_v59, 0.0  ;;  %v3839_v23 = vrot.slane %v3838_v21, 2  ;;  %v8103_v42 = vadd.f32 %v2579_v34, %v2446_v1  ;;  %p5936_p4 = pnand %p5935_p3, %p5931_p13 }
 0x2ba   : > { %v3571_v14 = vrot.slane %v3525_v22, 2  ;;  %v3572_v32 = vrot.slane %v3525_v22, 4  ;;  %v3573_v46 = vrot.slane %v3525_v22, 6  ;;  %v3843_v40 = vsel %vm3646_vm8, %v3525_v22, 0.0 }
 0x2bb   : > { %v3844_v63 = vrot.slane %v3843_v40, 4  ;;  %v3820_v50 = vrot.slane %v3819_v61, 1  ;;  %v3826_v13 = vadd.f32 %v3825_v52, %v3824_v10  ;;  %v8107_v60 = vsel %vm1669_vm11, %v3447_v62, 0.0 }
 0x2bc   : > { %v3850_v17 = vsel %vm3646_vm8, %v3571_v14, 0.0  ;;  %v3857_v25 = vsel %vm3646_vm8, %v3572_v32, 0.0  ;;  %v3864_v44 = vsel %vm3646_vm8, %v3573_v46, 0.0  ;;  %v4185_v9 = vunpack.c.l.bf16 %v326_v18 }
 0x2bd   : > { %v3845_v33 = vadd.f32 %v3844_v63, %v3843_v40  ;;  %v3851_v56 = vrot.slane %v3850_v17, 4  ;;  %v3858_v38 = vrot.slane %v3857_v25, 4  ;;  %v3865_v30 = vrot.slane %v3864_v44, 4 }
 0x2be   : > { %v4186_v51 = vunpack.c.h.bf16 %v326_v18  ;;  %v4187_v43 = vunpack.c.l.bf16 %v328_v3  ;;  %v8109_v54 = vadd.f32 %v3832_v11, %v3831_v16  ;;  %v4188_v47 = vunpack.c.h.bf16 %v328_v3 }
 0x2bf   : > { %v3846_v58 = vrot.slane %v3845_v33, 2  ;;  %v3852_v37 = vadd.f32 %v3851_v56, %v3850_v17  ;;  %v3859_v55 = vadd.f32 %v3858_v38, %v3857_v25  ;;  %v4189_v5 = vunpack.c.l.bf16 %v330_v26 }
 0x2c0   : > { %v4190_v19 = vunpack.c.h.bf16 %v330_v26  ;;  %v4227_v12 = vsel %vm424_vm0, %v4183_v27, 0.0  ;;  %v8112_v49 = vadd.f32 %v3820_v50, %v3819_v61  ;;  %v3827_v35 = vrot.slane %v3826_v13, 1 }
 0x2c1   : > { %v8114_v57 = vadd.f32 %v3839_v23, %v3838_v21  ;;  %v8116_v7 = vadd.f32 %v3865_v30, %v3864_v44  ;;  %v4228_v20 = vsel %vm424_vm0, %v4185_v9, 0.0  ;;  %v4230_v41 = vsel %vm424_vm0, %v4184_v48, 0.0 }
 0x2c2   : > { %v4231_v4 = vsel %vm424_vm0, %v4186_v51, 0.0  ;;  %v4233_v45 = vsel %vm424_vm0, %v4187_v43, 0.0  ;;  %v8122_v29 = vadd.f32 %v3846_v58, %v3845_v33  ;;  %v3853_v24 = vrot.slane %v3852_v37, 2 }
 0x2c3   : > { %v3860_v2 = vrot.slane %v3859_v55, 2  ;;  %v4229_v39 = vadd.f32 %v4228_v20, %v4227_v12  ;;  %v4232_v10 = vadd.f32 %v4231_v4, %v4230_v41  ;;  %v4234_v6 = vsel %vm424_vm0, %v4189_v5, 0.0 }
 0x2c4   : > { %v4236_v28 = vsel %vm424_vm0, %v4188_v47, 0.0  ;;  %v4237_v16 = vsel %vm424_vm0, %v4190_v19, 0.0  ;;  %v4235_v15 = vadd.f32 %v4234_v6, %v4233_v45  ;;  %v8129_v52 = vadd.f32 %v3827_v35, %v3826_v13 }
 0x2c5   : > { %v4238_v61 = vadd.f32 %v4237_v16, %v4236_v28  ;;  %v4251_v14 = vmul.f32 %v4229_v39, %v7270_v31  ;;  %v4252_v32 = vmul.f32 %v4232_v10, %v7270_v31  ;;  %v8135_v40 = vadd.f32 %v3853_v24, %v3852_v37 }
 0x2c6   : > { %v8138_v1 = vmul.f32 %v4235_v15, %v7270_v31  ;;  %v8143_v62 = vadd.f32 %v3860_v2, %v3859_v55  ;;  %vm5239_vm0 = vcmask 261120  }
 0x2c7   : > { %v8141_v11 = vmul.f32 %v4238_v61, %v7270_v31  ;;  %v4307_v27 = vrot.slane %v4251_v14, 2  ;;  %v4308_v48 = vrot.slane %v4251_v14, 4  ;;  %v4309_v63 = vrot.slane %v4251_v14, 6 }
 0x2c8   : > { %v4310_v17 = vrot.slane %v4252_v32, 2  ;;  %v4311_v25 = vrot.slane %v4252_v32, 4  ;;  %v4312_v44 = vrot.slane %v4252_v32, 6  ;;  %v4313_v34 = vrot.slane %v8138_v1, 2 }
 0x2c9   : > { %v4314_v18 = vrot.slane %v8138_v1, 4  ;;  %v4315_v3 = vrot.slane %v8138_v1, 6  ;;  %v4316_v50 = vrot.slane %v8141_v11, 2  ;;  %v4317_v13 = vrot.slane %v8141_v11, 4 }
 0x2ca   : > { %v4704_v23 = vsel %vm4367_vm15, %v4251_v14, 0.0  ;;  %v4711_v33 = vsel %vm4367_vm15, %v4307_v27, 0.0  ;;  %v4718_v56 = vsel %vm4367_vm15, %v4308_v48, 0.0  ;;  %v4725_v38 = vsel %vm4367_vm15, %v4309_v63, 0.0 }
 0x2cb   : > { %v4705_v30 = vrot.slane %v4704_v23, 4  ;;  %v4712_v26 = vrot.slane %v4711_v33, 4  ;;  %v4719_v9 = vrot.slane %v4718_v56, 4  ;;  %v4726_v51 = vrot.slane %v4725_v38, 4 }
 0x2cc   : > { %v4732_v43 = vsel %vm4367_vm15, %v4252_v32, 0.0  ;;  %v4739_v58 = vsel %vm4367_vm15, %v4310_v17, 0.0  ;;  %v4746_v37 = vsel %vm4367_vm15, %v4311_v25, 0.0  ;;  %v4753_v55 = vsel %vm4367_vm15, %v4312_v44, 0.0 }
 0x2cd   : > { %v4706_v47 = vadd.f32 %v4705_v30, %v4704_v23  ;;  %v4713_v5 = vadd.f32 %v4712_v26, %v4711_v33  ;;  %v4720_v19 = vadd.f32 %v4719_v9, %v4718_v56  ;;  %v4727_v12 = vadd.f32 %v4726_v51, %v4725_v38  ;;  %v8158_v56 = vpop.f32.mrf.mxu2  ;;  %v8160_v38 = vpop.f32.mrf.mxu3 }
 0x2ce   : > { %v4733_v35 = vrot.slane %v4732_v43, 4  ;;  %v4740_v20 = vrot.slane %v4739_v58, 4  ;;  %v4747_v41 = vrot.slane %v4746_v37, 4  ;;  %v4754_v4 = vrot.slane %v4753_v55, 4 }
 0x2cf   : > { %v4707_v45 = vrot.slane %v4706_v47, 2  ;;  %v4714_v24 = vrot.slane %v4713_v5, 2  ;;  %v4721_v2 = vrot.slane %v4720_v19, 2  ;;  %v4728_v39 = vrot.slane %v4727_v12, 2 }
 0x2d0   : > { %v4734_v10 = vadd.f32 %v4733_v35, %v4732_v43  ;;  %v4741_v6 = vadd.f32 %v4740_v20, %v4739_v58  ;;  %v4748_v28 = vadd.f32 %v4747_v41, %v4746_v37  ;;  %v4755_v16 = vadd.f32 %v4754_v4, %v4753_v55 }
 0x2d1   : > { %v4708_v15 = vadd.f32 %v4707_v45, %v4706_v47  ;;  %v4715_v61 = vadd.f32 %v4714_v24, %v4713_v5  ;;  %v4722_v14 = vadd.f32 %v4721_v2, %v4720_v19  ;;  %v4729_v32 = vadd.f32 %v4728_v39, %v4727_v12 }
 0x2d2   : > { %v4735_v27 = vrot.slane %v4734_v10, 2  ;;  %v4742_v48 = vrot.slane %v4741_v6, 2  ;;  %v4749_v63 = vrot.slane %v4748_v28, 2  ;;  %v4756_v17 = vrot.slane %v4755_v16, 2 }
 0x2d3   : > { %v4709_v25 = vrot.slane %v4708_v15, 1  ;;  %v4716_v44 = vrot.slane %v4715_v61, 1  ;;  %v4723_v23 = vrot.slane %v4722_v14, 1  ;;  %v4730_v33 = vrot.slane %v4729_v32, 1 }
 0x2d4   : > { %v4736_v30 = vadd.f32 %v4735_v27, %v4734_v10  ;;  %v4743_v26 = vadd.f32 %v4742_v48, %v4741_v6  ;;  %v4750_v9 = vadd.f32 %v4749_v63, %v4748_v28  ;;  %v8162_v51 = vadd.f32 %v4756_v17, %v4755_v16 }
 0x2d5   : > { %v4318_v43 = vrot.slane %v8141_v11, 6  ;;  %v8165_v58 = vadd.f32 %v4709_v25, %v4708_v15  ;;  %v8167_v37 = vadd.f32 %v4716_v44, %v4715_v61  ;;  %v8169_v55 = vadd.f32 %v4723_v23, %v4722_v14  ;;  %v8194_v15 = vpop.f32.mrf.mxu1  ;;  %v8196_v44 = vpop.f32.mrf.mxu2 }
 0x2d6   : > { %v8171_v47 = vadd.f32 %v4730_v33, %v4729_v32  ;;  %v4737_v5 = vrot.slane %v4736_v30, 1  ;;  %v4744_v19 = vrot.slane %v4743_v26, 1  ;;  %v4751_v12 = vrot.slane %v4750_v9, 1  ;;  %v8198_v23 = vpop.f32.mrf.mxu3 }
 0x2d7   : > { %v4760_v35 = vsel %vm4367_vm15, %v8138_v1, 0.0  ;;  %v4767_v20 = vsel %vm4367_vm15, %v4313_v34, 0.0  ;;  %v4774_v41 = vsel %vm4367_vm15, %v4314_v18, 0.0  ;;  %v4781_v4 = vsel %vm4367_vm15, %v4315_v3, 0.0 }
 0x2d8   : > { %v8178_v45 = vadd.f32 %v4737_v5, %v4736_v30  ;;  %v8180_v24 = vadd.f32 %v4744_v19, %v4743_v26  ;;  %v8182_v2 = vadd.f32 %v4751_v12, %v4750_v9  ;;  %v4758_v39 = vrot.slane %v8162_v51, 1 }
 0x2d9   : > { %v4761_v10 = vrot.slane %v4760_v35, 4  ;;  %v4768_v6 = vrot.slane %v4767_v20, 4  ;;  %v4775_v28 = vrot.slane %v4774_v41, 4  ;;  %v4782_v16 = vrot.slane %v4781_v4, 4 }
 0x2da   : > { %v4788_v1 = vsel %vm4367_vm15, %v8141_v11, 0.0  ;;  %v4795_v34 = vsel %vm4367_vm15, %v4316_v50, 0.0  ;;  %v4802_v18 = vsel %vm4367_vm15, %v4317_v13, 0.0  ;;  %v4809_v3 = vsel %vm4367_vm15, %v4318_v43, 0.0 }
 0x2db   : > { %v4762_v61 = vadd.f32 %v4761_v10, %v4760_v35  ;;  %v4769_v14 = vadd.f32 %v4768_v6, %v4767_v20  ;;  %v4776_v32 = vadd.f32 %v4775_v28, %v4774_v41  ;;  %v4783_v27 = vadd.f32 %v4782_v16, %v4781_v4 }
 0x2dc   : > { %v4789_v48 = vrot.slane %v4788_v1, 4  ;;  %v4796_v63 = vrot.slane %v4795_v34, 4  ;;  %v4803_v17 = vrot.slane %v4802_v18, 4  ;;  %v4810_v25 = vrot.slane %v4809_v3, 4 }
 0x2dd   : > { %v4763_v50 = vrot.slane %v4762_v61, 2  ;;  %v4770_v11 = vrot.slane %v4769_v14, 2  ;;  %v4777_v33 = vrot.slane %v4776_v32, 2  ;;  %v4784_v13 = vrot.slane %v4783_v27, 2 }
 0x2de   : > { %v4790_v30 = vadd.f32 %v4789_v48, %v4788_v1  ;;  %v4797_v26 = vadd.f32 %v4796_v63, %v4795_v34  ;;  %v4804_v9 = vadd.f32 %v4803_v17, %v4802_v18  ;;  %v4811_v43 = vadd.f32 %v4810_v25, %v4809_v3  ;;  %v2451_v48 = vpop.f32.mrf.mxu1 }
 0x2df   : > { %v4764_v5 = vadd.f32 %v4763_v50, %v4762_v61  ;;  %v4771_v19 = vadd.f32 %v4770_v11, %v4769_v14  ;;  %v4778_v12 = vadd.f32 %v4777_v33, %v4776_v32  ;;  %v4785_v35 = vadd.f32 %v4784_v13, %v4783_v27 }
 0x2e0   : > { %v4791_v20 = vrot.slane %v4790_v30, 2  ;;  %v4798_v41 = vrot.slane %v4797_v26, 2  ;;  %v4805_v4 = vrot.slane %v4804_v9, 2  ;;  %v4812_v10 = vrot.slane %v4811_v43, 2 }
 0x2e1   : > { %v4765_v6 = vrot.slane %v4764_v5, 1  ;;  %v4772_v28 = vrot.slane %v4771_v19, 1  ;;  %v4779_v16 = vrot.slane %v4778_v12, 1  ;;  %v4786_v53 = vrot.slane %v4785_v35, 1 }
 0x2e2   : > { %v4792_v21 = vadd.f32 %v4791_v20, %v4790_v30  ;;  %v4799_v46 = vadd.f32 %v4798_v41, %v4797_v26  ;;  %v4806_v22 = vadd.f32 %v4805_v4, %v4804_v9  ;;  %v4813_v59 = vadd.f32 %v4812_v10, %v4811_v43  ;;  %v8209_v30 = vpop.f32.mrf.mxu2  ;;  %v3330_v26 = vpop.f32.mrf.mxu3 }
 0x2e3   : > { %v4766_v1 = vadd.f32 %v4765_v6, %v4764_v5  ;;  %v4773_v34 = vadd.f32 %v4772_v28, %v4771_v19  ;;  %v4780_v18 = vadd.f32 %v4779_v16, %v4778_v12  ;;  %v4787_v3 = vadd.f32 %v4786_v53, %v4785_v35 }
 0x2e4   : > { %v4793_v61 = vrot.slane %v4792_v21, 1  ;;  %v4800_v14 = vrot.slane %v4799_v46, 1  ;;  %v4807_v32 = vrot.slane %v4806_v22, 1  ;;  %v4814_v27 = vrot.slane %v4813_v59, 1 }
 0x2e5   : > { %v4759_v63 = vadd.f32 %v4758_v39, %v8162_v51  ;;  %v4864_v17 = vmul.f32 %v8165_v58, %v7270_v31  ;;  %v4865_v25 = vmul.f32 %v8167_v37, %v7270_v31  ;;  %v4866_v50 = vmul.f32 %v8169_v55, %v7270_v31 }
 0x2e6   : > { %v4794_v11 = vadd.f32 %v4793_v61, %v4792_v21  ;;  %v4801_v33 = vadd.f32 %v4800_v14, %v4799_v46  ;;  %v4808_v13 = vadd.f32 %v4807_v32, %v4806_v22  ;;  %v4867_v53 = vmul.f32 %v8171_v47, %v7270_v31 }
 0x2e7   : > { %v4815_v9 = vadd.f32 %v4814_v27, %v4813_v59  ;;  %v4868_v51 = vmul.f32 %v8178_v45, %v7270_v31  ;;  %v4869_v58 = vmul.f32 %v8180_v24, %v7270_v31  ;;  %v4870_v37 = vmul.f32 %v8182_v2, %v7270_v31 }
 0x2e8   : > { %v4872_v21 = vmul.f32 %v4766_v1, %v7270_v31  ;;  %v4873_v22 = vmul.f32 %v4773_v34, %v7270_v31  ;;  %v4874_v46 = vmul.f32 %v4780_v18, %v7270_v31  ;;  %v4875_v55 = vmul.f32 %v4787_v3, %v7270_v31 }
 0x2e9   : > { %v4871_v47 = vmul.f32 %v4759_v63, %v7270_v31  ;;  %v4876_v59 = vmul.f32 %v4794_v11, %v7270_v31  ;;  %v4877_v45 = vmul.f32 %v4801_v33, %v7270_v31  ;;  %v4878_v39 = vmul.f32 %v4808_v13, %v7270_v31 }
 0x2ea   : > { %v5121_v24 = vsel %vm4944_vm1, %v4865_v25, %v4864_v17  ;;  %v5128_v2 = vsel %vm4944_vm1, %v4873_v22, %v4872_v21  ;;  %v3380_v43 = vadd.f32 %v8160_v38, %v8103_v42  ;;  %v2583_v5 = vadd.f32 %v8158_v56, %v8194_v15  ;;  %v2454_v42 = vpop.f32.mrf.mxu1  ;;  %v8245_v18 = vpop.f32.mrf.mxu2 }
 0x2eb   : > { %v4879_v19 = vmul.f32 %v4815_v9, %v7270_v31  ;;  %v5122_v12 = vsel %vm4946_vm2, %v4866_v50, %v5121_v24  ;;  %v5129_v35 = vsel %vm4946_vm2, %v4874_v46, %v5128_v2  ;;  %v2585_v20 = vadd.f32 %v8196_v44, %v2451_v48  ;;  %v8247_v3 = vpop.f32.mrf.mxu3 }
 0x2ec   : > { %v5123_v41 = vsel %vm4948_vm3, %v4867_v53, %v5122_v12  ;;  %v5130_v4 = vsel %vm4948_vm3, %v4875_v55, %v5129_v35  ;;  %v3416_v10 = vadd.f32 %v7973_v8, %v3380_v43  ;;  %v3381_v6 = vadd.f32 %v8198_v23, %v2583_v5 }
 0x2ed   : > { %v3855_v38 = vrot.slane %v8135_v40, 1  ;;  %v5124_v56 = vsel %vm4950_vm4, %v4868_v51, %v5123_v41  ;;  %v5131_v15 = vsel %vm4950_vm4, %v4876_v59, %v5130_v4  ;;  %v3382_v28 = vadd.f32 %v3330_v26, %v2585_v20 }
 0x2ee   : > { %v5125_v16 = vsel %vm4952_vm5, %v4869_v58, %v5124_v56  ;;  %v5132_v44 = vsel %vm4952_vm5, %v4877_v45, %v5131_v15  ;;  %v3448_v1 = vmax.f32 %v3416_v10, 0.0  ;;  %v3417_v34 = vadd.f32 %v7973_v8, %v3381_v6 }
 0x2ef   : > { %v5126_v23 = vsel %vm4954_vm6, %v4870_v37, %v5125_v16  ;;  %v5133_v61 = vsel %vm4954_vm6, %v4878_v39, %v5132_v44  ;;  %v3418_v14 = vadd.f32 %v7973_v8, %v3382_v28  ;;  %v3862_v32 = vrot.slane %v8143_v62, 1 }
 0x2f0   : > { %v8592_v27 = vrot.slane %v8109_v54, 1  ;;  %v5127_v63 = vsel %vm4956_vm7, %v4871_v47, %v5126_v23  ;;  %v5134_v17 = vsel %vm4956_vm7, %v4879_v19, %v5133_v61  ;;  %v3449_v25 = vmax.f32 %v3417_v34, 0.0 }
 0x2f1   : > { %v8593_v50 = vrot.slane %v8114_v57, 1  ;;  %v8594_v33 = vrot.slane %v8122_v29, 1  ;;  %v5791_v53 = vpack.i.bf16 %v5134_v17, %v5127_v63  ;;  %v3450_v26 = vmax.f32 %v3418_v14, 0.0 }
 0x2f2   : > { %v3835_v48 = vadd.f32 %v8592_v27, %v8109_v54  ;;  %v3488_v9 = vsel %vm1669_vm11, %v3449_v25, 0.0  ;;  %v3856_v51 = vadd.f32 %v3855_v38, %v8135_v40  ;;  %v3863_v54 = vadd.f32 %v3862_v32, %v8143_v62 }
 0x2f3   : > { %v3842_v11 = vadd.f32 %v8593_v50, %v8114_v57  ;;  %v3849_v13 = vadd.f32 %v8594_v33, %v8122_v29  ;;  %v8595_v58 = vrot.slane %v8116_v7, 2  ;;  %v5784_v21 = vunpack.i.l.bf16 %v8092_v36  ;;  %5792 = vrot.lane.b32.xlu0 %v5791_v53, %s5986_s12  ;;  %v3335_v43 = vpop.f32.mrf.mxu3 }
 0x2f4   : > { %v3490_v57 = vsel %vm1669_vm11, %v3448_v1, 0.0  ;;  %v3489_v29 = vadd.f32 %v3488_v9, %v8107_v60  ;;  %v3491_v22 = vsel %vm1669_vm11, %v3450_v26, 0.0  ;;  %v4119_v46 = vmul.f32 %v8112_v49, %v7270_v31 }
 0x2f5   : > { %v3868_v37 = vadd.f32 %v8595_v58, %v8116_v7  ;;  %v4120_v40 = vmul.f32 %v8129_v52, %v7270_v31  ;;  %v4121_v62 = vmul.f32 %v3835_v48, %v7270_v31  ;;  %v3492_v55 = vadd.f32 %v3491_v22, %v3490_v57  ;;  %v2456_v7 = vpop.f32.mrf.mxu1  ;;  %v8287_v52 = vpop.f32.mrf.mxu2 }
 0x2f6   : > { %v3526_v47 = vmul.f32 %v7270_v31, %v3489_v29  ;;  %v2588_v59 = vadd.f32 %v8209_v30, %v2454_v42  ;;  %v4122_v45 = vmul.f32 %v3842_v11, %v7270_v31  ;;  %v4123_v60 = vmul.f32 %v3849_v13, %v7270_v31 }
 0x2f7   : > { %v3527_v39 = vmul.f32 %v7270_v31, %v3492_v55  ;;  %v3869_v24 = vrot.slane %v3868_v37, 1  ;;  %v4124_v49 = vmul.f32 %v3856_v51, %v7270_v31  ;;  %v4125_v2 = vmul.f32 %v3863_v54, %v7270_v31 }
 0x2f8   : > { %v3574_v5 = vrot.slane %v3526_v47, 2  ;;  %v3575_v19 = vrot.slane %v3526_v47, 4  ;;  %v3576_v12 = vrot.slane %v3526_v47, 6  ;;  %v3871_v35 = vsel %vm3646_vm8, %v3526_v47, 0.0 }
 0x2f9   : > { %v3872_v30 = vrot.slane %v3871_v35, 4  ;;  %v3577_v20 = vrot.slane %v3527_v39, 2  ;;  %v3578_v41 = vrot.slane %v3527_v39, 4  ;;  %v4972_v4 = vsel %vm4944_vm1, %v4120_v40, %v4119_v46 }
 0x2fa   : > { %v3878_v10 = vsel %vm3646_vm8, %v3574_v5, 0.0  ;;  %v3885_v6 = vsel %vm3646_vm8, %v3575_v19, 0.0  ;;  %v3892_v42 = vsel %vm3646_vm8, %v3576_v12, 0.0  ;;  %v3899_v38 = vsel %vm3646_vm8, %v3527_v39, 0.0 }
 0x2fb   : > { %v3873_v56 = vadd.f32 %v3872_v30, %v3871_v35  ;;  %v3879_v15 = vrot.slane %v3878_v10, 4  ;;  %v3886_v28 = vrot.slane %v3885_v6, 4  ;;  %v3893_v16 = vrot.slane %v3892_v42, 4  ;;  %v3338_v9 = vpop.f32.mrf.mxu3 }
 0x2fc   : > { %v3579_v44 = vrot.slane %v3527_v39, 6  ;;  %v3900_v1 = vrot.slane %v3899_v38, 4  ;;  %v3906_v34 = vsel %vm3646_vm8, %v3577_v20, 0.0  ;;  %v3913_v23 = vsel %vm3646_vm8, %v3578_v41, 0.0 }
 0x2fd   : > { %v3874_v61 = vrot.slane %v3873_v56, 2  ;;  %v3880_v14 = vadd.f32 %v3879_v15, %v3878_v10  ;;  %v3887_v32 = vadd.f32 %v3886_v28, %v3885_v6  ;;  %v3894_v27 = vadd.f32 %v3893_v16, %v3892_v42  ;;  %v2459_v48 = vpop.f32.mrf.mxu1  ;;  %v2594_v26 = vpop.f32.mrf.mxu2 }
 0x2fe   : > { %v3901_v63 = vadd.f32 %v3900_v1, %v3899_v38  ;;  %v3907_v17 = vrot.slane %v3906_v34, 4  ;;  %v4973_v25 = vsel %vm4946_vm2, %v4121_v62, %v4972_v4  ;;  %v3383_v50 = vadd.f32 %v8247_v3, %v2588_v59 }
 0x2ff   : > { %v3875_v11 = vadd.f32 %v3874_v61, %v3873_v56  ;;  %v3881_v33 = vrot.slane %v3880_v14, 2  ;;  %v3888_v13 = vrot.slane %v3887_v32, 2  ;;  %v3895_v53 = vrot.slane %v3894_v27, 2 }
 0x300   : > { %v3902_v51 = vrot.slane %v3901_v63, 2  ;;  %v3914_v54 = vrot.slane %v3913_v23, 4  ;;  %v3920_v58 = vsel %vm3646_vm8, %v3579_v44, 0.0  ;;  %v3870_v57 = vadd.f32 %v3869_v24, %v3868_v37 }
 0x301   : > { %v3882_v29 = vadd.f32 %v3881_v33, %v3880_v14  ;;  %v3889_v22 = vadd.f32 %v3888_v13, %v3887_v32  ;;  %v3908_v46 = vadd.f32 %v3907_v17, %v3906_v34  ;;  %v4974_v40 = vsel %vm4948_vm3, %v4122_v45, %v4973_v25 }
 0x302   : > { %v3876_v55 = vrot.slane %v3875_v11, 1  ;;  %v4975_v62 = vsel %vm4950_vm4, %v4123_v60, %v4974_v40  ;;  %v3419_v3 = vadd.f32 %v7973_v8, %v3383_v50  ;;  %v2590_v47 = vadd.f32 %v8245_v18, %v2456_v7 }
 0x303   : > { %v3883_v59 = vrot.slane %v3882_v29, 1  ;;  %v3890_v39 = vrot.slane %v3889_v22, 1  ;;  %v3896_v5 = vadd.f32 %v3895_v53, %v3894_v27  ;;  %v3921_v19 = vrot.slane %v3920_v58, 4 }
 0x304   : > { %v3903_v12 = vadd.f32 %v3902_v51, %v3901_v63  ;;  %v3915_v35 = vadd.f32 %v3914_v54, %v3913_v23  ;;  %v4126_v37 = vmul.f32 %v3870_v57, %v7270_v31  ;;  %v4976_v24 = vsel %vm4952_vm5, %v4124_v49, %v4975_v62 }
 0x305   : > { %v3884_v30 = vadd.f32 %v3883_v59, %v3882_v29  ;;  %v3909_v20 = vrot.slane %v3908_v46, 2  ;;  %v4977_v45 = vsel %vm4954_vm6, %v4125_v2, %v4976_v24  ;;  %v3384_v41 = vadd.f32 %v3335_v43, %v2590_v47  ;;  %v2461_v60 = vpop.f32.mrf.mxu1  ;;  %v2597_v2 = vpop.f32.mrf.mxu2 }
 0x306   : > { %v3877_v4 = vadd.f32 %v3876_v55, %v3875_v11  ;;  %v3891_v10 = vadd.f32 %v3890_v39, %v3889_v22  ;;  %v4978_v18 = vsel %vm4956_vm7, %v4126_v37, %v4977_v45  ;;  %v2593_v7 = vadd.f32 %v8287_v52, %v2459_v48  ;;  %v3340_v43 = vpop.f32.mrf.mxu3 }
 0x307   : > { %v5161_v6 = vsel %vm1669_vm11, %v8089_v0, %v5784_v21  ;;  %v3897_v42 = vrot.slane %v3896_v5, 1  ;;  %v8596_v49 = vunpack.i.h.bf16 %v8092_v36  ;;  %v3451_v56 = vmax.f32 %v3419_v3, 0.0 }
 0x308   : > { %v4128_v15 = vmul.f32 %v3884_v30, %v7270_v31  ;;  %v3904_v28 = vrot.slane %v3903_v12, 1  ;;  %v3385_v44 = vadd.f32 %v3338_v9, %v2593_v7  ;;  %v3420_v52 = vadd.f32 %v7973_v8, %v3384_v41 }
 0x309   : > { %v5162_v38 = vsel %vm1669_vm11, %v4978_v18, %v8596_v49  ;;  %v3910_v1 = vadd.f32 %v3909_v20, %v3908_v46  ;;  %v3916_v34 = vrot.slane %v3915_v35, 2  ;;  %v3922_v23 = vadd.f32 %v3921_v19, %v3920_v58  ;;  %v8331_v58 = vld [vmem:[%s8535_s4] ss:$0 sm:$0xff] }
 0x30a   : > { %v5168_v16 = vpack.c.bf16 %v5162_v38, %v5161_v6  ;;  %v4127_v0 = vmul.f32 %v3877_v4, %v7270_v31  ;;  %v3421_v36 = vadd.f32 %v7973_v8, %v3385_v44  ;;  %v2595_v21 = vadd.f32 %v2594_v26, %v2461_v60  ;;  %v8325_v26 = vpop.permute.xlu2 %5787 }
 0x30b   : > { %v4129_v61 = vmul.f32 %v3891_v10, %v7270_v31  ;;  %v3898_v14 = vadd.f32 %v3897_v42, %v3896_v5  ;;  %v3911_v32 = vrot.slane %v3910_v1, 1  ;;  %v3917_v27 = vadd.f32 %v3916_v34, %v3915_v35 }
 0x30c   : > { %5501 = vmatmul.msk.bf16.gmra.mxu0 %vm2358_vm13, %v5168_v16  ;;  %v3923_v48 = vrot.slane %v3922_v23, 2  ;;  %v3453_v63 = vmax.f32 %v3421_v36, 0.0  ;;  %v3905_v17 = vadd.f32 %v3904_v28, %v3903_v12  ;;  %v4979_v25 = vsel %vm4944_vm1, %v4128_v15, %v4127_v0 }
 0x30d   : > { %v3386_v50 = vadd.f32 %v3340_v43, %v2595_v21  ;;  %v3493_v11 = vsel %vm1669_vm11, %v3451_v56, 0.0  ;;  %v3452_v33 = vmax.f32 %v3420_v52, 0.0  ;;  %v3912_v13 = vadd.f32 %v3911_v32, %v3910_v1  ;;  %v2464_v9 = vpop.f32.mrf.mxu1  ;;  %v8335_v46 = vpop.f32.mrf.mxu2 }
 0x30e   : > { %v3924_v53 = vadd.f32 %v3923_v48, %v3922_v23  ;;  %v3494_v8 = vsel %vm1669_vm11, %v3453_v63, 0.0  ;;  %v3918_v51 = vrot.slane %v3917_v27, 1  ;;  %v4980_v54 = vsel %vm4946_vm2, %v4129_v61, %v4979_v25  ;;  %v3343_v40 = vpop.f32.mrf.mxu3 }
 0x30f   : > { %v3422_v57 = vadd.f32 %v8331_v58, %v3386_v50  ;;  %v3495_v29 = vadd.f32 %v3494_v8, %v3493_v11  ;;  %v4130_v22 = vmul.f32 %v3898_v14, %v7270_v31  ;;  %v5790_v55 = vunpack.i.h.bf16 %v8325_v26 }
 0x310   : > { %v4131_v62 = vmul.f32 %v3905_v17, %v7270_v31  ;;  %v2598_v47 = vadd.f32 %v2597_v2, %v2464_v9  ;;  %v3496_v59 = vsel %vm1669_vm11, %v3452_v33, 0.0  ;;  %v3925_v5 = vrot.slane %v3924_v53, 1 }
 0x311   : > { %v3454_v3 = vmax.f32 %v3422_v57, 0.0  ;;  %v3528_v39 = vmul.f32 %v7270_v31, %v3495_v29  ;;  %v4981_v19 = vsel %vm4948_vm3, %v4130_v22, %v4980_v54  ;;  %v3919_v12 = vadd.f32 %v3918_v51, %v3917_v27 }
 0x312   : > { %v4132_v35 = vmul.f32 %v3912_v13, %v7270_v31  ;;  %v3387_v24 = vadd.f32 %v3343_v40, %v2598_v47  ;;  %v5789_v4 = vunpack.i.l.bf16 %v8325_v26  ;;  %v4982_v10 = vsel %vm4950_vm4, %v4131_v62, %v4981_v19 }
 0x313   : > { %v3497_v37 = vsel %vm1669_vm11, %v3454_v3, 0.0  ;;  %v3580_v30 = vrot.slane %v3528_v39, 2  ;;  %v3581_v20 = vrot.slane %v3528_v39, 4  ;;  %v3582_v45 = vrot.slane %v3528_v39, 6 }
 0x314   : > { %v3927_v41 = vsel %vm3646_vm8, %v3528_v39, 0.0  ;;  %v3498_v18 = vadd.f32 %v3497_v37, %v3496_v59  ;;  %v3926_v49 = vadd.f32 %v3925_v5, %v3924_v53  ;;  %v8351_v28 = vmul.f32 %v3919_v12, %v7270_v31 }
 0x315   : > { %v3928_v60 = vrot.slane %v3927_v41, 4  ;;  %v3934_v7 = vsel %vm3646_vm8, %v3580_v30, 0.0  ;;  %v3941_v6 = vsel %vm3646_vm8, %v3581_v20, 0.0  ;;  %v3948_v42 = vsel %vm3646_vm8, %v3582_v45, 0.0  ;;  %v2466_v38 = vpop.f32.mrf.mxu1  ;;  %v2602_v1 = vpop.f32.mrf.mxu2 }
 0x316   : > { %v3935_v2 = vrot.slane %v3934_v7, 4  ;;  %v3942_v43 = vrot.slane %v3941_v6, 4  ;;  %v3949_v15 = vrot.slane %v3948_v42, 4  ;;  %v8354_v16 = vsel %vm4952_vm5, %v4132_v35, %v4982_v10  ;;  %v3345_v34 = vpop.f32.mrf.mxu3 }
 0x317   : > { %v3929_v56 = vadd.f32 %v3928_v60, %v3927_v41  ;;  %v3529_v44 = vmul.f32 %v7270_v31, %v3498_v18  ;;  %v8358_v52 = vadd.f32 %v8331_v58, %v3387_v24  ;;  %v8361_v61 = vmul.f32 %v3926_v49, %v7270_v31 }
 0x318   : > { %v3936_v0 = vadd.f32 %v3935_v2, %v3934_v7  ;;  %v3943_v36 = vadd.f32 %v3942_v43, %v3941_v6  ;;  %v3950_v21 = vadd.f32 %v3949_v15, %v3948_v42  ;;  %v2600_v59 = vadd.f32 %v8335_v46, %v2466_v38 }
 0x319   : > { %v3930_v23 = vrot.slane %v3929_v56, 2  ;;  %v3583_v14 = vrot.slane %v3529_v44, 2  ;;  %v3584_v32 = vrot.slane %v3529_v44, 4  ;;  %v3585_v27 = vrot.slane %v3529_v44, 6 }
 0x31a   : > { %v3937_v63 = vrot.slane %v3936_v0, 2  ;;  %v3944_v17 = vrot.slane %v3943_v36, 2  ;;  %v3951_v25 = vrot.slane %v3950_v21, 2  ;;  %v3955_v50 = vsel %vm3646_vm8, %v3529_v44, 0.0 }
 0x31b   : > { %v3931_v48 = vadd.f32 %v3930_v23, %v3929_v56  ;;  %v3962_v11 = vsel %vm3646_vm8, %v3583_v14, 0.0  ;;  %v3969_v33 = vsel %vm3646_vm8, %v3584_v32, 0.0  ;;  %v3976_v13 = vsel %vm3646_vm8, %v3585_v27, 0.0 }
 0x31c   : > { %v3938_v9 = vadd.f32 %v3937_v63, %v3936_v0  ;;  %v3945_v8 = vadd.f32 %v3944_v17, %v3943_v36  ;;  %v3952_v51 = vadd.f32 %v3951_v25, %v3950_v21  ;;  %v3956_v54 = vrot.slane %v3955_v50, 4 }
 0x31d   : > { %v3932_v53 = vrot.slane %v3931_v48, 1  ;;  %v3963_v57 = vrot.slane %v3962_v11, 4  ;;  %v3970_v29 = vrot.slane %v3969_v33, 4  ;;  %v3977_v22 = vrot.slane %v3976_v13, 4  ;;  %v2469_v40 = vpop.f32.mrf.mxu1  ;;  %v2604_v35 = vpop.f32.mrf.mxu2 }
 0x31e   : > { %v3939_v3 = vrot.slane %v3938_v9, 1  ;;  %v3946_v47 = vrot.slane %v3945_v8, 1  ;;  %v3957_v39 = vadd.f32 %v3956_v54, %v3955_v50  ;;  %v3348_v37 = vpop.f32.mrf.mxu3  ;;  %v3953_v20 = vrot.slane %v3952_v51, 1 }
 0x31f   : > { %v3933_v62 = vadd.f32 %v3932_v53, %v3931_v48  ;;  %v3964_v5 = vadd.f32 %v3963_v57, %v3962_v11  ;;  %v3971_v19 = vadd.f32 %v3970_v29, %v3969_v33  ;;  %v3978_v12 = vadd.f32 %v3977_v22, %v3976_v13 }
 0x320   : > { %v3940_v24 = vadd.f32 %v3939_v3, %v3938_v9  ;;  %v3947_v30 = vadd.f32 %v3946_v47, %v3945_v8  ;;  %v3958_v41 = vrot.slane %v3957_v39, 2  ;;  %v3388_v46 = vadd.f32 %v3345_v34, %v2600_v59 }
 0x321   : > { %v4135_v45 = vmul.f32 %v3933_v62, %v7270_v31  ;;  %v3965_v60 = vrot.slane %v3964_v5, 2  ;;  %v3972_v10 = vrot.slane %v3971_v19, 2  ;;  %v3979_v18 = vrot.slane %v3978_v12, 2 }
 0x322   : > { %v4136_v7 = vmul.f32 %v3940_v24, %v7270_v31  ;;  %v4137_v6 = vmul.f32 %v3947_v30, %v7270_v31  ;;  %v2603_v42 = vadd.f32 %v2602_v1, %v2469_v40  ;;  %v3959_v49 = vadd.f32 %v3958_v41, %v3957_v39 }
 0x323   : > { %v3966_v38 = vadd.f32 %v3965_v60, %v3964_v5  ;;  %v3973_v56 = vadd.f32 %v3972_v10, %v3971_v19  ;;  %v3980_v2 = vadd.f32 %v3979_v18, %v3978_v12  ;;  %v3954_v43 = vadd.f32 %v3953_v20, %v3952_v51 }
 0x324   : > { %v3455_v15 = vmax.f32 %v8358_v52, 0.0  ;;  %v3389_v44 = vadd.f32 %v3348_v37, %v2603_v42  ;;  %v4986_v23 = vsel %vm4944_vm1, %v4136_v7, %v4135_v45  ;;  %v3960_v0 = vrot.slane %v3959_v49, 1  ;;  %v8381_v52 = vld [vmem:[%s8537_s6] ss:$0 sm:$0xff] }
 0x325   : > { %v3967_v36 = vrot.slane %v3966_v38, 1  ;;  %v2471_v21 = vpop.f32.mrf.mxu1  ;;  %v3974_v14 = vrot.slane %v3973_v56, 1  ;;  %v3981_v32 = vrot.slane %v3980_v2, 1  ;;  %v4984_v1 = vsel %vm4954_vm6, %v8351_v28, %v8354_v16  ;;  %v2607_v8 = vpop.f32.mrf.mxu2 }
 0x326   : > { %v3424_v34 = vadd.f32 %v8331_v58, %v3388_v46  ;;  %v3425_v27 = vadd.f32 %v8331_v58, %v3389_v44  ;;  %v2605_v48 = vadd.f32 %v2604_v35, %v2471_v21  ;;  %v3961_v63 = vadd.f32 %v3960_v0, %v3959_v49  ;;  %v3350_v17 = vpop.f32.mrf.mxu3 }
 0x327   : > { %v3968_v25 = vadd.f32 %v3967_v36, %v3966_v38  ;;  %v3975_v50 = vadd.f32 %v3974_v14, %v3973_v56  ;;  %v4987_v11 = vsel %vm4946_vm2, %v4137_v6, %v4986_v23  ;;  %v3982_v28 = vadd.f32 %v3981_v32, %v3980_v2 }
 0x328   : > { %v3457_v13 = vmax.f32 %v3425_v27, 0.0  ;;  %v3390_v53 = vadd.f32 %v3350_v17, %v2605_v48  ;;  %v4138_v16 = vmul.f32 %v3954_v43, %v7270_v31  ;;  %v3499_v9 = vsel %vm1669_vm11, %v3455_v15, 0.0 }
 0x329   : > { %v5211_v33 = vpop.f32.mrf.mxu0  ;;  %v4139_v51 = vmul.f32 %v3961_v63, %v7270_v31  ;;  %v4140_v54 = vmul.f32 %v3968_v25, %v7270_v31  ;;  %v4141_v57 = vmul.f32 %v3975_v50, %v7270_v31  ;;  %v3456_v3 = vmax.f32 %v3424_v34, 0.0 }
 0x32a   : > { %v3500_v29 = vsel %vm1669_vm11, %v3457_v13, 0.0  ;;  %v3426_v22 = vadd.f32 %v8331_v58, %v3390_v53  ;;  %v4988_v40 = vsel %vm4948_vm3, %v4138_v16, %v4987_v11  ;;  %v5212_v62 = vadd.f32 %v8381_v52, %v5211_v33 }
 0x32b   : > { %v3501_v47 = vadd.f32 %v3500_v29, %v3499_v9  ;;  %v4989_v59 = vsel %vm4950_vm4, %v4139_v51, %v4988_v40  ;;  %v4142_v5 = vmul.f32 %v3982_v28, %v7270_v31  ;;  %v4985_v35 = vsel %vm4956_vm7, %v8361_v61, %v4984_v1 }
 0x32c   : > { %v3458_v39 = vmax.f32 %v3426_v22, 0.0  ;;  %v4990_v19 = vsel %vm4952_vm5, %v4140_v54, %v4989_v59  ;;  %v5231_v12 = vmax.f32 %v5212_v62, 0.0  ;;  %v5163_v61 = vsel %vm1669_vm11, %v4985_v35, %v5789_v4 }
 0x32d   : > { %v3530_v37 = vmul.f32 %v7270_v31, %v3501_v47  ;;  %v2474_v24 = vpop.f32.mrf.mxu1  ;;  %v4991_v30 = vsel %vm4954_vm6, %v4141_v57, %v4990_v19  ;;  %v3502_v18 = vsel %vm1669_vm11, %v3456_v3, 0.0  ;;  %v2609_v2 = vpop.f32.mrf.mxu2 }
 0x32e   : > { %v3503_v20 = vsel %vm1669_vm11, %v3458_v39, 0.0  ;;  %v4992_v45 = vsel %vm4956_vm7, %v4142_v5, %v4991_v30  ;;  %5240 = vst.msk [vmem:[%s8403_s29] sm:$0xff] %vm5239_vm0, %v5231_v12  ;;  %v3353_v10 = vpop.f32.mrf.mxu3  ;;  %v2608_v21 = vadd.f32 %v2607_v8, %v2474_v24 }
 0x32f   : > { %v3586_v41 = vrot.slane %v3530_v37, 2  ;;  %v3587_v60 = vrot.slane %v3530_v37, 4  ;;  %v5164_v7 = vsel %vm1669_vm11, %v4992_v45, %v5790_v55  ;;  %v3588_v6 = vrot.slane %v3530_v37, 6 }
 0x330   : > { %v3983_v46 = vsel %vm3646_vm8, %v3530_v37, 0.0  ;;  %v3504_v42 = vadd.f32 %v3503_v20, %v3502_v18  ;;  %v5169_v49 = vpack.c.bf16 %v5164_v7, %v5163_v61  ;;  %v3391_v34 = vadd.f32 %v3353_v10, %v2608_v21 }
 0x331   : > { %v3990_v38 = vsel %vm3646_vm8, %v3586_v41, 0.0  ;;  %v3997_v56 = vsel %vm3646_vm8, %v3587_v60, 0.0  ;;  %v3984_v43 = vrot.slane %v3983_v46, 4  ;;  %v4004_v15 = vsel %vm3646_vm8, %v3588_v6, 0.0  ;;  %v5213_v27 = vpop.f32.mrf.mxu0 }
 0x332   : > { %5502 = vmatmul.msk.bf16.gmra.mxu0 %vm2358_vm13, %v5169_v49  ;;  %v3991_v4 = vrot.slane %v3990_v38, 4  ;;  %v3531_v26 = vmul.f32 %v7270_v31, %v3504_v42  ;;  %v3998_v55 = vrot.slane %v3997_v56, 4  ;;  %v4005_v36 = vrot.slane %v4004_v15, 4 }
 0x333   : > { %v3985_v0 = vadd.f32 %v3984_v43, %v3983_v46  ;;  %v5214_v53 = vadd.f32 %v8381_v52, %v5213_v27  ;;  %v3427_v9 = vadd.f32 %v8331_v58, %v3391_v34 }
 0x334   : > { %v3992_v14 = vadd.f32 %v3991_v4, %v3990_v38  ;;  %v3589_v32 = vrot.slane %v3531_v26, 2  ;;  %v3999_v1 = vadd.f32 %v3998_v55, %v3997_v56  ;;  %v4011_v48 = vsel %vm3646_vm8, %v3531_v26, 0.0 }
 0x335   : > { %v2476_v44 = vpop.f32.mrf.mxu1  ;;  %v3986_v63 = vrot.slane %v3985_v0, 2  ;;  %v4006_v17 = vadd.f32 %v4005_v36, %v4004_v15  ;;  %v3590_v50 = vrot.slane %v3531_v26, 4  ;;  %v2612_v33 = vpop.f32.mrf.mxu2  ;;  %v4012_v16 = vrot.slane %v4011_v48, 4 }
 0x336   : > { %v3355_v23 = vpop.f32.mrf.mxu3  ;;  %v3993_v25 = vrot.slane %v3992_v14, 2  ;;  %v4018_v11 = vsel %vm3646_vm8, %v3589_v32, 0.0  ;;  %v4000_v28 = vrot.slane %v3999_v1, 2  ;;  %v5232_v54 = vmax.f32 %v5214_v53, 0.0 }
 0x337   : > { %v3591_v57 = vrot.slane %v3531_v26, 6  ;;  %v4019_v29 = vrot.slane %v4018_v11, 4  ;;  %v3987_v40 = vadd.f32 %v3986_v63, %v3985_v0  ;;  %v4007_v3 = vrot.slane %v4006_v17, 2 }
 0x338   : > { %v3994_v62 = vadd.f32 %v3993_v25, %v3992_v14  ;;  %v4025_v47 = vsel %vm3646_vm8, %v3590_v50, 0.0  ;;  %5241 = vst.msk [vmem:[%s8403_s29 + $0x8] sm:$0xff] %vm5239_vm0, %v5232_v54  ;;  %v4001_v59 = vadd.f32 %v4000_v28, %v3999_v1  ;;  %v4013_v39 = vadd.f32 %v4012_v16, %v4011_v48 }
 0x339   : > { %v3459_v5 = vmax.f32 %v3427_v9, 0.0  ;;  %v2610_v12 = vadd.f32 %v2609_v2, %v2476_v44  ;;  %v4020_v35 = vadd.f32 %v4019_v29, %v4018_v11  ;;  %v4026_v37 = vrot.slane %v4025_v47, 4 }
 0x33a   : > { %v4032_v24 = vsel %vm3646_vm8, %v3591_v57, 0.0  ;;  %v3988_v20 = vrot.slane %v3987_v40, 1  ;;  %v3995_v45 = vrot.slane %v3994_v62, 1  ;;  %v4008_v41 = vadd.f32 %v4007_v3, %v4006_v17 }
 0x33b   : > { %v3392_v60 = vadd.f32 %v3355_v23, %v2610_v12  ;;  %v4002_v61 = vrot.slane %v4001_v59, 1  ;;  %v4014_v18 = vrot.slane %v4013_v39, 2  ;;  %v3505_v7 = vsel %vm1669_vm11, %v3459_v5, 0.0 }
 0x33c   : > { %v4021_v49 = vrot.slane %v4020_v35, 2  ;;  %v4027_v38 = vadd.f32 %v4026_v37, %v4025_v47  ;;  %v4033_v56 = vrot.slane %v4032_v24, 4  ;;  %v3989_v43 = vadd.f32 %v3988_v20, %v3987_v40 }
 0x33d   : > { %v2479_v13 = vpop.f32.mrf.mxu1  ;;  %v2614_v46 = vpop.f32.mrf.mxu2  ;;  %v4009_v4 = vrot.slane %v4008_v41, 1  ;;  %v3428_v15 = vadd.f32 %v8331_v58, %v3392_v60  ;;  %v3996_v55 = vadd.f32 %v3995_v45, %v3994_v62  ;;  %v4003_v23 = vadd.f32 %v4002_v61, %v4001_v59 }
 0x33e   : > { %v2613_v8 = vadd.f32 %v2612_v33, %v2479_v13  ;;  %v3358_v51 = vpop.f32.mrf.mxu3  ;;  %v4015_v0 = vadd.f32 %v4014_v18, %v4013_v39  ;;  %v4022_v27 = vadd.f32 %v4021_v49, %v4020_v35  ;;  %v4028_v48 = vrot.slane %v4027_v38, 2 }
 0x33f   : > { %v3460_v17 = vmax.f32 %v3428_v15, 0.0  ;;  %v4144_v16 = vmul.f32 %v3996_v55, %v7270_v31  ;;  %v4034_v62 = vadd.f32 %v4033_v56, %v4032_v24  ;;  %v4145_v35 = vmul.f32 %v4003_v23, %v7270_v31 }
 0x340   : > { %v3393_v22 = vadd.f32 %v3358_v51, %v2613_v8  ;;  %v4016_v9 = vrot.slane %v4015_v0, 1  ;;  %v4010_v8 = vadd.f32 %v4009_v4, %v4008_v41  ;;  %v4029_v40 = vadd.f32 %v4028_v48, %v4027_v38 }
 0x341   : > { %v3508_v47 = vsel %vm1669_vm11, %v3460_v17, 0.0  ;;  %v4035_v24 = vrot.slane %v4034_v62, 2 }
 0x342   : > { %v3429_v19 = vadd.f32 %v8331_v58, %v3393_v22  ;;  %v4023_v22 = vrot.slane %v4022_v27, 1  ;;  %v4017_v12 = vadd.f32 %v4016_v9, %v4015_v0  ;;  %v4146_v41 = vmul.f32 %v4010_v8, %v7270_v31 }
 0x344   : > { %v3461_v30 = vmax.f32 %v3429_v19, 0.0  ;;  %v4143_v19 = vmul.f32 %v3989_v43, %v7270_v31  ;;  %v4024_v60 = vadd.f32 %v4023_v22, %v4022_v27  ;;  %v4147_v4 = vmul.f32 %v4017_v12, %v7270_v31 }
 0x345   : > { %v2481_v10 = vpop.f32.mrf.mxu1 }
 0x346   : > { %v3506_v6 = vsel %vm1669_vm11, %v3461_v30, 0.0  ;;  %v2615_v2 = vadd.f32 %v2614_v46, %v2481_v10  ;;  %v3360_v44 = vpop.f32.mrf.mxu3  ;;  %v4993_v10 = vsel %vm4944_vm1, %v4144_v16, %v4143_v19  ;;  %v4030_v46 = vrot.slane %v4029_v40, 1 }
 0x347   : > { %v3507_v42 = vadd.f32 %v3506_v6, %v3505_v7  ;;  %v4994_v15 = vsel %vm4946_vm2, %v4145_v35, %v4993_v10 }
 0x348   : > { %v3394_v36 = vadd.f32 %v3360_v44, %v2615_v2 }
 0x349   : > { %v3532_v26 = vmul.f32 %v7270_v31, %v3507_v42 }
 0x34a   : > { %v3430_v63 = vadd.f32 %v8331_v58, %v3394_v36  ;;  %v4036_v36 = vadd.f32 %v4035_v24, %v4034_v62 }
 0x34b   : > { %v3592_v21 = vrot.slane %v3532_v26, 2  ;;  %v3593_v14 = vrot.slane %v3532_v26, 4  ;;  %v3594_v32 = vrot.slane %v3532_v26, 6  ;;  %v4039_v1 = vsel %vm3646_vm8, %v3532_v26, 0.0 }
 0x34c   : > { %v4040_v34 = vrot.slane %v4039_v1, 4  ;;  %v3462_v51 = vmax.f32 %v3430_v63, 0.0 }
 0x34d   : > { %v4046_v25 = vsel %vm3646_vm8, %v3592_v21, 0.0  ;;  %v4053_v50 = vsel %vm3646_vm8, %v3593_v14, 0.0  ;;  %v4060_v11 = vsel %vm3646_vm8, %v3594_v32, 0.0 }
 0x34e   : > { %v4041_v33 = vadd.f32 %v4040_v34, %v4039_v1  ;;  %v4047_v13 = vrot.slane %v4046_v25, 4  ;;  %v4054_v53 = vrot.slane %v4053_v50, 4  ;;  %v4061_v28 = vrot.slane %v4060_v11, 4 }
 0x34f   : > { %v3509_v3 = vsel %vm1669_vm11, %v3462_v51, 0.0  ;;  %v4995_v1 = vsel %vm4948_vm3, %v4146_v41, %v4994_v15 }
 0x350   : > { %v4042_v54 = vrot.slane %v4041_v33, 2  ;;  %v4048_v57 = vadd.f32 %v4047_v13, %v4046_v25  ;;  %v4055_v29 = vadd.f32 %v4054_v53, %v4053_v50  ;;  %v4062_v58 = vadd.f32 %v4061_v28, %v4060_v11 }
 0x351   : > { %v3510_v37 = vadd.f32 %v3509_v3, %v3508_v47  ;;  %v4031_v50 = vadd.f32 %v4030_v46, %v4029_v40  ;;  %v4148_v11 = vmul.f32 %v4024_v60, %v7270_v31  ;;  %v4037_v28 = vrot.slane %v4036_v36, 1 }
 0x352   : > { %v4043_v59 = vadd.f32 %v4042_v54, %v4041_v33  ;;  %v4049_v39 = vrot.slane %v4048_v57, 2  ;;  %v4056_v5 = vrot.slane %v4055_v29, 2  ;;  %v4063_v45 = vrot.slane %v4062_v58, 2 }
 0x353   : > { %v3533_v61 = vmul.f32 %v7270_v31, %v3510_v37  ;;  %v4996_v51 = vsel %vm4950_vm4, %v4147_v4, %v4995_v1  ;;  %v4149_v62 = vmul.f32 %v4031_v50, %v7270_v31 }
 0x354   : > { %v4050_v30 = vadd.f32 %v4049_v39, %v4048_v57  ;;  %v4057_v20 = vadd.f32 %v4056_v5, %v4055_v29  ;;  %v4044_v18 = vrot.slane %v4043_v59, 1  ;;  %v4064_v43 = vadd.f32 %v4063_v45, %v4062_v58 }
 0x355   : > { %v3595_v42 = vrot.slane %v3533_v61, 2  ;;  %v3596_v49 = vrot.slane %v3533_v61, 4  ;;  %v3597_v38 = vrot.slane %v3533_v61, 6  ;;  %v4067_v56 = vsel %vm3646_vm8, %v3533_v61, 0.0 }
 0x356   : > { %v4051_v7 = vrot.slane %v4050_v30, 1  ;;  %v4058_v6 = vrot.slane %v4057_v20, 1  ;;  %v4068_v26 = vrot.slane %v4067_v56, 4  ;;  %v4045_v0 = vadd.f32 %v4044_v18, %v4043_v59 }
 0x357   : > { %v4074_v44 = vsel %vm3646_vm8, %v3595_v42, 0.0  ;;  %v4081_v55 = vsel %vm3646_vm8, %v3596_v49, 0.0  ;;  %v4088_v23 = vsel %vm3646_vm8, %v3597_v38, 0.0  ;;  %v4065_v48 = vrot.slane %v4064_v43, 1 }
 0x358   : > { %v4052_v2 = vadd.f32 %v4051_v7, %v4050_v30  ;;  %v4075_v21 = vrot.slane %v4074_v44, 4  ;;  %v4082_v14 = vrot.slane %v4081_v55, 4  ;;  %v4059_v32 = vadd.f32 %v4058_v6, %v4057_v20 }
 0x359   : > { %v4069_v34 = vadd.f32 %v4068_v26, %v4067_v56  ;;  %v4089_v27 = vrot.slane %v4088_v23, 4  ;;  %v4151_v53 = vmul.f32 %v4045_v0, %v7270_v31  ;;  %v4066_v29 = vadd.f32 %v4065_v48, %v4064_v43 }
 0x35a   : > { %v4152_v63 = vmul.f32 %v4052_v2, %v7270_v31  ;;  %v4076_v17 = vadd.f32 %v4075_v21, %v4074_v44  ;;  %v4083_v25 = vadd.f32 %v4082_v14, %v4081_v55  ;;  %v4153_v8 = vmul.f32 %v4059_v32, %v7270_v31 }
 0x35b   : > { %v4070_v33 = vrot.slane %v4069_v34, 2  ;;  %v4090_v13 = vadd.f32 %v4089_v27, %v4088_v23  ;;  %v4038_v59 = vadd.f32 %v4037_v28, %v4036_v36  ;;  %v4997_v39 = vsel %vm4952_vm5, %v4148_v11, %v4996_v51 }
 0x35c   : > { %v4077_v16 = vrot.slane %v4076_v17, 2  ;;  %v4084_v9 = vrot.slane %v4083_v25, 2  ;;  %v5000_v40 = vsel %vm4944_vm1, %v4152_v63, %v4151_v53  ;;  %v4154_v45 = vmul.f32 %v4066_v29, %v7270_v31 }
 0x35d   : > { %v4071_v54 = vadd.f32 %v4070_v33, %v4069_v34  ;;  %v4091_v57 = vrot.slane %v4090_v13, 2  ;;  %v5001_v37 = vsel %vm4946_vm2, %v4153_v8, %v5000_v40  ;;  %v4998_v41 = vsel %vm4954_vm6, %v4149_v62, %v4997_v39 }
 0x35e   : > { %v4078_v58 = vadd.f32 %v4077_v16, %v4076_v17  ;;  %v4085_v22 = vadd.f32 %v4084_v9, %v4083_v25  ;;  %v4150_v10 = vmul.f32 %v4038_v59, %v7270_v31  ;;  %v5002_v6 = vsel %vm4948_vm3, %v4154_v45, %v5001_v37 }
 0x35f   : > { %v4072_v3 = vrot.slane %v4071_v54, 1  ;;  %v4092_v47 = vadd.f32 %v4091_v57, %v4090_v13 }
 0x360   : > { %v4079_v5 = vrot.slane %v4078_v58, 1  ;;  %v4086_v19 = vrot.slane %v4085_v22, 1  ;;  %v4999_v38 = vsel %vm4956_vm7, %v4150_v10, %v4998_v41 }
 0x361   : > { %v4073_v12 = vadd.f32 %v4072_v3, %v4071_v54  ;;  %v4093_v35 = vrot.slane %v4092_v47, 1 }
 0x362   : > { %v4080_v30 = vadd.f32 %v4079_v5, %v4078_v58  ;;  %v4087_v20 = vadd.f32 %v4086_v19, %v4085_v22 }
 0x363   : > { %v4094_v60 = vadd.f32 %v4093_v35, %v4092_v47  ;;  %v4155_v24 = vmul.f32 %v4073_v12, %v7270_v31 }
 0x364   : > { %v4156_v18 = vmul.f32 %v4080_v30, %v7270_v31  ;;  %v4157_v7 = vmul.f32 %v4087_v20, %v7270_v31 }
 0x365   : > { %v5793_v61 = vpop.permute.xlu0 %5792  ;;  %v5003_v49 = vsel %vm4950_vm4, %v4155_v24, %v5002_v6  ;;  %v4158_v56 = vmul.f32 %v4094_v60, %v7270_v31 }
 0x366   : > { %v5795_v46 = vunpack.i.h.bf16 %v5793_v61  ;;  %v5794_v42 = vunpack.i.l.bf16 %v5793_v61  ;;  %v5004_v2 = vsel %vm4952_vm5, %v4156_v18, %v5003_v49 }
 0x367   : > { %v5005_v43 = vsel %vm4954_vm6, %v4157_v7, %v5004_v2 }
 0x368   : > { %v5006_v4 = vsel %vm4956_vm7, %v4158_v56, %v5005_v43  ;;  %v5165_v15 = vsel %vm1669_vm11, %v4999_v38, %v5794_v42 }
 0x369   : > { %v5166_v26 = vsel %vm1669_vm11, %v5006_v4, %v5795_v46 }
 0x36a   : > { %v5170_v44 = vpack.c.bf16 %v5166_v26, %v5165_v15 }
 0x36c   : > { %5503 = vmatmul.msk.bf16.gmra.mxu0 %vm2358_vm13, %v5170_v44 }
 0x389   : > { %v5216_v55 = vpop.f32.mrf.mxu0 }
 0x38a   : > { %v5217_v23 = vadd.f32 %v8381_v52, %v5216_v55 }
 0x38c   : > { %v5233_v0 = vmax.f32 %v5217_v23, 0.0 }
 0x38e   : > { %5242 = vst.msk [vmem:[%s8403_s29 + $0x10] sm:$0xff] %vm5239_vm0, %v5233_v0 }
 0x391   : > { %v5218_v31 = vpop.f32.mrf.mxu0 }
 0x392   : > { %v5219_v36 = vadd.f32 %v8381_v52, %v5218_v31 }
 0x394   : > { %v5234_v21 = vmax.f32 %v5219_v36, 0.0 }
 0x396   : > { %5243 = vst.msk [vmem:[%s8403_s29 + $0x18] sm:$0xff] %vm5239_vm0, %v5234_v21 }
 0x3af   : > { %v5221_v14 = vpop.f32.mrf.mxu0 }
 0x3b0   : > { %v5222_v32 = vadd.f32 %v8381_v52, %v5221_v14 }
 0x3b2   : > { %v5235_v1 = vmax.f32 %v5222_v32, 0.0 }
 0x3b4   : > { %5244 = vst.msk [vmem:[%s8403_s29 + $0x20] sm:$0xff] %vm5239_vm0, %v5235_v1 }
 0x3b7   : > { %v5223_v34 = vpop.f32.mrf.mxu0 }
 0x3b8   : > { %v5224_v27 = vadd.f32 %v8381_v52, %v5223_v34 }
 0x3ba   : > { %v5236_v48 = vmax.f32 %v5224_v27, 0.0 }
 0x3bc   : > { %5245 = vst.msk [vmem:[%s8403_s29 + $0x28] sm:$0xff] %vm5239_vm0, %v5236_v48 }
 0x3e9   : > { %v5226_v63 = vpop.f32.mrf.mxu0 }
 0x3ea   : > { %v5227_v17 = vadd.f32 %v8381_v52, %v5226_v63 }
 0x3ec   : > { %v5237_v25 = vmax.f32 %v5227_v17, 0.0 }
 0x3ee   : > { %5246 = vst.msk [vmem:[%s8403_s29 + $0x30] sm:$0xff] %vm5239_vm0, %v5237_v25 }
 0x3f1   : > { %v5228_v50 = vpop.f32.mrf.mxu0 }
 0x3f2   : > { %v5229_v11 = vadd.f32 %v8381_v52, %v5228_v50 }
 0x3f4   : > { %v5238_v33 = vmax.f32 %v5229_v11, 0.0 }
 0x3f6   : > { %5247 = vst.msk [vmem:[%s8403_s29 + $0x38] sm:$0xff] %vm5239_vm0, %v5238_v33 }
 0x3f7   : > { %5939 = shalt.err (!%p5936_p4)
}
 0x3f8   : > { %s5989_s22 = smov 128  }
 0x3f9   : > { %5725 = dma.vmem_to_hbm [thread:$0]  (%p6080_p11), %s5262_s8, 1024, %s5264_s17, %s5249_s11, %s5989_s22, %s5989_s22, %s5986_s12  }
 0x3fa PF: > { %s5278_s29 = sand.u32 1, %s5969_s24   ;;  %p8597_p7 = scmp.ge.s32.totalorder %s5981_s27, 2 }
 0x3fb   : > { %s5279_s9 = scalar_lea.sflag [#allocation5], %s5278_s29 }
 0x3fc   : > { %p5732_p5 = pnand %p8597_p7, %p6084_p12 }
 0x3fe   : > { %p5733_p8 = pneg %p5732_p5 }
 0x400   : > { %5961 = dma.done.wait (%p5733_p8), %s5279_s9, 1024  }
 0x401   : > { %5963 = vsyncadd (%p5733_p8), %s5279_s9, 4294966272  ;;  %s8598_s21 = sld [smem:[#allocation9_spill]]  ;;  %p20_p10 = scmp.ge.s32.totalorder %s6055_s30, 4  }
 0x402   : > { %s8599_s24 = smov %s5973_s25  ;;  %s8600_s25 = smov %s5977_s26 }
 0x403   : > { %s8602_s27 = smov %s6055_s30  ;;  %22 = sbr.rel (!%p20_p10) target bundleno = 5 (0x5), region = 97 }
 0x407   : > { %s8601_s26 = smov %s8598_s21 }
 0x408   :  { %5285 = vsyncpa [#allocation4], 1 }
 0x409   :  { %5287 = vsyncpa [#allocation4 + $0x1], 1 }
 0x40a   :  { %5288 = vsyncpa [#allocation5], 1 }
 0x40b   :  { %5290 = vsyncpa [#allocation5 + $0x1], 1 }

</bundles_post_ra>
